<compile_context>
chip_gen: v6e
topology: v6e:2x2x1
jax: 0.10.0
libtpu: 0.0.40
codegen_flags: <defaults>
</compile_context>

<pallas_src>
import functools

import jax
import jax.numpy as jnp
from jax.experimental import pallas as pl
from jax.experimental.pallas import tpu as pltpu


def _round_up(x, m):
    return ((x + m - 1) // m) * m


# -----------------------------------------------------------------------------
# Pallas kernels
# -----------------------------------------------------------------------------
def _max4_kernel(a_ref, b_ref, c_ref, d_ref, o_ref):
    """Elementwise max of four tensors (2x2 max pool on pre-strided views)."""
    o_ref[...] = jnp.maximum(
        jnp.maximum(a_ref[...], b_ref[...]),
        jnp.maximum(c_ref[...], d_ref[...]),
    )


def _conv3x3_flat_kernel(x_ref, w_ref, b_ref, o_ref, *, tap_offsets, m_out):
    """Fused 3x3 conv + bias + ReLU on a row-flattened padded activation.

    x_ref: (1, M_in, Cin)  bf16 -- padded image, rows flattened (row stride Wq)
    w_ref: (9, Cin, Cp)    bf16 -- one (Cin, Cp) matrix per tap
    b_ref: (1, Cp)         f32
    o_ref: (1, m_out, Cp)       -- m_out = H_out * Wq; the 2 rightmost columns
                                   of each (H_out, Wq) row are garbage and are
                                   sliced off by the caller.
    """
    acc = jnp.dot(
        x_ref[0, pl.ds(tap_offsets[0], m_out), :],
        w_ref[0],
        preferred_element_type=jnp.float32,
    )
    for t in range(1, 9):
        patch = x_ref[0, pl.ds(tap_offsets[t], m_out), :]
        acc = acc + jnp.dot(patch, w_ref[t], preferred_element_type=jnp.float32)
    y = jnp.maximum(acc + b_ref[...], 0.0)
    o_ref[0] = y.astype(o_ref.dtype)


# -----------------------------------------------------------------------------
# Pallas wrappers
# -----------------------------------------------------------------------------
def maxpool2x2_padded(x):
    """2x2 max pool of NHWC `x`, emitted directly in the conv-ready padded layout.

    x: (N, H, W, C), H and W even.  Returns (N, H//2 + 3, W//2 + 2, C): the
    pooled image surrounded by (top 1, bottom 2, left 1, right 1) zeros.
    """
    N, H, W, C = x.shape
    assert H % 2 == 0 and W % 2 == 0
    Hq, Wq = H // 2 + 3, W // 2 + 2
    xp = jnp.pad(x, ((0, 0), (2, 4), (2, 2), (0, 0)))
    a = xp[:, 0::2, 0::2, :]
    b = xp[:, 0::2, 1::2, :]
    c = xp[:, 1::2, 0::2, :]
    d = xp[:, 1::2, 1::2, :]
    spec = pl.BlockSpec((1, Hq, Wq, C), lambda n: (n, 0, 0, 0))
    return pl.pallas_call(
        _max4_kernel,
        out_shape=jax.ShapeDtypeStruct((N, Hq, Wq, C), x.dtype),
        grid=(N,),
        in_specs=[spec, spec, spec, spec],
        out_specs=spec,
        compiler_params=pltpu.CompilerParams(dimension_semantics=("parallel",)),
    )(a, b, c, d)


def conv3x3_flat(x_flat, w, b, *, wq, h_out, out_dtype):
    """Fused conv3x3 + bias + ReLU on a row-flattened padded activation.

    x_flat: (N, M_in, Cin) bf16, M_in = (h_out + 3) * wq (padded image rows
    flattened with row stride wq).  Returns (N, h_out * wq, Cp).
    """
    N, M_in, Cin = x_flat.shape
    nt, cin_w, Cp = w.shape
    assert nt == 9 and cin_w == Cin
    m_out = h_out * wq
    taps = tuple(dy * wq + dx for dy in range(3) for dx in range(3))
    assert taps[-1] + m_out <= M_in  # every tap window stays in-bounds

    kernel = functools.partial(
        _conv3x3_flat_kernel, tap_offsets=taps, m_out=m_out
    )
    return pl.pallas_call(
        kernel,
        out_shape=jax.ShapeDtypeStruct((N, m_out, Cp), out_dtype),
        grid=(N,),
        in_specs=[
            pl.BlockSpec((1, M_in, Cin), lambda n: (n, 0, 0)),
            pl.BlockSpec((9, Cin, Cp), lambda n: (0, 0, 0)),
            pl.BlockSpec((1, Cp), lambda n: (0, 0)),
        ],
        out_specs=pl.BlockSpec((1, m_out, Cp), lambda n: (n, 0, 0)),
        compiler_params=pltpu.CompilerParams(dimension_semantics=("parallel",)),
    )(x_flat, w, b.reshape(1, Cp))


# -----------------------------------------------------------------------------
# Down forward (MaxPool2d(2) -> Conv3x3+ReLU -> Conv3x3+ReLU)
# -----------------------------------------------------------------------------
def down_forward(x_nchw, w1, b1, w2, b2, *, cout):
    """x_nchw: (N, Cin, H, W) f32 -> (N, cout, H//2, W//2) f32."""
    x = jnp.transpose(x_nchw, (0, 2, 3, 1)).astype(jnp.bfloat16)  # NHWC bf16
    N, H, W, Cin = x.shape
    Ho, Wo = H // 2, W // 2
    Hq, Wq = Ho + 3, Wo + 2
    Cp = w1.shape[-1]

    # MaxPool2d(2), written directly in the padded layout conv1 expects.
    p = maxpool2x2_padded(x)                                   # (N, Hq, Wq, Cin)

    # Conv1 + bias + ReLU (bf16 output feeds conv2's bf16 MXU operands).
    y1 = conv3x3_flat(p.reshape(N, Hq * Wq, Cin), w1, b1,
                      wq=Wq, h_out=Ho, out_dtype=jnp.bfloat16)
    y1 = y1.reshape(N, Ho, Wq, Cp)[:, :, :Wo, :]               # drop garbage cols

    # Conv2 + bias + ReLU.
    y1p = jnp.pad(y1, ((0, 0), (1, 2), (1, 1), (0, 0)))        # (N, Hq, Wq, Cp)
    y2 = conv3x3_flat(y1p.reshape(N, Hq * Wq, Cp), w2, b2,
                      wq=Wq, h_out=Ho, out_dtype=jnp.float32)
    y2 = y2.reshape(N, Ho, Wq, Cp)[:, :, :Wo, :cout]
    return jnp.transpose(y2, (0, 3, 1, 2))                     # back to NCHW


# -----------------------------------------------------------------------------
# Parameters (deterministic He-style init; Cout padded to 128 lanes)
# -----------------------------------------------------------------------------
def init_down_params(key, cin, cout):
    cp = _round_up(cout, 128)
    k1, k2, k3, k4 = jax.random.split(key, 4)
    w1 = jax.random.normal(k1, (9, cin, cout), jnp.float32) * (2.0 / (9 * cin)) ** 0.5
    w2 = jax.random.normal(k2, (9, cout, cout), jnp.float32) * (2.0 / (9 * cout)) ** 0.5
    b1 = jax.random.normal(k3, (cout,), jnp.float32) * 0.01
    b2 = jax.random.normal(k4, (cout,), jnp.float32) * 0.01
    # Pad Cout (and conv2's Cin) with zeros up to a multiple of 128.
    w1 = jnp.pad(w1, ((0, 0), (0, 0), (0, cp - cout))).astype(jnp.bfloat16)
    w2 = jnp.pad(w2, ((0, 0), (0, cp - cout), (0, cp - cout))).astype(jnp.bfloat16)
    b1 = jnp.pad(b1, (0, cp - cout))
    b2 = jnp.pad(b2, (0, cp - cout))
    return w1, b1, w2, b2


# -----------------------------------------------------------------------------
# Pure-JAX reference (mirrors the kernel's bf16 operand casts, f32 accumulation)
# -----------------------------------------------------------------------------
def reference_down(x_nchw, w1, b1, w2, b2, cout):
    x = jnp.transpose(x_nchw, (0, 2, 3, 1)).astype(jnp.bfloat16).astype(jnp.float32)
    N, H, W, C = x.shape
    p = jnp.max(x.reshape(N, H // 2, 2, W // 2, 2, C), axis=(2, 4))

    def conv(z, w, b):
        hh, ww = z.shape[1], z.shape[2]
        zp = jnp.pad(z, ((0, 0), (1, 1), (1, 1), (0, 0)))
        wf = w.astype(jnp.float32)
        out = b.astype(jnp.float32)
        for dy in range(3):
            for dx in range(3):
                out = out + jnp.einsum(
                    "nhwc,cd->nhwd",
                    zp[:, dy:dy + hh, dx:dx + ww, :], wf[dy * 3 + dx],
                    precision=jax.lax.Precision.HIGHEST)
        return jnp.maximum(out, 0.0)

    y1 = conv(p, w1, b1).astype(jnp.bfloat16).astype(jnp.float32)
    y2 = conv(y1, w2, b2)[..., :cout]
    return jnp.transpose(y2, (0, 3, 1, 2))


# -----------------------------------------------------------------------------
if __name__ == "__main__":
    key = jax.random.PRNGKey(0)
    k_params, k_x = jax.random.split(key)

    batch, in_ch, out_ch, spatial = 2, 64, 128, 16  # Down(64, 128) on 16x16
    w1, b1, w2, b2 = init_down_params(k_params, in_ch, out_ch)
    x = jax.random.normal(k_x, (batch, in_ch, spatial, spatial), jnp.float32)

    fwd = jax.jit(functools.partial(down_forward, cout=out_ch))
    out = fwd(x, w1, b1, w2, b2)
    jax.block_until_ready(out)

    assert out.shape == (batch, out_ch, spatial // 2, spatial // 2)
    assert out.dtype == jnp.float32

    ref = reference_down(x, w1, b1, w2, b2, out_ch)
    err = float(jnp.max(jnp.abs(out - ref)))
    assert err < 5e-2, f"max abs error vs reference: {err}"
    print("KERNEL_OK")
</pallas_src>

<mosaic_0001>
module attributes {stable_mosaic.version = 11 : i64} {
  func.func @_max4_kernel(%arg0: i32, %arg1: memref<1x11x10x64xbf16, #tpu.memory_space<vmem>>, %arg2: memref<1x11x10x64xbf16, #tpu.memory_space<vmem>>, %arg3: memref<1x11x10x64xbf16, #tpu.memory_space<vmem>>, %arg4: memref<1x11x10x64xbf16, #tpu.memory_space<vmem>>, %arg5: memref<1x11x10x64xbf16, #tpu.memory_space<vmem>>) attributes {dimension_semantics = [#tpu.dimension_semantics<parallel>], iteration_bounds = array<i64: 2>, scalar_prefetch = 0 : i64, scratch_operands = 0 : i64, tpu.core_type = #tpu.core_type<tc>, window_params = [{transform_indices = @transform_0, window_bounds = array<i64: 1, 11, 10, 64>}, {transform_indices = @transform_1, window_bounds = array<i64: 1, 11, 10, 64>}, {transform_indices = @transform_2, window_bounds = array<i64: 1, 11, 10, 64>}, {transform_indices = @transform_3, window_bounds = array<i64: 1, 11, 10, 64>}, {transform_indices = @transform_4, window_bounds = array<i64: 1, 11, 10, 64>}]} {
    %c0 = arith.constant 0 : index
    %c0_0 = arith.constant 0 : index
    %c0_1 = arith.constant 0 : index
    %c0_2 = arith.constant 0 : index
    %0 = vector.load %arg1[%c0, %c0_0, %c0_1, %c0_2] : memref<1x11x10x64xbf16, #tpu.memory_space<vmem>>, vector<1x11x10x64xbf16>
    %c0_3 = arith.constant 0 : index
    %c0_4 = arith.constant 0 : index
    %c0_5 = arith.constant 0 : index
    %c0_6 = arith.constant 0 : index
    %1 = vector.load %arg2[%c0_3, %c0_4, %c0_5, %c0_6] : memref<1x11x10x64xbf16, #tpu.memory_space<vmem>>, vector<1x11x10x64xbf16>
    %2 = arith.maximumf %0, %1 : vector<1x11x10x64xbf16>
    %c0_7 = arith.constant 0 : index
    %c0_8 = arith.constant 0 : index
    %c0_9 = arith.constant 0 : index
    %c0_10 = arith.constant 0 : index
    %3 = vector.load %arg3[%c0_7, %c0_8, %c0_9, %c0_10] : memref<1x11x10x64xbf16, #tpu.memory_space<vmem>>, vector<1x11x10x64xbf16>
    %c0_11 = arith.constant 0 : index
    %c0_12 = arith.constant 0 : index
    %c0_13 = arith.constant 0 : index
    %c0_14 = arith.constant 0 : index
    %4 = vector.load %arg4[%c0_11, %c0_12, %c0_13, %c0_14] : memref<1x11x10x64xbf16, #tpu.memory_space<vmem>>, vector<1x11x10x64xbf16>
    %5 = arith.maximumf %3, %4 : vector<1x11x10x64xbf16>
    %6 = arith.maximumf %2, %5 : vector<1x11x10x64xbf16>
    %c0_15 = arith.constant 0 : index
    %c0_16 = arith.constant 0 : index
    %c0_17 = arith.constant 0 : index
    %c0_18 = arith.constant 0 : index
    %7 = vector.load %arg5[%c0_15, %c0_16, %c0_17, %c0_18] : memref<1x11x10x64xbf16, #tpu.memory_space<vmem>>, vector<1x11x10x64xbf16>
    tpu.vector_store %arg5[%c0_15, %c0_16, %c0_17, %c0_18], %6 {strides = array<i32>} : memref<1x11x10x64xbf16, #tpu.memory_space<vmem>>, vector<1x11x10x64xbf16>,
    return
  }
  func.func @transform_0(%arg0: i32) -> (i32, i32, i32, i32) {
    %c0_i32 = arith.constant 0 : i32
    %c0_i32_0 = arith.constant 0 : i32
    %c0_i32_1 = arith.constant 0 : i32
    %c0_i32_2 = arith.constant 0 : i32
    return %arg0, %c0_i32, %c0_i32_0, %c0_i32_1 : i32, i32, i32, i32
  }
  func.func @transform_1(%arg0: i32) -> (i32, i32, i32, i32) {
    %c0_i32 = arith.constant 0 : i32
    %c0_i32_0 = arith.constant 0 : i32
    %c0_i32_1 = arith.constant 0 : i32
    %c0_i32_2 = arith.constant 0 : i32
    return %arg0, %c0_i32, %c0_i32_0, %c0_i32_1 : i32, i32, i32, i32
  }
  func.func @transform_2(%arg0: i32) -> (i32, i32, i32, i32) {
    %c0_i32 = arith.constant 0 : i32
    %c0_i32_0 = arith.constant 0 : i32
    %c0_i32_1 = arith.constant 0 : i32
    %c0_i32_2 = arith.constant 0 : i32
    return %arg0, %c0_i32, %c0_i32_0, %c0_i32_1 : i32, i32, i32, i32
  }
  func.func @transform_3(%arg0: i32) -> (i32, i32, i32, i32) {
    %c0_i32 = arith.constant 0 : i32
    %c0_i32_0 = arith.constant 0 : i32
    %c0_i32_1 = arith.constant 0 : i32
    %c0_i32_2 = arith.constant 0 : i32
    return %arg0, %c0_i32, %c0_i32_0, %c0_i32_1 : i32, i32, i32, i32
  }
  func.func @transform_4(%arg0: i32) -> (i32, i32, i32, i32) {
    %c0_i32 = arith.constant 0 : i32
    %c0_i32_0 = arith.constant 0 : i32
    %c0_i32_1 = arith.constant 0 : i32
    %c0_i32_2 = arith.constant 0 : i32
    return %arg0, %c0_i32, %c0_i32_0, %c0_i32_1 : i32, i32, i32, i32
  }
}

module attributes {stable_mosaic.version = 11 : i64} {
  func.func @_conv3x3_flat_kernel(%arg0: i32, %arg1: memref<1x110x64xbf16, #tpu.memory_space<vmem>>, %arg2: memref<9x64x128xbf16, #tpu.memory_space<vmem>>, %arg3: memref<1x128xf32, #tpu.memory_space<vmem>>, %arg4: memref<1x80x128xbf16, #tpu.memory_space<vmem>>) attributes {dimension_semantics = [#tpu.dimension_semantics<parallel>], iteration_bounds = array<i64: 2>, scalar_prefetch = 0 : i64, scratch_operands = 0 : i64, tpu.core_type = #tpu.core_type<tc>, window_params = [{transform_indices = @transform_0, window_bounds = array<i64: 1, 110, 64>}, {pipeline_mode = #tpu.pipeline_mode<synchronous>, transform_indices = @transform_1, window_bounds = array<i64: 9, 64, 128>}, {pipeline_mode = #tpu.pipeline_mode<synchronous>, transform_indices = @transform_2, window_bounds = array<i64: 1, 128>}, {transform_indices = @transform_3, window_bounds = array<i64: 1, 80, 128>}]} {
    %c0 = arith.constant 0 : index
    %c0_0 = arith.constant 0 : index
    %c0_1 = arith.constant 0 : index
    %0 = vector.load %arg1[%c0, %c0_0, %c0_1] : memref<1x110x64xbf16, #tpu.memory_space<vmem>>, vector<1x80x64xbf16>
    %1 = vector.shape_cast %0 : vector<1x80x64xbf16> to vector<80x64xbf16>
    %c0_2 = arith.constant 0 : index
    %c0_3 = arith.constant 0 : index
    %c0_4 = arith.constant 0 : index
    %2 = vector.load %arg2[%c0_2, %c0_3, %c0_4] : memref<9x64x128xbf16, #tpu.memory_space<vmem>>, vector<1x64x128xbf16>
    %3 = vector.shape_cast %2 : vector<1x64x128xbf16> to vector<64x128xbf16>
    %cst = arith.constant dense<0.000000e+00> : vector<80x128xf32>
    %4 = tpu.matmul %1, %3, %cst {dimension_numbers = #tpu.dot_dimension_numbers<[1], [0], [0], [1], [0, 0, 1, 1], [], []>} : vector<80x64xbf16>, vector<64x128xbf16>, vector<80x128xf32> -> vector<80x128xf32>
    %c0_5 = arith.constant 0 : index
    %c1 = arith.constant 1 : index
    %c0_6 = arith.constant 0 : index
    %5 = vector.load %arg1[%c0_5, %c1, %c0_6] : memref<1x110x64xbf16, #tpu.memory_space<vmem>>, vector<1x80x64xbf16>
    %6 = vector.shape_cast %5 : vector<1x80x64xbf16> to vector<80x64xbf16>
    %c1_7 = arith.constant 1 : index
    %c0_8 = arith.constant 0 : index
    %c0_9 = arith.constant 0 : index
    %7 = vector.load %arg2[%c1_7, %c0_8, %c0_9] : memref<9x64x128xbf16, #tpu.memory_space<vmem>>, vector<1x64x128xbf16>
    %8 = vector.shape_cast %7 : vector<1x64x128xbf16> to vector<64x128xbf16>
    %cst_10 = arith.constant dense<0.000000e+00> : vector<80x128xf32>
    %9 = tpu.matmul %6, %8, %cst_10 {dimension_numbers = #tpu.dot_dimension_numbers<[1], [0], [0], [1], [0, 0, 1, 1], [], []>} : vector<80x64xbf16>, vector<64x128xbf16>, vector<80x128xf32> -> vector<80x128xf32>
    %10 = arith.addf %4, %9 : vector<80x128xf32>
    %c0_11 = arith.constant 0 : index
    %c2 = arith.constant 2 : index
    %c0_12 = arith.constant 0 : index
    %11 = vector.load %arg1[%c0_11, %c2, %c0_12] : memref<1x110x64xbf16, #tpu.memory_space<vmem>>, vector<1x80x64xbf16>
    %12 = vector.shape_cast %11 : vector<1x80x64xbf16> to vector<80x64xbf16>
    %c2_13 = arith.constant 2 : index
    %c0_14 = arith.constant 0 : index
    %c0_15 = arith.constant 0 : index
    %13 = vector.load %arg2[%c2_13, %c0_14, %c0_15] : memref<9x64x128xbf16, #tpu.memory_space<vmem>>, vector<1x64x128xbf16>
    %14 = vector.shape_cast %13 : vector<1x64x128xbf16> to vector<64x128xbf16>
    %cst_16 = arith.constant dense<0.000000e+00> : vector<80x128xf32>
    %15 = tpu.matmul %12, %14, %cst_16 {dimension_numbers = #tpu.dot_dimension_numbers<[1], [0], [0], [1], [0, 0, 1, 1], [], []>} : vector<80x64xbf16>, vector<64x128xbf16>, vector<80x128xf32> -> vector<80x128xf32>
    %16 = arith.addf %10, %15 : vector<80x128xf32>
    %c0_17 = arith.constant 0 : index
    %c10 = arith.constant 10 : index
    %c0_18 = arith.constant 0 : index
    %17 = vector.load %arg1[%c0_17, %c10, %c0_18] : memref<1x110x64xbf16, #tpu.memory_space<vmem>>, vector<1x80x64xbf16>
    %18 = vector.shape_cast %17 : vector<1x80x64xbf16> to vector<80x64xbf16>
    %c3 = arith.constant 3 : index
    %c0_19 = arith.constant 0 : index
    %c0_20 = arith.constant 0 : index
    %19 = vector.load %arg2[%c3, %c0_19, %c0_20] : memref<9x64x128xbf16, #tpu.memory_space<vmem>>, vector<1x64x128xbf16>
    %20 = vector.shape_cast %19 : vector<1x64x128xbf16> to vector<64x128xbf16>
    %cst_21 = arith.constant dense<0.000000e+00> : vector<80x128xf32>
    %21 = tpu.matmul %18, %20, %cst_21 {dimension_numbers = #tpu.dot_dimension_numbers<[1], [0], [0], [1], [0, 0, 1, 1], [], []>} : vector<80x64xbf16>, vector<64x128xbf16>, vector<80x128xf32> -> vector<80x128xf32>
    %22 = arith.addf %16, %21 : vector<80x128xf32>
    %c0_22 = arith.constant 0 : index
    %c11 = arith.constant 11 : index
    %c0_23 = arith.constant 0 : index
    %23 = vector.load %arg1[%c0_22, %c11, %c0_23] : memref<1x110x64xbf16, #tpu.memory_space<vmem>>, vector<1x80x64xbf16>
    %24 = vector.shape_cast %23 : vector<1x80x64xbf16> to vector<80x64xbf16>
    %c4 = arith.constant 4 : index
    %c0_24 = arith.constant 0 : index
    %c0_25 = arith.constant 0 : index
    %25 = vector.load %arg2[%c4, %c0_24, %c0_25] : memref<9x64x128xbf16, #tpu.memory_space<vmem>>, vector<1x64x128xbf16>
    %26 = vector.shape_cast %25 : vector<1x64x128xbf16> to vector<64x128xbf16>
    %cst_26 = arith.constant dense<0.000000e+00> : vector<80x128xf32>
    %27 = tpu.matmul %24, %26, %cst_26 {dimension_numbers = #tpu.dot_dimension_numbers<[1], [0], [0], [1], [0, 0, 1, 1], [], []>} : vector<80x64xbf16>, vector<64x128xbf16>, vector<80x128xf32> -> vector<80x128xf32>
    %28 = arith.addf %22, %27 : vector<80x128xf32>
    %c0_27 = arith.constant 0 : index
    %c12 = arith.constant 12 : index
    %c0_28 = arith.constant 0 : index
    %29 = vector.load %arg1[%c0_27, %c12, %c0_28] : memref<1x110x64xbf16, #tpu.memory_space<vmem>>, vector<1x80x64xbf16>
    %30 = vector.shape_cast %29 : vector<1x80x64xbf16> to vector<80x64xbf16>
    %c5 = arith.constant 5 : index
    %c0_29 = arith.constant 0 : index
    %c0_30 = arith.constant 0 : index
    %31 = vector.load %arg2[%c5, %c0_29, %c0_30] : memref<9x64x128xbf16, #tpu.memory_space<vmem>>, vector<1x64x128xbf16>
    %32 = vector.shape_cast %31 : vector<1x64x128xbf16> to vector<64x128xbf16>
    %cst_31 = arith.constant dense<0.000000e+00> : vector<80x128xf32>
    %33 = tpu.matmul %30, %32, %cst_31 {dimension_numbers = #tpu.dot_dimension_numbers<[1], [0], [0], [1], [0, 0, 1, 1], [], []>} : vector<80x64xbf16>, vector<64x128xbf16>, vector<80x128xf32> -> vector<80x128xf32>
    %34 = arith.addf %28, %33 : vector<80x128xf32>
    %c0_32 = arith.constant 0 : index
    %c20 = arith.constant 20 : index
    %c0_33 = arith.constant 0 : index
    %35 = vector.load %arg1[%c0_32, %c20, %c0_33] : memref<1x110x64xbf16, #tpu.memory_space<vmem>>, vector<1x80x64xbf16>
    %36 = vector.shape_cast %35 : vector<1x80x64xbf16> to vector<80x64xbf16>
    %c6 = arith.constant 6 : index
    %c0_34 = arith.constant 0 : index
    %c0_35 = arith.constant 0 : index
    %37 = vector.load %arg2[%c6, %c0_34, %c0_35] : memref<9x64x128xbf16, #tpu.memory_space<vmem>>, vector<1x64x128xbf16>
    %38 = vector.shape_cast %37 : vector<1x64x128xbf16> to vector<64x128xbf16>
    %cst_36 = arith.constant dense<0.000000e+00> : vector<80x128xf32>
    %39 = tpu.matmul %36, %38, %cst_36 {dimension_numbers = #tpu.dot_dimension_numbers<[1], [0], [0], [1], [0, 0, 1, 1], [], []>} : vector<80x64xbf16>, vector<64x128xbf16>, vector<80x128xf32> -> vector<80x128xf32>
    %40 = arith.addf %34, %39 : vector<80x128xf32>
    %c0_37 = arith.constant 0 : index
    %c21 = arith.constant 21 : index
    %c0_38 = arith.constant 0 : index
    %41 = vector.load %arg1[%c0_37, %c21, %c0_38] : memref<1x110x64xbf16, #tpu.memory_space<vmem>>, vector<1x80x64xbf16>
    %42 = vector.shape_cast %41 : vector<1x80x64xbf16> to vector<80x64xbf16>
    %c7 = arith.constant 7 : index
    %c0_39 = arith.constant 0 : index
    %c0_40 = arith.constant 0 : index
    %43 = vector.load %arg2[%c7, %c0_39, %c0_40] : memref<9x64x128xbf16, #tpu.memory_space<vmem>>, vector<1x64x128xbf16>
    %44 = vector.shape_cast %43 : vector<1x64x128xbf16> to vector<64x128xbf16>
    %cst_41 = arith.constant dense<0.000000e+00> : vector<80x128xf32>
    %45 = tpu.matmul %42, %44, %cst_41 {dimension_numbers = #tpu.dot_dimension_numbers<[1], [0], [0], [1], [0, 0, 1, 1], [], []>} : vector<80x64xbf16>, vector<64x128xbf16>, vector<80x128xf32> -> vector<80x128xf32>
    %46 = arith.addf %40, %45 : vector<80x128xf32>
    %c0_42 = arith.constant 0 : index
    %c22 = arith.constant 22 : index
    %c0_43 = arith.constant 0 : index
    %47 = vector.load %arg1[%c0_42, %c22, %c0_43] : memref<1x110x64xbf16, #tpu.memory_space<vmem>>, vector<1x80x64xbf16>
    %48 = vector.shape_cast %47 : vector<1x80x64xbf16> to vector<80x64xbf16>
    %c8 = arith.constant 8 : index
    %c0_44 = arith.constant 0 : index
    %c0_45 = arith.constant 0 : index
    %49 = vector.load %arg2[%c8, %c0_44, %c0_45] : memref<9x64x128xbf16, #tpu.memory_space<vmem>>, vector<1x64x128xbf16>
    %50 = vector.shape_cast %49 : vector<1x64x128xbf16> to vector<64x128xbf16>
    %cst_46 = arith.constant dense<0.000000e+00> : vector<80x128xf32>
    %51 = tpu.matmul %48, %50, %cst_46 {dimension_numbers = #tpu.dot_dimension_numbers<[1], [0], [0], [1], [0, 0, 1, 1], [], []>} : vector<80x64xbf16>, vector<64x128xbf16>, vector<80x128xf32> -> vector<80x128xf32>
    %52 = arith.addf %46, %51 : vector<80x128xf32>
    %c0_47 = arith.constant 0 : index
    %c0_48 = arith.constant 0 : index
    %53 = vector.load %arg3[%c0_47, %c0_48] : memref<1x128xf32, #tpu.memory_space<vmem>>, vector<1x128xf32>
    %54 = vector.broadcast %53 : vector<1x128xf32> to vector<80x128xf32>
    %55 = arith.addf %52, %54 : vector<80x128xf32>
    %cst_49 = arith.constant 0.000000e+00 : f32
    %56 = vector.broadcast %cst_49 : f32 to vector<80x128xf32>
    %57 = arith.maximumf %55, %56 : vector<80x128xf32>
    %58 = arith.truncf %57 : vector<80x128xf32> to vector<80x128xbf16>
    %c0_50 = arith.constant 0 : index
    %c0_51 = arith.constant 0 : index
    %c0_52 = arith.constant 0 : index
    %59 = vector.load %arg4[%c0_50, %c0_51, %c0_52] : memref<1x80x128xbf16, #tpu.memory_space<vmem>>, vector<1x80x128xbf16>
    %60 = vector.shape_cast %59 : vector<1x80x128xbf16> to vector<80x128xbf16>
    %61 = vector.shape_cast %58 : vector<80x128xbf16> to vector<1x80x128xbf16>
    tpu.vector_store %arg4[%c0_50, %c0_51, %c0_52], %61 {strides = array<i32>} : memref<1x80x128xbf16, #tpu.memory_space<vmem>>, vector<1x80x128xbf16>,
    return
  }
  func.func @transform_0(%arg0: i32) -> (i32, i32, i32) {
    %c0_i32 = arith.constant 0 : i32
    %c0_i32_0 = arith.constant 0 : i32
    %c0_i32_1 = arith.constant 0 : i32
    return %arg0, %c0_i32, %c0_i32_0 : i32, i32, i32
  }
  func.func @transform_1(%arg0: i32) -> (i32, i32, i32) {
    %c0_i32 = arith.constant 0 : i32
    %c0_i32_0 = arith.constant 0 : i32
    %c0_i32_1 = arith.constant 0 : i32
    %c0_i32_2 = arith.constant 0 : i32
    return %c0_i32, %c0_i32_0, %c0_i32_1 : i32, i32, i32
  }
  func.func @transform_2(%arg0: i32) -> (i32, i32) {
    %c0_i32 = arith.constant 0 : i32
    %c0_i32_0 = arith.constant 0 : i32
    %c0_i32_1 = arith.constant 0 : i32
    return %c0_i32, %c0_i32_0 : i32, i32
  }
  func.func @transform_3(%arg0: i32) -> (i32, i32, i32) {
    %c0_i32 = arith.constant 0 : i32
    %c0_i32_0 = arith.constant 0 : i32
    %c0_i32_1 = arith.constant 0 : i32
    return %arg0, %c0_i32, %c0_i32_0 : i32, i32, i32
  }
}

module attributes {stable_mosaic.version = 11 : i64} {
  func.func @_conv3x3_flat_kernel(%arg0: i32, %arg1: memref<1x110x128xbf16, #tpu.memory_space<vmem>>, %arg2: memref<9x128x128xbf16, #tpu.memory_space<vmem>>, %arg3: memref<1x128xf32, #tpu.memory_space<vmem>>, %arg4: memref<1x80x128xf32, #tpu.memory_space<vmem>>) attributes {dimension_semantics = [#tpu.dimension_semantics<parallel>], iteration_bounds = array<i64: 2>, scalar_prefetch = 0 : i64, scratch_operands = 0 : i64, tpu.core_type = #tpu.core_type<tc>, window_params = [{transform_indices = @transform_0, window_bounds = array<i64: 1, 110, 128>}, {pipeline_mode = #tpu.pipeline_mode<synchronous>, transform_indices = @transform_1, window_bounds = array<i64: 9, 128, 128>}, {pipeline_mode = #tpu.pipeline_mode<synchronous>, transform_indices = @transform_2, window_bounds = array<i64: 1, 128>}, {transform_indices = @transform_3, window_bounds = array<i64: 1, 80, 128>}]} {
    %c0 = arith.constant 0 : index
    %c0_0 = arith.constant 0 : index
    %c0_1 = arith.constant 0 : index
    %0 = vector.load %arg1[%c0, %c0_0, %c0_1] : memref<1x110x128xbf16, #tpu.memory_space<vmem>>, vector<1x80x128xbf16>
    %1 = vector.shape_cast %0 : vector<1x80x128xbf16> to vector<80x128xbf16>
    %c0_2 = arith.constant 0 : index
    %c0_3 = arith.constant 0 : index
    %c0_4 = arith.constant 0 : index
    %2 = vector.load %arg2[%c0_2, %c0_3, %c0_4] : memref<9x128x128xbf16, #tpu.memory_space<vmem>>, vector<1x128x128xbf16>
    %3 = vector.shape_cast %2 : vector<1x128x128xbf16> to vector<128x128xbf16>
    %cst = arith.constant dense<0.000000e+00> : vector<80x128xf32>
    %4 = tpu.matmul %1, %3, %cst {dimension_numbers = #tpu.dot_dimension_numbers<[1], [0], [0], [1], [0, 0, 1, 1], [], []>} : vector<80x128xbf16>, vector<128x128xbf16>, vector<80x128xf32> -> vector<80x128xf32>
    %c0_5 = arith.constant 0 : index
    %c1 = arith.constant 1 : index
    %c0_6 = arith.constant 0 : index
    %5 = vector.load %arg1[%c0_5, %c1, %c0_6] : memref<1x110x128xbf16, #tpu.memory_space<vmem>>, vector<1x80x128xbf16>
    %6 = vector.shape_cast %5 : vector<1x80x128xbf16> to vector<80x128xbf16>
    %c1_7 = arith.constant 1 : index
    %c0_8 = arith.constant 0 : index
    %c0_9 = arith.constant 0 : index
    %7 = vector.load %arg2[%c1_7, %c0_8, %c0_9] : memref<9x128x128xbf16, #tpu.memory_space<vmem>>, vector<1x128x128xbf16>
    %8 = vector.shape_cast %7 : vector<1x128x128xbf16> to vector<128x128xbf16>
    %cst_10 = arith.constant dense<0.000000e+00> : vector<80x128xf32>
    %9 = tpu.matmul %6, %8, %cst_10 {dimension_numbers = #tpu.dot_dimension_numbers<[1], [0], [0], [1], [0, 0, 1, 1], [], []>} : vector<80x128xbf16>, vector<128x128xbf16>, vector<80x128xf32> -> vector<80x128xf32>
    %10 = arith.addf %4, %9 : vector<80x128xf32>
    %c0_11 = arith.constant 0 : index
    %c2 = arith.constant 2 : index
    %c0_12 = arith.constant 0 : index
    %11 = vector.load %arg1[%c0_11, %c2, %c0_12] : memref<1x110x128xbf16, #tpu.memory_space<vmem>>, vector<1x80x128xbf16>
    %12 = vector.shape_cast %11 : vector<1x80x128xbf16> to vector<80x128xbf16>
    %c2_13 = arith.constant 2 : index
    %c0_14 = arith.constant 0 : index
    %c0_15 = arith.constant 0 : index
    %13 = vector.load %arg2[%c2_13, %c0_14, %c0_15] : memref<9x128x128xbf16, #tpu.memory_space<vmem>>, vector<1x128x128xbf16>
    %14 = vector.shape_cast %13 : vector<1x128x128xbf16> to vector<128x128xbf16>
    %cst_16 = arith.constant dense<0.000000e+00> : vector<80x128xf32>
    %15 = tpu.matmul %12, %14, %cst_16 {dimension_numbers = #tpu.dot_dimension_numbers<[1], [0], [0], [1], [0, 0, 1, 1], [], []>} : vector<80x128xbf16>, vector<128x128xbf16>, vector<80x128xf32> -> vector<80x128xf32>
    %16 = arith.addf %10, %15 : vector<80x128xf32>
    %c0_17 = arith.constant 0 : index
    %c10 = arith.constant 10 : index
    %c0_18 = arith.constant 0 : index
    %17 = vector.load %arg1[%c0_17, %c10, %c0_18] : memref<1x110x128xbf16, #tpu.memory_space<vmem>>, vector<1x80x128xbf16>
    %18 = vector.shape_cast %17 : vector<1x80x128xbf16> to vector<80x128xbf16>
    %c3 = arith.constant 3 : index
    %c0_19 = arith.constant 0 : index
    %c0_20 = arith.constant 0 : index
    %19 = vector.load %arg2[%c3, %c0_19, %c0_20] : memref<9x128x128xbf16, #tpu.memory_space<vmem>>, vector<1x128x128xbf16>
    %20 = vector.shape_cast %19 : vector<1x128x128xbf16> to vector<128x128xbf16>
    %cst_21 = arith.constant dense<0.000000e+00> : vector<80x128xf32>
    %21 = tpu.matmul %18, %20, %cst_21 {dimension_numbers = #tpu.dot_dimension_numbers<[1], [0], [0], [1], [0, 0, 1, 1], [], []>} : vector<80x128xbf16>, vector<128x128xbf16>, vector<80x128xf32> -> vector<80x128xf32>
    %22 = arith.addf %16, %21 : vector<80x128xf32>
    %c0_22 = arith.constant 0 : index
    %c11 = arith.constant 11 : index
    %c0_23 = arith.constant 0 : index
    %23 = vector.load %arg1[%c0_22, %c11, %c0_23] : memref<1x110x128xbf16, #tpu.memory_space<vmem>>, vector<1x80x128xbf16>
    %24 = vector.shape_cast %23 : vector<1x80x128xbf16> to vector<80x128xbf16>
    %c4 = arith.constant 4 : index
    %c0_24 = arith.constant 0 : index
    %c0_25 = arith.constant 0 : index
    %25 = vector.load %arg2[%c4, %c0_24, %c0_25] : memref<9x128x128xbf16, #tpu.memory_space<vmem>>, vector<1x128x128xbf16>
    %26 = vector.shape_cast %25 : vector<1x128x128xbf16> to vector<128x128xbf16>
    %cst_26 = arith.constant dense<0.000000e+00> : vector<80x128xf32>
    %27 = tpu.matmul %24, %26, %cst_26 {dimension_numbers = #tpu.dot_dimension_numbers<[1], [0], [0], [1], [0, 0, 1, 1], [], []>} : vector<80x128xbf16>, vector<128x128xbf16>, vector<80x128xf32> -> vector<80x128xf32>
    %28 = arith.addf %22, %27 : vector<80x128xf32>
    %c0_27 = arith.constant 0 : index
    %c12 = arith.constant 12 : index
    %c0_28 = arith.constant 0 : index
    %29 = vector.load %arg1[%c0_27, %c12, %c0_28] : memref<1x110x128xbf16, #tpu.memory_space<vmem>>, vector<1x80x128xbf16>
    %30 = vector.shape_cast %29 : vector<1x80x128xbf16> to vector<80x128xbf16>
    %c5 = arith.constant 5 : index
    %c0_29 = arith.constant 0 : index
    %c0_30 = arith.constant 0 : index
    %31 = vector.load %arg2[%c5, %c0_29, %c0_30] : memref<9x128x128xbf16, #tpu.memory_space<vmem>>, vector<1x128x128xbf16>
    %32 = vector.shape_cast %31 : vector<1x128x128xbf16> to vector<128x128xbf16>
    %cst_31 = arith.constant dense<0.000000e+00> : vector<80x128xf32>
    %33 = tpu.matmul %30, %32, %cst_31 {dimension_numbers = #tpu.dot_dimension_numbers<[1], [0], [0], [1], [0, 0, 1, 1], [], []>} : vector<80x128xbf16>, vector<128x128xbf16>, vector<80x128xf32> -> vector<80x128xf32>
    %34 = arith.addf %28, %33 : vector<80x128xf32>
    %c0_32 = arith.constant 0 : index
    %c20 = arith.constant 20 : index
    %c0_33 = arith.constant 0 : index
    %35 = vector.load %arg1[%c0_32, %c20, %c0_33] : memref<1x110x128xbf16, #tpu.memory_space<vmem>>, vector<1x80x128xbf16>
    %36 = vector.shape_cast %35 : vector<1x80x128xbf16> to vector<80x128xbf16>
    %c6 = arith.constant 6 : index
    %c0_34 = arith.constant 0 : index
    %c0_35 = arith.constant 0 : index
    %37 = vector.load %arg2[%c6, %c0_34, %c0_35] : memref<9x128x128xbf16, #tpu.memory_space<vmem>>, vector<1x128x128xbf16>
    %38 = vector.shape_cast %37 : vector<1x128x128xbf16> to vector<128x128xbf16>
    %cst_36 = arith.constant dense<0.000000e+00> : vector<80x128xf32>
    %39 = tpu.matmul %36, %38, %cst_36 {dimension_numbers = #tpu.dot_dimension_numbers<[1], [0], [0], [1], [0, 0, 1, 1], [], []>} : vector<80x128xbf16>, vector<128x128xbf16>, vector<80x128xf32> -> vector<80x128xf32>
    %40 = arith.addf %34, %39 : vector<80x128xf32>
    %c0_37 = arith.constant 0 : index
    %c21 = arith.constant 21 : index
    %c0_38 = arith.constant 0 : index
    %41 = vector.load %arg1[%c0_37, %c21, %c0_38] : memref<1x110x128xbf16, #tpu.memory_space<vmem>>, vector<1x80x128xbf16>
    %42 = vector.shape_cast %41 : vector<1x80x128xbf16> to vector<80x128xbf16>
    %c7 = arith.constant 7 : index
    %c0_39 = arith.constant 0 : index
    %c0_40 = arith.constant 0 : index
    %43 = vector.load %arg2[%c7, %c0_39, %c0_40] : memref<9x128x128xbf16, #tpu.memory_space<vmem>>, vector<1x128x128xbf16>
    %44 = vector.shape_cast %43 : vector<1x128x128xbf16> to vector<128x128xbf16>
    %cst_41 = arith.constant dense<0.000000e+00> : vector<80x128xf32>
    %45 = tpu.matmul %42, %44, %cst_41 {dimension_numbers = #tpu.dot_dimension_numbers<[1], [0], [0], [1], [0, 0, 1, 1], [], []>} : vector<80x128xbf16>, vector<128x128xbf16>, vector<80x128xf32> -> vector<80x128xf32>
    %46 = arith.addf %40, %45 : vector<80x128xf32>
    %c0_42 = arith.constant 0 : index
    %c22 = arith.constant 22 : index
    %c0_43 = arith.constant 0 : index
    %47 = vector.load %arg1[%c0_42, %c22, %c0_43] : memref<1x110x128xbf16, #tpu.memory_space<vmem>>, vector<1x80x128xbf16>
    %48 = vector.shape_cast %47 : vector<1x80x128xbf16> to vector<80x128xbf16>
    %c8 = arith.constant 8 : index
    %c0_44 = arith.constant 0 : index
    %c0_45 = arith.constant 0 : index
    %49 = vector.load %arg2[%c8, %c0_44, %c0_45] : memref<9x128x128xbf16, #tpu.memory_space<vmem>>, vector<1x128x128xbf16>
    %50 = vector.shape_cast %49 : vector<1x128x128xbf16> to vector<128x128xbf16>
    %cst_46 = arith.constant dense<0.000000e+00> : vector<80x128xf32>
    %51 = tpu.matmul %48, %50, %cst_46 {dimension_numbers = #tpu.dot_dimension_numbers<[1], [0], [0], [1], [0, 0, 1, 1], [], []>} : vector<80x128xbf16>, vector<128x128xbf16>, vector<80x128xf32> -> vector<80x128xf32>
    %52 = arith.addf %46, %51 : vector<80x128xf32>
    %c0_47 = arith.constant 0 : index
    %c0_48 = arith.constant 0 : index
    %53 = vector.load %arg3[%c0_47, %c0_48] : memref<1x128xf32, #tpu.memory_space<vmem>>, vector<1x128xf32>
    %54 = vector.broadcast %53 : vector<1x128xf32> to vector<80x128xf32>
    %55 = arith.addf %52, %54 : vector<80x128xf32>
    %cst_49 = arith.constant 0.000000e+00 : f32
    %56 = vector.broadcast %cst_49 : f32 to vector<80x128xf32>
    %57 = arith.maximumf %55, %56 : vector<80x128xf32>
    %c0_50 = arith.constant 0 : index
    %c0_51 = arith.constant 0 : index
    %c0_52 = arith.constant 0 : index
    %58 = vector.load %arg4[%c0_50, %c0_51, %c0_52] : memref<1x80x128xf32, #tpu.memory_space<vmem>>, vector<1x80x128xf32>
    %59 = vector.shape_cast %58 : vector<1x80x128xf32> to vector<80x128xf32>
    %60 = vector.shape_cast %57 : vector<80x128xf32> to vector<1x80x128xf32>
    tpu.vector_store %arg4[%c0_50, %c0_51, %c0_52], %60 {strides = array<i32>} : memref<1x80x128xf32, #tpu.memory_space<vmem>>, vector<1x80x128xf32>,
    return
  }
  func.func @transform_0(%arg0: i32) -> (i32, i32, i32) {
    %c0_i32 = arith.constant 0 : i32
    %c0_i32_0 = arith.constant 0 : i32
    %c0_i32_1 = arith.constant 0 : i32
    return %arg0, %c0_i32, %c0_i32_0 : i32, i32, i32
  }
  func.func @transform_1(%arg0: i32) -> (i32, i32, i32) {
    %c0_i32 = arith.constant 0 : i32
    %c0_i32_0 = arith.constant 0 : i32
    %c0_i32_1 = arith.constant 0 : i32
    %c0_i32_2 = arith.constant 0 : i32
    return %c0_i32, %c0_i32_0, %c0_i32_1 : i32, i32, i32
  }
  func.func @transform_2(%arg0: i32) -> (i32, i32) {
    %c0_i32 = arith.constant 0 : i32
    %c0_i32_0 = arith.constant 0 : i32
    %c0_i32_1 = arith.constant 0 : i32
    return %c0_i32, %c0_i32_0 : i32, i32
  }
  func.func @transform_3(%arg0: i32) -> (i32, i32, i32) {
    %c0_i32 = arith.constant 0 : i32
    %c0_i32_0 = arith.constant 0 : i32
    %c0_i32_1 = arith.constant 0 : i32
    return %arg0, %c0_i32, %c0_i32_0 : i32, i32, i32
  }
}

</mosaic_0001>

<bundles_post_ra>
// kernel: down_forward.3
= control target key start
LH: loop header
LB: loop body
LE: loop exit
PB: predicated region body
PF: predicated region fallthrough
CT: control target
= control target key end

     0   :  { %s581_s15 = smov 0   ;;  %s749_s0 = inlined_call_operand.vmem [shape: bf16[2,11,10,64], index: 0, kind: input, shape index: {}]   ;;  %s750_s1 = inlined_call_operand.vmem [shape: bf16[2,11,10,64], index: 1, kind: input, shape index: {}]   ;;  %s751_s2 = inlined_call_operand.vmem [shape: bf16[2,11,10,64], index: 2, kind: input, shape index: {}]   ;;  %s752_s3 = inlined_call_operand.vmem [shape: bf16[2,11,10,64], index: 3, kind: input, shape index: {}]   ;;  %s753_s4 = inlined_call_operand.vmem [shape: bf16[2,11,10,64], index: 4, kind: output, shape index: {}]  }
   0x1 LB: > { %s527_s16 = sadd.s32 4294967295, %s554_s15   ;;  %p531_p0 = scmp.ge.s32.totalorder %s554_s15, 1  ;;  %s554_s15 = sphi %s581_s15, %s14_s15  }
   0x2   : > { %p192_p1 = scmp.lt.s32.totalorder %s554_s15, 3 }
   0x4   : > { %p193_p2 = pnand %p531_p0, %p192_p1 }
   0x5   : > { %p233_p3 = scmp.lt.s32.totalorder (!%p193_p2), %s527_s16, 1 }
   0x6   : > { %196 = sbr.rel (%p193_p2) target bundleno = 57 (0x39), region = 36 }
   0xb   : > { %s755_s16 = smov (!%p233_p3, %s527_s16), 1  ;;  %vm412_vm0 = vcmask 519168   ;;  %vm414_vm1 = vcmask 516096  }
   0xc   : > { %s539_s17 = smul.u32 88, %s755_s16 }
   0xe   : > { %s592_s20 = scalar_lea.vmem %s749_s0, %s539_s17  ;;  %s597_s23 = scalar_lea.vmem %s750_s1, %s539_s17 }
   0xf   : > { %s602_s26 = scalar_lea.vmem %s751_s2, %s539_s17  ;;  %s607_s29 = scalar_lea.vmem %s752_s3, %s539_s17  ;;  %v258_v0 = vld [vmem:[%s592_s20] sm:$0xf]  ;;  %v259_v2 = vld [vmem:[%s592_s20 + $0x4] sm:$0x1]  ;;  %v260_v11 = vld [vmem:[%s592_s20 + $0x8] sm:$0xf] }
  0x10   : > { %v280_v1 = vld [vmem:[%s597_s23] sm:$0xf]  ;;  %v281_v6 = vld [vmem:[%s597_s23 + $0x4] sm:$0x1]  ;;  %s621_s6 = scalar_lea.vmem %s753_s4, %s539_s17  ;;  %v282_v13 = vld [vmem:[%s597_s23 + $0x8] sm:$0xf] }
  0x11   : > { %v302_v3 = vmax.bf16 %v280_v1, %v258_v0  ;;  %v324_v4 = vld [vmem:[%s602_s26] sm:$0xf]  ;;  %v303_v8 = vmax.bf16 %v281_v6, %v259_v2  ;;  %v325_v9 = vld [vmem:[%s602_s26 + $0x4] sm:$0x1]  ;;  %v326_v14 = vld [vmem:[%s602_s26 + $0x8] sm:$0xf]  ;;  %v304_v17 = vmax.bf16 %v282_v13, %v260_v11 }
  0x12   : > { %v346_v5 = vld [vmem:[%s607_s29] sm:$0xf]  ;;  %v347_v10 = vld [vmem:[%s607_s29 + $0x4] sm:$0x1]  ;;  %v348_v15 = vld [vmem:[%s607_s29 + $0x8] sm:$0xf] }
  0x13   : > { %v368_v7 = vmax.bf16 %v346_v5, %v324_v4  ;;  %v369_v12 = vmax.bf16 %v347_v10, %v325_v9  ;;  %v370_v18 = vmax.bf16 %v348_v15, %v326_v14  ;;  %v261_v19 = vld [vmem:[%s592_s20 + $0xc] sm:$0x1]  ;;  %v262_v25 = vld [vmem:[%s592_s20 + $0x10] sm:$0xf]  ;;  %v263_v32 = vld [vmem:[%s592_s20 + $0x14] sm:$0x1] }
  0x14   : > { %v283_v20 = vld [vmem:[%s597_s23 + $0xc] sm:$0x1]  ;;  %v284_v26 = vld [vmem:[%s597_s23 + $0x10] sm:$0xf]  ;;  %v285_v34 = vld [vmem:[%s597_s23 + $0x14] sm:$0x1] }
  0x15   : > { %v390_v16 = vmax.bf16 %v368_v7, %v302_v3  ;;  %v327_v21 = vld [vmem:[%s602_s26 + $0xc] sm:$0x1]  ;;  %v391_v22 = vmax.bf16 %v369_v12, %v303_v8  ;;  %v305_v23 = vmax.bf16 %v283_v20, %v261_v19  ;;  %v392_v27 = vmax.bf16 %v370_v18, %v304_v17  ;;  %v328_v30 = vld [vmem:[%s602_s26 + $0x10] sm:$0xf]  ;;  %v329_v35 = vld [vmem:[%s602_s26 + $0x14] sm:$0x1] }
  0x16   : > { %v349_v24 = vld [vmem:[%s607_s29 + $0xc] sm:$0x1]  ;;  %v306_v29 = vmax.bf16 %v284_v26, %v262_v25  ;;  %v350_v31 = vld [vmem:[%s607_s29 + $0x10] sm:$0xf]  ;;  %v351_v36 = vld [vmem:[%s607_s29 + $0x14] sm:$0x1]  ;;  %v307_v38 = vmax.bf16 %v285_v34, %v263_v32 }
  0x17   : > { %413 = vst.msk [vmem:[%s621_s6] sm:$0xf] %vm412_vm0, %v390_v16  ;;  %v371_v28 = vmax.bf16 %v349_v24, %v327_v21  ;;  %v372_v33 = vmax.bf16 %v350_v31, %v328_v30  ;;  %416 = vst.msk [vmem:[%s621_s6 + $0x8] sm:$0xf] %vm412_vm0, %v392_v27  ;;  %v373_v39 = vmax.bf16 %v351_v36, %v329_v35  ;;  %v264_v40 = vld [vmem:[%s592_s20 + $0x18] sm:$0xf] }
  0x18   : > { %415 = vst.msk [vmem:[%s621_s6 + $0x4] sm:$0x1] %vm414_vm1, %v391_v22  ;;  %v286_v41 = vld [vmem:[%s597_s23 + $0x18] sm:$0xf]  ;;  %v265_v46 = vld [vmem:[%s592_s20 + $0x1c] sm:$0x1] }
  0x19   : > { %v393_v37 = vmax.bf16 %v371_v28, %v305_v23  ;;  %v330_v42 = vld [vmem:[%s602_s26 + $0x18] sm:$0xf]  ;;  %v394_v43 = vmax.bf16 %v372_v33, %v306_v29  ;;  %v308_v44 = vmax.bf16 %v286_v41, %v264_v40  ;;  %v287_v47 = vld [vmem:[%s597_s23 + $0x1c] sm:$0x1]  ;;  %v395_v48 = vmax.bf16 %v373_v39, %v307_v38  ;;  %v266_v53 = vld [vmem:[%s592_s20 + $0x20] sm:$0xf] }
  0x1a   : > { %v352_v45 = vld [vmem:[%s607_s29 + $0x18] sm:$0xf]  ;;  %v309_v50 = vmax.bf16 %v287_v47, %v265_v46  ;;  %v331_v51 = vld [vmem:[%s602_s26 + $0x1c] sm:$0x1]  ;;  %v288_v55 = vld [vmem:[%s597_s23 + $0x20] sm:$0xf] }
  0x1b   : > { %417 = vst.msk [vmem:[%s621_s6 + $0xc] sm:$0x1] %vm414_vm1, %v393_v37  ;;  %v374_v49 = vmax.bf16 %v352_v45, %v330_v42  ;;  %v353_v52 = vld [vmem:[%s607_s29 + $0x1c] sm:$0x1]  ;;  %v332_v56 = vld [vmem:[%s602_s26 + $0x20] sm:$0xf]  ;;  %v310_v59 = vmax.bf16 %v288_v55, %v266_v53 }
  0x1c   : > { %418 = vst.msk [vmem:[%s621_s6 + $0x10] sm:$0xf] %vm412_vm0, %v394_v43  ;;  %v375_v54 = vmax.bf16 %v353_v52, %v331_v51  ;;  %v354_v57 = vld [vmem:[%s607_s29 + $0x20] sm:$0xf]  ;;  %v267_v61 = vld [vmem:[%s592_s20 + $0x24] sm:$0x1] }
  0x1d   : > { %419 = vst.msk [vmem:[%s621_s6 + $0x14] sm:$0x1] %vm414_vm1, %v395_v48  ;;  %v396_v58 = vmax.bf16 %v374_v49, %v308_v44  ;;  %v376_v60 = vmax.bf16 %v354_v57, %v332_v56  ;;  %v289_v62 = vld [vmem:[%s597_s23 + $0x24] sm:$0x1]  ;;  %v268_v3 = vld [vmem:[%s592_s20 + $0x28] sm:$0xf] }
  0x1e   : > { %v333_v63 = vld [vmem:[%s602_s26 + $0x24] sm:$0x1]  ;;  %v397_v0 = vmax.bf16 %v375_v54, %v309_v50  ;;  %v311_v1 = vmax.bf16 %v289_v62, %v267_v61  ;;  %v290_v4 = vld [vmem:[%s597_s23 + $0x28] sm:$0xf]  ;;  %v269_v10 = vld [vmem:[%s592_s20 + $0x2c] sm:$0x1] }
  0x1f   : > { %v355_v2 = vld [vmem:[%s607_s29 + $0x24] sm:$0x1]  ;;  %420 = vst.msk [vmem:[%s621_s6 + $0x18] sm:$0xf] %vm412_vm0, %v396_v58  ;;  %v398_v5 = vmax.bf16 %v376_v60, %v310_v59  ;;  %v312_v7 = vmax.bf16 %v290_v4, %v268_v3  ;;  %v334_v8 = vld [vmem:[%s602_s26 + $0x28] sm:$0xf] }
  0x20   : > { %v377_v6 = vmax.bf16 %v355_v2, %v333_v63  ;;  %v356_v9 = vld [vmem:[%s607_s29 + $0x28] sm:$0xf]  ;;  %421 = vst.msk [vmem:[%s621_s6 + $0x1c] sm:$0x1] %vm414_vm1, %v397_v0  ;;  %v291_v12 = vld [vmem:[%s597_s23 + $0x2c] sm:$0x1] }
  0x21   : > { %v378_v11 = vmax.bf16 %v356_v9, %v334_v8  ;;  %v335_v13 = vld [vmem:[%s602_s26 + $0x2c] sm:$0x1]  ;;  %422 = vst.msk [vmem:[%s621_s6 + $0x20] sm:$0xf] %vm412_vm0, %v398_v5  ;;  %v313_v16 = vmax.bf16 %v291_v12, %v269_v10  ;;  %v270_v18 = vld [vmem:[%s592_s20 + $0x30] sm:$0xf] }
  0x22   : > { %v357_v14 = vld [vmem:[%s607_s29 + $0x2c] sm:$0x1]  ;;  %v399_v15 = vmax.bf16 %v377_v6, %v311_v1  ;;  %v292_v19 = vld [vmem:[%s597_s23 + $0x30] sm:$0xf]  ;;  %v271_v24 = vld [vmem:[%s592_s20 + $0x34] sm:$0x1] }
  0x23   : > { %v379_v17 = vmax.bf16 %v357_v14, %v335_v13  ;;  %v336_v20 = vld [vmem:[%s602_s26 + $0x30] sm:$0xf]  ;;  %v400_v21 = vmax.bf16 %v378_v11, %v312_v7  ;;  %v314_v22 = vmax.bf16 %v292_v19, %v270_v18  ;;  %v293_v25 = vld [vmem:[%s597_s23 + $0x34] sm:$0x1]  ;;  %v272_v31 = vld [vmem:[%s592_s20 + $0x38] sm:$0xf] }
  0x24   : > { %v358_v23 = vld [vmem:[%s607_s29 + $0x30] sm:$0xf]  ;;  %423 = vst.msk [vmem:[%s621_s6 + $0x24] sm:$0x1] %vm414_vm1, %v399_v15  ;;  %v315_v28 = vmax.bf16 %v293_v25, %v271_v24  ;;  %v337_v29 = vld [vmem:[%s602_s26 + $0x34] sm:$0x1] }
  0x25   : > { %v401_v26 = vmax.bf16 %v379_v17, %v313_v16  ;;  %v380_v27 = vmax.bf16 %v358_v23, %v336_v20  ;;  %v359_v30 = vld [vmem:[%s607_s29 + $0x34] sm:$0x1]  ;;  %424 = vst.msk [vmem:[%s621_s6 + $0x28] sm:$0xf] %vm412_vm0, %v400_v21  ;;  %v294_v33 = vld [vmem:[%s597_s23 + $0x38] sm:$0xf] }
  0x26   : > { %v381_v32 = vmax.bf16 %v359_v30, %v337_v29  ;;  %v338_v34 = vld [vmem:[%s602_s26 + $0x38] sm:$0xf]  ;;  %v316_v37 = vmax.bf16 %v294_v33, %v272_v31  ;;  %v273_v39 = vld [vmem:[%s592_s20 + $0x3c] sm:$0x1]  ;;  %v274_v45 = vld [vmem:[%s592_s20 + $0x40] sm:$0xf] }
  0x27   : > { %v360_v35 = vld [vmem:[%s607_s29 + $0x38] sm:$0xf]  ;;  %425 = vst.msk [vmem:[%s621_s6 + $0x2c] sm:$0x1] %vm414_vm1, %v401_v26  ;;  %v402_v36 = vmax.bf16 %v380_v27, %v314_v22  ;;  %v295_v40 = vld [vmem:[%s597_s23 + $0x3c] sm:$0x1] }
  0x28   : > { %v382_v38 = vmax.bf16 %v360_v35, %v338_v34  ;;  %v339_v41 = vld [vmem:[%s602_s26 + $0x3c] sm:$0x1]  ;;  %v403_v42 = vmax.bf16 %v381_v32, %v315_v28  ;;  %v317_v43 = vmax.bf16 %v295_v40, %v273_v39  ;;  %v296_v46 = vld [vmem:[%s597_s23 + $0x40] sm:$0xf]  ;;  %v275_v52 = vld [vmem:[%s592_s20 + $0x44] sm:$0x1] }
  0x29   : > { %v361_v44 = vld [vmem:[%s607_s29 + $0x3c] sm:$0x1]  ;;  %426 = vst.msk [vmem:[%s621_s6 + $0x30] sm:$0xf] %vm412_vm0, %v402_v36  ;;  %v318_v49 = vmax.bf16 %v296_v46, %v274_v45  ;;  %v340_v50 = vld [vmem:[%s602_s26 + $0x40] sm:$0xf] }
  0x2a   : > { %v404_v47 = vmax.bf16 %v382_v38, %v316_v37  ;;  %v383_v48 = vmax.bf16 %v361_v44, %v339_v41  ;;  %v362_v51 = vld [vmem:[%s607_s29 + $0x40] sm:$0xf]  ;;  %427 = vst.msk [vmem:[%s621_s6 + $0x34] sm:$0x1] %vm414_vm1, %v403_v42  ;;  %v297_v54 = vld [vmem:[%s597_s23 + $0x44] sm:$0x1] }
  0x2b   : > { %v384_v53 = vmax.bf16 %v362_v51, %v340_v50  ;;  %v341_v55 = vld [vmem:[%s602_s26 + $0x44] sm:$0x1]  ;;  %v319_v58 = vmax.bf16 %v297_v54, %v275_v52  ;;  %v276_v60 = vld [vmem:[%s592_s20 + $0x48] sm:$0xf]  ;;  %v277_v2 = vld [vmem:[%s592_s20 + $0x4c] sm:$0x1] }
  0x2c   : > { %v363_v56 = vld [vmem:[%s607_s29 + $0x44] sm:$0x1]  ;;  %428 = vst.msk [vmem:[%s621_s6 + $0x38] sm:$0xf] %vm412_vm0, %v404_v47  ;;  %v405_v57 = vmax.bf16 %v383_v48, %v317_v43  ;;  %v298_v61 = vld [vmem:[%s597_s23 + $0x48] sm:$0xf] }
  0x2d   : > { %v385_v59 = vmax.bf16 %v363_v56, %v341_v55  ;;  %v342_v62 = vld [vmem:[%s602_s26 + $0x48] sm:$0xf]  ;;  %v406_v63 = vmax.bf16 %v384_v53, %v318_v49  ;;  %v320_v0 = vmax.bf16 %v298_v61, %v276_v60  ;;  %v299_v3 = vld [vmem:[%s597_s23 + $0x4c] sm:$0x1]  ;;  %v278_v9 = vld [vmem:[%s592_s20 + $0x50] sm:$0xf] }
  0x2e   : > { %v364_v1 = vld [vmem:[%s607_s29 + $0x48] sm:$0xf]  ;;  %429 = vst.msk [vmem:[%s621_s6 + $0x3c] sm:$0x1] %vm414_vm1, %v405_v57  ;;  %v321_v6 = vmax.bf16 %v299_v3, %v277_v2  ;;  %v343_v7 = vld [vmem:[%s602_s26 + $0x4c] sm:$0x1] }
  0x2f   : > { %v407_v4 = vmax.bf16 %v385_v59, %v319_v58  ;;  %v386_v5 = vmax.bf16 %v364_v1, %v342_v62  ;;  %v365_v8 = vld [vmem:[%s607_s29 + $0x4c] sm:$0x1]  ;;  %430 = vst.msk [vmem:[%s621_s6 + $0x40] sm:$0xf] %vm412_vm0, %v406_v63  ;;  %v300_v11 = vld [vmem:[%s597_s23 + $0x50] sm:$0xf] }
  0x30   : > { %v387_v10 = vmax.bf16 %v365_v8, %v343_v7  ;;  %v344_v12 = vld [vmem:[%s602_s26 + $0x50] sm:$0xf]  ;;  %v322_v15 = vmax.bf16 %v300_v11, %v278_v9  ;;  %v279_v17 = vld [vmem:[%s592_s20 + $0x54] sm:$0x1] }
  0x31   : > { %v366_v13 = vld [vmem:[%s607_s29 + $0x50] sm:$0xf]  ;;  %431 = vst.msk [vmem:[%s621_s6 + $0x44] sm:$0x1] %vm414_vm1, %v407_v4  ;;  %v408_v14 = vmax.bf16 %v386_v5, %v320_v0  ;;  %v301_v18 = vld [vmem:[%s597_s23 + $0x54] sm:$0x1] }
  0x32   : > { %v388_v16 = vmax.bf16 %v366_v13, %v344_v12  ;;  %v345_v19 = vld [vmem:[%s602_s26 + $0x54] sm:$0x1]  ;;  %v409_v20 = vmax.bf16 %v387_v10, %v321_v6  ;;  %v323_v21 = vmax.bf16 %v301_v18, %v279_v17 }
  0x33   : > { %v367_v22 = vld [vmem:[%s607_s29 + $0x54] sm:$0x1]  ;;  %432 = vst.msk [vmem:[%s621_s6 + $0x48] sm:$0xf] %vm412_vm0, %v408_v14 }
  0x34   : > { %v410_v23 = vmax.bf16 %v388_v16, %v322_v15  ;;  %v389_v24 = vmax.bf16 %v367_v22, %v345_v19  ;;  %433 = vst.msk [vmem:[%s621_s6 + $0x4c] sm:$0x1] %vm414_vm1, %v409_v20 }
  0x36   : > { %434 = vst.msk [vmem:[%s621_s6 + $0x50] sm:$0xf] %vm412_vm0, %v410_v23  ;;  %v411_v25 = vmax.bf16 %v389_v24, %v323_v21 }
  0x38   : > { %435 = vst.msk [vmem:[%s621_s6 + $0x54] sm:$0x1] %vm414_vm1, %v411_v25 }
  0x39 PF: > { %s14_s15 = sadd.s32 1, %s554_s15  }
  0x3a   : > { %p11_p4 = scmp.ge.s32.totalorder %s14_s15, 4  }
  0x3c   :  { %13 = sbr.rel (!%p11_p4) target bundleno = 1 (0x1), region = 75 }

// kernel: down_forward.4
= control target key start
LH: loop header
LB: loop body
LE: loop exit
PB: predicated region body
PF: predicated region fallthrough
CT: control target
= control target key end

     0   :  { %s2475_s12 = smov 0   ;;  %s3042_s0 = inlined_call_operand.vmem [shape: bf16[2,110,64], index: 0, kind: input, shape index: {}]   ;;  %s3043_s1 = inlined_call_operand.vmem [shape: bf16[9,64,128], index: 1, kind: input, shape index: {}]   ;;  %s3044_s2 = inlined_call_operand.vmem [shape: f32[1,128], index: 2, kind: input, shape index: {}]   ;;  %s3045_s3 = inlined_call_operand.vmem [shape: bf16[2,80,128], index: 3, kind: output, shape index: {}]  }
   0x1 LB: > { %s1806_s13 = sadd.s32 4294967295, %s2451_s12   ;;  %p1810_p0 = scmp.ge.s32.totalorder %s2451_s12, 1  ;;  %s2451_s12 = sphi %s2475_s12, %s13_s12  }
   0x2   : > { %p137_p1 = scmp.lt.s32.totalorder %s2451_s12, 3 }
   0x4   : > { %p138_p2 = pnand %p1810_p0, %p137_p1 }
   0x5   : > { %p161_p3 = scmp.lt.s32.totalorder (!%p138_p2), %s1806_s13, 1 }
   0x6   : > { %141 = sbr.rel (%p138_p2) target bundleno = 412 (0x19c), region = 32 }
   0xb   : > { %v2386_v0 = vld [vmem:[%s3043_s1 + $0x38] sm:$0xff]   ;;  %v2453_v1 = vmov 0.0   ;;  %v2387_v2 = vld [vmem:[%s3043_s1 + $0x30] sm:$0xff]   ;;  %vm2454_vm0 = vmmov 0   ;;  %s3047_s13 = smov (!%p161_p3, %s1806_s13), 1  ;;  %v2388_v3 = vld [vmem:[%s3043_s1 + $0x28] sm:$0xff]  }
   0xc   : > { %2366 = vmatprep.subr.bf16.mxu1 %v2453_v1  ;;  %2114 = vmatprep.subr.bf16.mxu0 %v2453_v1  ;;  %s2374_s20 = smul.u32 56, %s3047_s13  ;;  %v2389_v4 = vld [vmem:[%s3043_s1 + $0x20] sm:$0xff]   ;;  %vm228_vm1 = vsmask.f32 7424  ;;  %vm297_vm2 = vcmask 523264   ;;  %v2392_v19 = vld [vmem:[%s3043_s1 + $0x18] sm:$0xff]  }
   0xd   : > { %2370 = vmatpush3.bf16.msra.mxu1 %v2386_v0  ;;  %2115 = vmatpush3.bf16.msra.mxu0 %v2386_v0  ;;  %v2395_v26 = vld [vmem:[%s3043_s1 + $0x58] sm:$0xff]   ;;  %v2396_v32 = vld [vmem:[%s3043_s1 + $0x10] sm:$0xff]   ;;  %v2399_v37 = vld [vmem:[%s3043_s1 + $0x8] sm:$0xff]   ;;  %vm506_vm3 = vcmask 1046528   ;;  %vm834_vm4 = vsmask.f32 6400 }
   0xe   : > { %2367 = vmatprep.subr.bf16.mxu1 %v2453_v1  ;;  %2116 = vmatprep.subr.bf16.mxu0 %v2453_v1  ;;  %s2511_s25 = scalar_lea.vmem %s3042_s0, %s2374_s20  ;;  %v2398_v35 = vld [vmem:[%s3043_s1 + $0x50] sm:$0xff]   ;;  %v2400_v43 = vld [vmem:[%s3043_s1 + $0x48] sm:$0xff]   ;;  %v2403_v47 = vld [vmem:[%s3043_s1] sm:$0xff]   ;;  %vm1023_vm5 = vcmask 1045504   ;;  %vm1540_vm6 = vcmask 1044480   ;;  %s2375_s18 = smul.u32 40, %s3047_s13 }
   0xf   : > { %2130 = vmatprep.mubr.msk.bf16.mxu1 %vm2454_vm0, %v2453_v1  ;;  %2122 = vmatprep.mubr.msk.bf16.mxu0 %vm2454_vm0, %v2453_v1  ;;  %v2514_v5 = vld [vmem:[%s2511_s25 + $0x10] sm:$0xff]   ;;  %v2517_v6 = vld [vmem:[%s2511_s25 + $0x18] sm:$0xff]   ;;  %v172_v7 = vld [vmem:[%s2511_s25] sm:$0xf]  ;;  %vm1351_vm7 = vsmask.f32 5376 }
  0x10   : > { %v2523_v8 = vld [vmem:[%s2511_s25 + $0x4] sm:$0xf]  ;;  %v245_v9 = vshll.u32 %v2514_v5, 16  ;;  %v249_v10 = vshrl.u32 %v2514_v5, 16  ;;  %v253_v11 = vshll.u32 %v2517_v6, 16  ;;  %v2532_v13 = vld [vmem:[%s2511_s25 + $0x8] sm:$0xff]   ;;  %s3009_s21 = scalar_lea.vmem %s3045_s3, %s2375_s18 }
  0x11   : > { %2371 = vmatpush3.bf16.msra.mxu1 %v2387_v2  ;;  %2117 = vmatpush3.bf16.msra.mxu0 %v2387_v2  ;;  %v2529_v12 = vcombine.low %v172_v7, %v2523_v8  ;;  %v2535_v14 = vld [vmem:[%s2511_s25 + $0x20] sm:$0xff]   ;;  %v237_v20 = vshll.u32 %v2532_v13, 16  ;;  %v257_v21 = vshrl.u32 %v2517_v6, 16  ;;  %v241_v27 = vshrl.u32 %v2532_v13, 16  ;;  %v2406_v53 = vld [vmem:[%s3043_s1 + $0x98] sm:$0xff]   ;;  %v2408_v55 = vld [vmem:[%s3043_s1 + $0x90] sm:$0xff]  }
  0x12   : > { %2368 = vmatprep.subr.bf16.mxu1 %v2453_v1  ;;  %2118 = vmatprep.subr.bf16.mxu0 %v2453_v1  ;;  %v247_v15 = vrot.slane %v245_v9, 1  ;;  %v255_v16 = vrot.slane %v253_v11, 1  ;;  %v261_v24 = vshll.u32 %v2535_v14, 16  ;;  %v2554_v30 = vld [vmem:[%s2511_s25 + $0x28] ss:$0 sps:$4 sm:$0x11]  }
  0x13   : > { %v230_v17 = vshrl.u32 %v2529_v12, 16  ;;  %v232_v18 = vshll.u32 %v2529_v12, 16  ;;  %v239_v25 = vrot.slane %v237_v20, 1  ;;  %v493_v38 = vld [vmem:[%s2511_s25] sm:$0xe]  ;;  %v265_v40 = vshrl.u32 %v2535_v14, 16 }
  0x14   : > { %v251_v22 = vor.u32 %v249_v10, %v247_v15  ;;  %v259_v33 = vor.u32 %v257_v21, %v255_v16  ;;  %v263_v34 = vrot.slane %v261_v24, 1  ;;  %v269_v41 = vshll.u32 %v2554_v30, 16  ;;  %v2402_v48 = vld [vmem:[%s3043_s1 + $0x40] sm:$0xff]   ;;  %v2405_v58 = vld [vmem:[%s3043_s1 + $0x78] sm:$0xff]   ;;  %v2410_v62 = vld [vmem:[%s3043_s1 + $0x88] sm:$0xff]  }
  0x15   : > { %2372 = vmatpush3.bf16.msra.mxu1 %v2388_v3  ;;  %2119 = vmatpush3.bf16.msra.mxu0 %v2388_v3  ;;  %v234_v23 = vrot.slane %v232_v18, 1  ;;  %v243_v36 = vor.u32 %v241_v27, %v239_v25  ;;  %v1853_v44 = vcombine.low %v493_v38, %v2523_v8  ;;  %v508_v50 = vrot.slane %v2532_v13, 1  ;;  %v2617_v56 = vld [vmem:[%s2511_s25 + $0x1c] sm:$0xff]   ;;  %v2621_v57 = vld [vmem:[%s2511_s25 + $0x24] sm:$0xff]   ;;  %v2407_v0 = vld [vmem:[%s3043_s1 + $0x70] sm:$0xff]  }
  0x16   : > { %2369 = vmatprep.subr.bf16.mxu1 %v2453_v1  ;;  %2120 = vmatprep.subr.bf16.mxu0 %v2453_v1  ;;  %v256_v28 = vsel %vm228_vm1, %v251_v22, %v255_v16  ;;  %v264_v39 = vsel %vm228_vm1, %v259_v33, %v263_v34  ;;  %v267_v45 = vor.u32 %v265_v40, %v263_v34  ;;  %v271_v46 = vrot.slane %v269_v41, 1  ;;  %v2426_v2 = vld [vmem:[%s2511_s25 + $0x2c] ss:$0 sps:$4 sm:$0x11]   ;;  %v2411_v11 = vld [vmem:[%s3043_s1 + $0x60] sm:$0xff]  }
  0x17   : > { %v235_v29 = vor.u32 %v234_v23, %v230_v17  ;;  %v248_v42 = vsel %vm228_vm1, %v243_v36, %v247_v15  ;;  %v507_v49 = vrot.slane %v1853_v44, 1  ;;  %v510_v54 = vrot.slane %v2514_v5, 1  ;;  %v2409_v8 = vld [vmem:[%s3043_s1 + $0x68] sm:$0xff]  }
  0x18   : > { %v272_v51 = vsel %vm228_vm1, %v267_v45, %v271_v46  ;;  %v693_v59 = vrot.slane %v2617_v56, 1  ;;  %v695_v60 = vrot.slane %v2621_v57, 1  ;;  %v512_v3 = vrot.slane %v2517_v6, 1  ;;  %v2678_v15 = vld [vmem:[%s2511_s25 + $0x8] sm:$0xf]  ;;  %v2684_v18 = vld [vmem:[%s2511_s25 + $0xc] sm:$0xff]  }
  0x19   : > { %2373 = vmatpush3.bf16.msra.mxu1 %v2389_v4  ;;  %2121 = vmatpush3.bf16.msra.mxu0 %v2389_v4  ;;  %v240_v31 = vsel %vm228_vm1, %v235_v29, %v239_v25  ;;  %v509_v52 = vsel %vm506_vm3, %v507_v49, %v508_v50  ;;  %v511_v61 = vsel %vm506_vm3, %v508_v50, %v510_v54  ;;  %v2412_v4 = vld [vmem:[%s3043_s1 + $0x80] sm:$0xff]   ;;  %v697_v7 = vrot.slane %v2426_v2, 1  ;;  %v2423_v46 = vld [vmem:[%s3043_s1 + $0xc8] sm:$0xff]  }
  0x1a   : > { %2142 = vmatprep.subr.bf16.mxu1 %v2453_v1  ;;  %2170 = vmatprep.subr.bf16.mxu0 %v2453_v1  ;;  %v2638_v63 = vsel %vm506_vm3, %v693_v59, %v695_v60  ;;  %v513_v10 = vsel %vm506_vm3, %v510_v54, %v512_v3  ;;  %v844_v22 = vshrl.u32 %v2684_v18, 16  ;;  %v847_v23 = vshll.u32 %v2684_v18, 16  ;;  %v2422_v54 = vld [vmem:[%s3043_s1 + $0xa8] sm:$0xff]  }
  0x1b   : > { %v2659_v9 = vsel %vm506_vm3, %v695_v60, %v697_v7  ;;  %v865_v40 = vshll.u32 %v2617_v56, 16  ;;  %v871_v50 = vshrl.u32 %v2621_v57, 16 }
  0x1c   : > { %2131 = vmatmul.mubr.msk.bf16.vlgmr.msra.gmra.mxu1 %vm297_vm2, %v256_v28  ;;  %2123 = vmatmul.mubr.msk.bf16.vlgmr.msra.gmra.mxu0 %vm297_vm2, %v240_v31  ;;  %v849_v27 = vrot.slane %v847_v23, 2  ;;  %v2698_v28 = vld [vmem:[%s2511_s25 + $0x14] sm:$0xff]  }
  0x1d   : > { %2143 = vmatpush3.bf16.msra.mxu1 %v2392_v19  ;;  %2134 = vmatprep.mubr.msk.bf16.mxu1 %vm2454_vm0, %v2453_v1  ;;  %v516_v19 = vrot.slane %v2554_v30, 1  ;;  %v853_v31 = vshrl.u32 %v2698_v28, 16  ;;  %v867_v45 = vrot.slane %v865_v40, 2 }
  0x1e   : > { %2144 = vmatprep.subr.bf16.mxu1 %v2453_v1  ;;  %2171 = vmatpush3.bf16.msra.mxu0 %v2395_v26  ;;  %v846_v26 = vrot.slane %v844_v22, 1 }
  0x1f   : > { %2126 = vmatprep.mubr.msk.bf16.mxu0 %vm2454_vm0, %v2453_v1  ;;  %2172 = vmatprep.subr.bf16.mxu0 %v2453_v1  ;;  %v855_v34 = vrot.slane %v853_v31, 1  ;;  %v1027_v31 = vrot.slane %v2698_v28, 2 }
  0x20   : > { %v850_v30 = vor.u32 %v849_v27, %v846_v26  ;;  %v2436_v26 = vld [vmem:[%s3043_s1 + $0x110] sm:$0xff]  }
  0x21   : > { %2145 = vmatpush3.bf16.msra.mxu1 %v2396_v32  ;;  %v856_v32 = vshll.u32 %v2698_v28, 16 }
  0x22   : > { %2146 = vmatprep.subr.bf16.mxu1 %v2453_v1  ;;  %2173 = vmatpush3.bf16.msra.mxu0 %v2398_v35 }
  0x23   : > { %2174 = vmatprep.subr.bf16.mxu0 %v2453_v1  ;;  %v858_v35 = vrot.slane %v856_v32, 2  ;;  %v2434_v32 = vld [vmem:[%s3043_s1 + $0xf0] sm:$0xff]  }
  0x24   : > { %2135 = vmatmul.mubr.msk.bf16.gmra.mxu1 %vm297_vm2, %v264_v39  ;;  %2127 = vmatmul.mubr.msk.bf16.gmra.mxu0 %vm297_vm2, %v248_v42  ;;  %v862_v39 = vshrl.u32 %v2617_v56, 16  ;;  %v2415_v42 = vld [vmem:[%s3043_s1 + $0xb8] sm:$0xff]  }
  0x25   : > { %2147 = vmatpush3.bf16.msra.mxu1 %v2399_v37  ;;  %2138 = vmatprep.mubr.msk.bf16.mxu1 %vm2454_vm0, %v2453_v1  ;;  %v689_v37 = vrot.slane %v2684_v18, 1  ;;  %v859_v38 = vor.u32 %v858_v35, %v855_v34  ;;  %v2438_v34 = vld [vmem:[%s3043_s1 + $0xe8] sm:$0xff]  }
  0x26   : > { %2148 = vmatprep.subr.bf16.mxu1 %v2453_v1  ;;  %2175 = vmatpush3.bf16.msra.mxu0 %v2400_v43  ;;  %v864_v44 = vrot.slane %v862_v39, 1 }
  0x27   : > { %2178 = vmatprep.mubr.msk.bf16.mxu0 %vm2454_vm0, %v2453_v1  ;;  %2176 = vmatprep.subr.bf16.mxu0 %v2453_v1  ;;  %v860_v43 = vsel %vm834_vm4, %v850_v30, %v859_v38 }
  0x28   : > { %v868_v49 = vor.u32 %v867_v45, %v864_v44 }
  0x29   : > { %2149 = vmatpush3.bf16.msra.mxu1 %v2403_v47  ;;  %v691_v47 = vrot.slane %v2698_v28, 1 }
  0x2a   : > { %2198 = vmatprep.subr.bf16.mxu1 %v2453_v1  ;;  %2177 = vmatpush3.bf16.msra.mxu0 %v2402_v48  ;;  %v2418_v48 = vld [vmem:[%s3043_s1 + $0xb0] sm:$0xff]  }
  0x2b   : > { %2226 = vmatprep.subr.bf16.mxu0 %v2453_v1 }
  0x2c   : > { %2139 = vmatmul.mubr.msk.bf16.gmra.mxu1 %vm297_vm2, %v272_v51  ;;  %v874_v51 = vshll.u32 %v2621_v57, 16 }
  0x2d   : > { %2150 = vmatprep.mubr.msk.bf16.mxu1 %vm2454_vm0, %v2453_v1  ;;  %2179 = vmatmul.mubr.msk.bf16.vlgmr.msra.gmra.mxu0 %vm297_vm2, %v509_v52  ;;  %v2427_v52 = vld [vmem:[%s3043_s1 + $0xc0] sm:$0xff]  }
  0x2e   : > { %2227 = vmatpush3.bf16.msra.mxu0 %v2406_v53  ;;  %2182 = vmatprep.mubr.msk.bf16.mxu0 %vm2454_vm0, %v2453_v1  ;;  %v692_v53 = vsel %vm506_vm3, %v689_v37, %v691_v47  ;;  %v876_v60 = vrot.slane %v874_v51, 2 }
  0x2f   : > { %2228 = vmatprep.subr.bf16.mxu0 %v2453_v1 }
  0x32   : > { %2229 = vmatpush3.bf16.msra.mxu0 %v2408_v55  ;;  %v869_v55 = vsel %vm834_vm4, %v859_v38, %v868_v49  ;;  %v2441_v38 = vld [vmem:[%s3043_s1 + $0xe0] sm:$0xff]  }
  0x33   : > { %2230 = vmatprep.subr.bf16.mxu0 %v2453_v1 }
  0x34   : > { %2151 = vmatmul.mubr.msk.bf16.vlgmr.msra.gmra.mxu1 %vm297_vm2, %v2529_v12  ;;  %v514_v12 = vrot.slane %v2535_v14, 1 }
  0x35   : > { %2199 = vmatpush3.bf16.msra.mxu1 %v2405_v58  ;;  %2154 = vmatprep.mubr.msk.bf16.mxu1 %vm2454_vm0, %v2453_v1  ;;  %v873_v58 = vrot.slane %v871_v50, 1 }
  0x36   : > { %2183 = vmatmul.mubr.msk.bf16.gmra.mxu0 %vm297_vm2, %v511_v61  ;;  %2200 = vmatprep.subr.bf16.mxu1 %v2453_v1  ;;  %v515_v16 = vsel %vm506_vm3, %v512_v3, %v514_v12  ;;  %v517_v24 = vsel %vm506_vm3, %v514_v12, %v516_v19  ;;  %v2760_v61 = vld [vmem:[%s2511_s25 + $0x2c] ss:$0 sps:$4 sm:$0x33]   ;;  %v1010_v19 = vld [vmem:[%s2511_s25 + $0x4] sm:$0xc] }
  0x37   : > { %2186 = vmatprep.mubr.msk.bf16.mxu0 %vm2454_vm0, %v2453_v1  ;;  %2231 = vmatpush3.bf16.msra.mxu0 %v2410_v62  ;;  %v2425_v62 = vld [vmem:[%s3043_s1 + $0xa0] sm:$0xff]   ;;  %v880_v2 = vshrl.u32 %v2760_v61, 16  ;;  %v883_v3 = vshll.u32 %v2760_v61, 16  ;;  %v2788_v12 = vld [vmem:[%s2511_s25 + $0xc] sm:$0xf]  ;;  %v1912_v22 = vcombine.low %v1010_v19, %v2678_v15 }
  0x38   : > { %2232 = vmatprep.subr.bf16.mxu0 %v2453_v1 }
  0x39   : > { %2201 = vmatpush3.bf16.msra.mxu1 %v2407_v0  ;;  %v877_v0 = vor.u32 %v876_v60, %v873_v58 }
  0x3a   : > { %2202 = vmatprep.subr.bf16.mxu1 %v2453_v1 }
  0x3b   : > { %2233 = vmatpush3.bf16.msra.mxu0 %v2412_v4  ;;  %v694_v4 = vsel %vm506_vm3, %v691_v47, %v693_v59  ;;  %v878_v7 = vsel %vm834_vm4, %v868_v49, %v877_v0  ;;  %v1157_v59 = vld [vmem:[%s2511_s25 + $0x8] sm:$0xc]  ;;  %v1033_v47 = vrot.slane %v2760_v61, 2 }
  0x3c   : > { %2155 = vmatmul.mubr.msk.bf16.gmra.mxu1 %vm297_vm2, %v2532_v13  ;;  %2282 = vmatprep.subr.bf16.mxu0 %v2453_v1  ;;  %v640_v13 = vld [vmem:[%s2511_s25 + $0x4] sm:$0xe] }
  0x3d   : > { %2158 = vmatprep.mubr.msk.bf16.mxu1 %vm2454_vm0, %v2453_v1  ;;  %2203 = vmatpush3.bf16.msra.mxu1 %v2409_v8  ;;  %v1871_v17 = vcombine.low %v640_v13, %v2678_v15  ;;  %v882_v8 = vrot.slane %v880_v2, 1 }
  0x3e   : > { %2187 = vmatmul.mubr.msk.bf16.gmra.mxu0 %vm297_vm2, %v513_v10  ;;  %2204 = vmatprep.subr.bf16.mxu1 %v2453_v1  ;;  %v885_v10 = vrot.slane %v883_v3, 2 }
  0x3f   : > { %2190 = vmatprep.mubr.msk.bf16.mxu0 %vm2454_vm0, %v2453_v1  ;;  %v836_v20 = vshrl.u32 %v1871_v17, 16  ;;  %v839_v21 = vshll.u32 %v1871_v17, 16  ;;  %v688_v36 = vrot.slane %v1871_v17, 1  ;;  %v2795_v17 = vld [vmem:[%s2511_s25 + $0x10] sm:$0xff]  }
  0x40   : > { %v1361_v49 = vshrl.u32 %v2795_v17, 16  ;;  %v1364_v50 = vshll.u32 %v2795_v17, 16 }
  0x41   : > { %2205 = vmatpush3.bf16.msra.mxu1 %v2411_v11  ;;  %v838_v25 = vrot.slane %v836_v20, 1  ;;  %v690_v41 = vsel %vm506_vm3, %v688_v36, %v689_v37  ;;  %v886_v11 = vor.u32 %v885_v10, %v882_v8  ;;  %v2863_v36 = vld [vmem:[%s2511_s25 + $0x28] sm:$0xff]   ;;  %v1029_v37 = vrot.slane %v2617_v56, 2 }
  0x42   : > { %2254 = vmatprep.subr.bf16.mxu1 %v2453_v1  ;;  %v1212_v39 = vrot.slane %v2863_v36, 2  ;;  %v1363_v58 = vrot.slane %v1361_v49, 2  ;;  %v1366_v60 = vrot.slane %v1364_v50, 3 }
  0x43   : > { %v887_v13 = vsel %vm834_vm4, %v877_v0, %v886_v11  ;;  %v1030_v40 = vsel %vm1023_vm5, %v1027_v31, %v1029_v37 }
  0x44   : > { %2159 = vmatmul.mubr.msk.bf16.gmra.mxu1 %vm297_vm2, %v2514_v5  ;;  %v841_v5 = vrot.slane %v839_v21, 2  ;;  %v1206_v21 = vrot.slane %v2795_v17, 2  ;;  %v1367_v0 = vor.u32 %v1366_v60, %v1363_v58 }
  0x45   : > { %2162 = vmatprep.mubr.msk.bf16.mxu1 %vm2454_vm0, %v2453_v1 }
  0x46   : > { %2191 = vmatmul.mubr.msk.bf16.gmra.mxu0 %vm297_vm2, %v515_v16  ;;  %v842_v29 = vor.u32 %v841_v5, %v838_v25  ;;  %v2792_v16 = vcombine.low %v1157_v59, %v2788_v12  ;;  %v1024_v25 = vrot.slane %v1912_v22, 2  ;;  %v1025_v5 = vrot.slane %v2684_v18, 2  ;;  %v2431_v18 = vld [vmem:[%s3043_s1 + $0xf8] sm:$0xff]  }
  0x47   : > { %2194 = vmatprep.mubr.msk.bf16.mxu0 %vm2454_vm0, %v2453_v1 }
  0x48   : > { %v851_v33 = vsel %vm834_vm4, %v842_v29, %v850_v30  ;;  %v1205_v20 = vrot.slane %v2792_v16, 2  ;;  %v2834_v29 = vld [vmem:[%s2511_s25 + $0x20] sm:$0xff]   ;;  %v2439_v30 = vld [vmem:[%s3043_s1 + $0x108] sm:$0xff]   ;;  %v1028_v28 = vsel %vm1023_vm5, %v1025_v5, %v1027_v31 }
  0x4a   : > { %v1207_v23 = vsel %vm1023_vm5, %v1205_v20, %v1206_v21 }
  0x4c   : > { %2163 = vmatmul.mubr.msk.bf16.gmra.mxu1 %vm297_vm2, %v2517_v6  ;;  %v2416_v6 = vld [vmem:[%s3043_s1 + $0xd8] sm:$0xff]  }
  0x4d   : > { %2166 = vmatprep.mubr.msk.bf16.mxu1 %vm2454_vm0, %v2453_v1 }
  0x4e   : > { %2195 = vmatmul.mubr.msk.bf16.gmra.mxu0 %vm297_vm2, %v517_v24  ;;  %v2813_v24 = vld [vmem:[%s2511_s25 + $0x18] sm:$0xff]  }
  0x4f   : > { %2234 = vmatprep.mubr.msk.bf16.mxu0 %vm2454_vm0, %v2453_v1  ;;  %v1208_v15 = vrot.slane %v2813_v24, 2  ;;  %v1370_v2 = vshrl.u32 %v2813_v24, 16  ;;  %v1373_v3 = vshll.u32 %v2813_v24, 16 }
  0x51   : > { %v1209_v27 = vsel %vm1023_vm5, %v1206_v21, %v1208_v15  ;;  %v1372_v8 = vrot.slane %v1370_v2, 2  ;;  %v1375_v10 = vrot.slane %v1373_v3, 3 }
  0x53   : > { %v1376_v59 = vor.u32 %v1375_v10, %v1372_v8 }
  0x54   : > { %2167 = vmatmul.mubr.msk.bf16.gmra.mxu1 %vm297_vm2, %v2535_v14  ;;  %v2420_v14 = vld [vmem:[%s3043_s1 + $0xd0] sm:$0xff]  }
  0x55   : > { %2206 = vmatprep.mubr.msk.bf16.mxu1 %vm2454_vm0, %v2453_v1 }
  0x56   : > { %2235 = vmatmul.mubr.msk.bf16.vlgmr.msra.gmra.mxu0 %vm297_vm2, %v851_v33  ;;  %v1210_v33 = vrot.slane %v2834_v29, 2 }
  0x57   : > { %2283 = vmatpush3.bf16.msra.mxu0 %v2416_v6  ;;  %2238 = vmatprep.mubr.msk.bf16.mxu0 %vm2454_vm0, %v2453_v1  ;;  %v2442_v6 = vld [vmem:[%s3043_s1 + $0x100] sm:$0xff]  }
  0x58   : > { %2284 = vmatprep.subr.bf16.mxu0 %v2453_v1  ;;  %v1211_v35 = vsel %vm1023_vm5, %v1208_v15, %v1210_v33  ;;  %v1213_v56 = vsel %vm1023_vm5, %v1210_v33, %v1212_v39 }
  0x5b   : > { %2285 = vmatpush3.bf16.msra.mxu0 %v2420_v14  ;;  %v2440_v14 = vld [vmem:[%s2511_s25 + $0x30] ss:$0 sps:$4 sm:$0x33]  }
  0x5c   : > { %2207 = vmatmul.mubr.msk.bf16.vlgmr.msra.gmra.mxu1 %vm297_vm2, %v690_v41  ;;  %2286 = vmatprep.subr.bf16.mxu0 %v2453_v1  ;;  %v1031_v41 = vrot.slane %v2621_v57, 2  ;;  %v1353_v57 = vshrl.u32 %v2792_v16, 16 }
  0x5d   : > { %2255 = vmatpush3.bf16.msra.mxu1 %v2415_v42  ;;  %2210 = vmatprep.mubr.msk.bf16.mxu1 %vm2454_vm0, %v2453_v1  ;;  %v1214_v42 = vrot.slane %v2440_v14, 2 }
  0x5e   : > { %2239 = vmatmul.mubr.msk.bf16.gmra.mxu0 %vm297_vm2, %v860_v43  ;;  %2256 = vmatprep.subr.bf16.mxu1 %v2453_v1  ;;  %v1527_v43 = vld [vmem:[%s2511_s25 + $0x8] sm:$0x8]  ;;  %v1032_v44 = vsel %vm1023_vm5, %v1029_v37, %v1031_v41 }
  0x5f   : > { %2242 = vmatprep.mubr.msk.bf16.mxu0 %vm2454_vm0, %v2453_v1  ;;  %2287 = vmatpush3.bf16.msra.mxu0 %v2423_v46  ;;  %v1215_v45 = vsel %vm1023_vm5, %v1212_v39, %v1214_v42  ;;  %v1971_v46 = vcombine.low %v1527_v43, %v2788_v12  ;;  %v1379_v12 = vshrl.u32 %v2834_v29, 16 }
  0x60   : > { %2288 = vmatprep.subr.bf16.mxu0 %v2453_v1 }
  0x61   : > { %2257 = vmatpush3.bf16.msra.mxu1 %v2418_v48  ;;  %v1356_v48 = vshll.u32 %v2792_v16, 16  ;;  %v1541_v51 = vrot.slane %v1971_v46, 3  ;;  %v1546_v16 = vrot.slane %v2834_v29, 3  ;;  %v1381_v19 = vrot.slane %v1379_v12, 2 }
  0x62   : > { %2258 = vmatprep.subr.bf16.mxu1 %v2453_v1 }
  0x63   : > { %2289 = vmatpush3.bf16.msra.mxu0 %v2427_v52  ;;  %v1542_v52 = vrot.slane %v2795_v17, 3  ;;  %v1377_v17 = vsel %vm1351_vm7, %v1367_v0, %v1376_v59 }
  0x64   : > { %2211 = vmatmul.mubr.msk.bf16.gmra.mxu1 %vm297_vm2, %v692_v53  ;;  %2338 = vmatprep.subr.bf16.mxu0 %v2453_v1  ;;  %v1034_v53 = vsel %vm1023_vm5, %v1031_v41, %v1033_v47 }
  0x65   : > { %2214 = vmatprep.mubr.msk.bf16.mxu1 %vm2454_vm0, %v2453_v1  ;;  %2259 = vmatpush3.bf16.msra.mxu1 %v2422_v54  ;;  %v1355_v54 = vrot.slane %v1353_v57, 2  ;;  %v1543_v61 = vsel %vm1540_vm6, %v1541_v51, %v1542_v52 }
  0x66   : > { %2243 = vmatmul.mubr.msk.bf16.gmra.mxu0 %vm297_vm2, %v869_v55  ;;  %2260 = vmatprep.subr.bf16.mxu1 %v2453_v1  ;;  %v1358_v55 = vrot.slane %v1356_v48, 3 }
  0x67   : > { %2246 = vmatprep.mubr.msk.bf16.mxu0 %vm2454_vm0, %v2453_v1 }
  0x69   : > { %2261 = vmatpush3.bf16.msra.mxu1 %v2425_v62  ;;  %v1359_v62 = vor.u32 %v1358_v55, %v1355_v54 }
  0x6a   : > { %2310 = vmatprep.subr.bf16.mxu1 %v2453_v1 }
  0x6c   : > { %2215 = vmatmul.mubr.msk.bf16.gmra.mxu1 %vm297_vm2, %v694_v4  ;;  %v1544_v4 = vrot.slane %v2813_v24, 3  ;;  %v1548_v24 = vrot.slane %v2863_v36, 3 }
  0x6d   : > { %2218 = vmatprep.mubr.msk.bf16.mxu1 %vm2454_vm0, %v2453_v1 }
  0x6e   : > { %2247 = vmatmul.mubr.msk.bf16.gmra.mxu0 %vm297_vm2, %v878_v7  ;;  %v1368_v7 = vsel %vm1351_vm7, %v1359_v62, %v1367_v0  ;;  %v1545_v11 = vsel %vm1540_vm6, %v1542_v52, %v1544_v4  ;;  %v1547_v21 = vsel %vm1540_vm6, %v1544_v4, %v1546_v16 }
  0x6f   : > { %2250 = vmatprep.mubr.msk.bf16.mxu0 %vm2454_vm0, %v2453_v1 }
  0x74   : > { %2219 = vmatmul.mubr.msk.bf16.gmra.mxu1 %vm297_vm2, %v2638_v63  ;;  %v2432_v63 = vld [vmem:[%s3043_s1 + $0x118] sm:$0xff]  }
  0x75   : > { %2222 = vmatprep.mubr.msk.bf16.mxu1 %vm2454_vm0, %v2453_v1 }
  0x76   : > { %2251 = vmatmul.mubr.msk.bf16.gmra.mxu0 %vm297_vm2, %v887_v13  ;;  %v1382_v13 = vshll.u32 %v2834_v29, 16 }
  0x77   : > { %2290 = vmatprep.mubr.msk.bf16.mxu0 %vm2454_vm0, %v2453_v1 }
  0x78   : > { %v1384_v20 = vrot.slane %v1382_v13, 3 }
  0x7a   : > { %v1385_v22 = vor.u32 %v1384_v20, %v1381_v19 }
  0x7c   : > { %2223 = vmatmul.mubr.msk.bf16.gmra.mxu1 %vm297_vm2, %v2659_v9  ;;  %v1026_v9 = vsel %vm1023_vm5, %v1024_v25, %v1025_v5  ;;  %v1386_v25 = vsel %vm1351_vm7, %v1376_v59, %v1385_v22 }
  0x7d   : > { %2262 = vmatprep.mubr.msk.bf16.mxu1 %vm2454_vm0, %v2453_v1 }
  0x7e   : > { %2291 = vmatmul.mubr.msk.bf16.vlgmr.msra.gmra.mxu0 %vm297_vm2, %v1207_v23  ;;  %v1388_v23 = vshrl.u32 %v2863_v36, 16 }
  0x7f   : > { %2339 = vmatpush3.bf16.msra.mxu0 %v2432_v63  ;;  %2294 = vmatprep.mubr.msk.bf16.mxu0 %vm2454_vm0, %v2453_v1  ;;  %v1391_v63 = vshll.u32 %v2863_v36, 16 }
  0x80   : > { %2340 = vmatprep.subr.bf16.mxu0 %v2453_v1  ;;  %v1390_v5 = vrot.slane %v1388_v23, 2 }
  0x81   : > { %v1393_v15 = vrot.slane %v1391_v63, 3 }
  0x83   : > { %2341 = vmatpush3.bf16.msra.mxu0 %v2436_v26  ;;  %v2444_v26 = vld [vmem:[%s2511_s25 + $0x30] ss:$0 sps:$4 sm:$0x77]  }
  0x84   : > { %2263 = vmatmul.mubr.msk.bf16.vlgmr.msra.gmra.mxu1 %vm297_vm2, %v1026_v9  ;;  %2342 = vmatprep.subr.bf16.mxu0 %v2453_v1  ;;  %v1549_v9 = vsel %vm1540_vm6, %v1546_v16, %v1548_v24  ;;  %v1400_v29 = vshll.u32 %v2444_v26, 16 }
  0x85   : > { %2311 = vmatpush3.bf16.msra.mxu1 %v2431_v18  ;;  %2266 = vmatprep.mubr.msk.bf16.mxu1 %vm2454_vm0, %v2453_v1  ;;  %v1394_v18 = vor.u32 %v1393_v15, %v1390_v5 }
  0x86   : > { %2295 = vmatmul.mubr.msk.bf16.gmra.mxu0 %vm297_vm2, %v1209_v27  ;;  %2312 = vmatprep.subr.bf16.mxu1 %v2453_v1  ;;  %v1397_v27 = vshrl.u32 %v2444_v26, 16  ;;  %v1402_v33 = vrot.slane %v1400_v29, 3 }
  0x87   : > { %2298 = vmatprep.mubr.msk.bf16.mxu0 %vm2454_vm0, %v2453_v1  ;;  %2343 = vmatpush3.bf16.msra.mxu0 %v2439_v30  ;;  %v1550_v30 = vrot.slane %v2444_v26, 3  ;;  %v1395_v31 = vsel %vm1351_vm7, %v1385_v22, %v1394_v18 }
  0x88   : > { %2344 = vmatprep.subr.bf16.mxu0 %v2453_v1 }
  0x89   : > { %2313 = vmatpush3.bf16.msra.mxu1 %v2434_v32  ;;  %v1399_v32 = vrot.slane %v1397_v27, 2 }
  0x8a   : > { %2314 = vmatprep.subr.bf16.mxu1 %v2453_v1 }
  0x8b   : > { %2345 = vmatpush3.bf16.msra.mxu0 %v2442_v6  ;;  %v1551_v6 = vsel %vm1540_vm6, %v1548_v24, %v1550_v30 }
  0x8c   : > { %2267 = vmatmul.mubr.msk.bf16.gmra.mxu1 %vm297_vm2, %v1028_v28  ;;  %v1403_v28 = vor.u32 %v1402_v33, %v1399_v32 }
  0x8d   : > { %2270 = vmatprep.mubr.msk.bf16.mxu1 %vm2454_vm0, %v2453_v1  ;;  %2315 = vmatpush3.bf16.msra.mxu1 %v2438_v34 }
  0x8e   : > { %2299 = vmatmul.mubr.msk.bf16.gmra.mxu0 %vm297_vm2, %v1211_v35  ;;  %2316 = vmatprep.subr.bf16.mxu1 %v2453_v1  ;;  %v1404_v34 = vsel %vm1351_vm7, %v1394_v18, %v1403_v28 }
  0x8f   : > { %2302 = vmatprep.mubr.msk.bf16.mxu0 %vm2454_vm0, %v2453_v1 }
  0x91   : > { %2317 = vmatpush3.bf16.msra.mxu1 %v2441_v38 }
  0x94   : > { %2271 = vmatmul.mubr.msk.bf16.gmra.mxu1 %vm297_vm2, %v1030_v40 }
  0x95   : > { %2274 = vmatprep.mubr.msk.bf16.mxu1 %vm2454_vm0, %v2453_v1 }
  0x96   : > { %2303 = vmatmul.mubr.msk.bf16.gmra.mxu0 %vm297_vm2, %v1213_v56 }
  0x97   : > { %2306 = vmatprep.mubr.msk.bf16.mxu0 %vm2454_vm0, %v2453_v1 }
  0x9c   : > { %2275 = vmatmul.mubr.msk.bf16.gmra.mxu1 %vm297_vm2, %v1032_v44 }
  0x9d   : > { %2278 = vmatprep.mubr.msk.bf16.mxu1 %vm2454_vm0, %v2453_v1 }
  0x9e   : > { %2307 = vmatmul.mubr.msk.bf16.gmra.mxu0 %vm297_vm2, %v1215_v45 }
  0x9f   : > { %2346 = vmatprep.mubr.msk.bf16.mxu0 %vm2454_vm0, %v2453_v1 }
  0xa4   : > { %2279 = vmatmul.mubr.msk.bf16.gmra.mxu1 %vm297_vm2, %v1034_v53 }
  0xa5   : > { %2318 = vmatprep.mubr.msk.bf16.mxu1 %vm2454_vm0, %v2453_v1 }
  0xa6   : > { %2347 = vmatmul.mubr.msk.bf16.vlgmr.msra.gmra.mxu0 %vm297_vm2, %v1543_v61 }
  0xa7   : > { %2350 = vmatprep.mubr.msk.bf16.mxu0 %vm2454_vm0, %v2453_v1 }
  0xac   : > { %2319 = vmatmul.mubr.msk.bf16.vlgmr.msra.gmra.mxu1 %vm297_vm2, %v1368_v7 }
  0xad   : > { %2322 = vmatprep.mubr.msk.bf16.mxu1 %vm2454_vm0, %v2453_v1 }
  0xae   : > { %2351 = vmatmul.mubr.msk.bf16.gmra.mxu0 %vm297_vm2, %v1545_v11 }
  0xaf   : > { %2354 = vmatprep.mubr.msk.bf16.mxu0 %vm2454_vm0, %v2453_v1 }
  0xb4   : > { %2323 = vmatmul.mubr.msk.bf16.gmra.mxu1 %vm297_vm2, %v1377_v17 }
  0xb5   : > { %2326 = vmatprep.mubr.msk.bf16.mxu1 %vm2454_vm0, %v2453_v1 }
  0xb6   : > { %2355 = vmatmul.mubr.msk.bf16.gmra.mxu0 %vm297_vm2, %v1547_v21 }
  0xb7   : > { %2358 = vmatprep.mubr.msk.bf16.mxu0 %vm2454_vm0, %v2453_v1 }
  0xbc   : > { %2327 = vmatmul.mubr.msk.bf16.gmra.mxu1 %vm297_vm2, %v1386_v25 }
  0xbd   : > { %2330 = vmatprep.mubr.msk.bf16.mxu1 %vm2454_vm0, %v2453_v1 }
  0xbe   : > { %2359 = vmatmul.mubr.msk.bf16.gmra.mxu0 %vm297_vm2, %v1549_v9 }
  0xbf   : > { %2362 = vmatprep.mubr.msk.bf16.mxu0 %vm2454_vm0, %v2453_v1 }
  0xc4   : > { %2331 = vmatmul.mubr.msk.bf16.gmra.mxu1 %vm297_vm2, %v1395_v31 }
  0xc5   : > { %2334 = vmatprep.mubr.msk.bf16.mxu1 %vm2454_vm0, %v2453_v1 }
  0xc6   : > { %2363 = vmatmul.mubr.msk.bf16.gmra.mxu0 %vm297_vm2, %v1551_v6 }
  0xcc   : > { %2335 = vmatmul.mubr.msk.bf16.gmra.mxu1 %vm297_vm2, %v1404_v34 }
  0xdc   : > { %v363_v35 = vpop.f32.mrf.mxu1  ;;  %v347_v37 = vpop.f32.mrf.mxu0 }
  0xde   : > { %v2132_v36 = vpop.f32.mrf.mxu1  ;;  %v2124_v39 = vpop.f32.mrf.mxu0 }
  0xe0   : > { %v366_v38 = vpop.f32.mrf.mxu1  ;;  %v350_v56 = vpop.f32.mrf.mxu0 }
  0xe2   : > { %v2133_v40 = vpop.f32.mrf.mxu1  ;;  %v2125_v41 = vpop.f32.mrf.mxu0 }
  0xe4   : > { %v371_v14 = vpop.f32.mrf.mxu1  ;;  %v355_v43 = vpop.f32.mrf.mxu0 }
  0xe6   : > { %v2136_v42 = vpop.f32.mrf.mxu1  ;;  %v2128_v1 = vpop.f32.mrf.mxu0 }
  0xe8   : > { %v374_v44 = vpop.f32.mrf.mxu1  ;;  %v358_v46 = vpop.f32.mrf.mxu0 }
  0xea   : > { %v2137_v45 = vpop.f32.mrf.mxu1  ;;  %v2129_v57 = vpop.f32.mrf.mxu0 }
  0xec   : > { %v379_v47 = vpop.f32.mrf.mxu1 }
  0xed   : > { %v591_v49 = vpop.f32.mrf.mxu0 }
  0xee   : > { %v2140_v48 = vpop.f32.mrf.mxu1 }
  0xef   : > { %v2180_v51 = vpop.f32.mrf.mxu0 }
  0xf0   : > { %v382_v50 = vpop.f32.mrf.mxu1 }
  0xf1   : > { %v594_v53 = vpop.f32.mrf.mxu0 }
  0xf2   : > { %v2141_v52 = vpop.f32.mrf.mxu1 }
  0xf3   : > { %v2181_v55 = vpop.f32.mrf.mxu0 }
  0xf4   : > { %v454_v54 = vpop.f32.mrf.mxu1 }
  0xf5   : > { %v455_v58 = vadd.f32 %v454_v54, %v347_v37 }
  0xf6   : > { %v2152_v60 = vpop.f32.mrf.mxu1  ;;  %v599_v61 = vpop.f32.mrf.mxu0 }
  0xf7   : > { %v630_v62 = vadd.f32 %v591_v49, %v455_v58 }
  0xf8   : > { %v457_v0 = vpop.f32.mrf.mxu1  ;;  %v2184_v2 = vpop.f32.mrf.mxu0 }
  0xf9   : > { %v458_v3 = vadd.f32 %v457_v0, %v350_v56 }
  0xfa   : > { %v2153_v4 = vpop.f32.mrf.mxu1  ;;  %v602_v7 = vpop.f32.mrf.mxu0 }
  0xfb   : > { %v631_v8 = vadd.f32 %v594_v53, %v458_v3 }
  0xfc   : > { %v462_v10 = vpop.f32.mrf.mxu1  ;;  %v2185_v11 = vpop.f32.mrf.mxu0 }
  0xfd   : > { %v463_v59 = vadd.f32 %v462_v10, %v355_v43 }
  0xfe   : > { %v2156_v12 = vpop.f32.mrf.mxu1  ;;  %v607_v13 = vpop.f32.mrf.mxu0 }
  0xff   : > { %v632_v16 = vadd.f32 %v599_v61, %v463_v59 }
 0x100   : > { %v465_v17 = vpop.f32.mrf.mxu1  ;;  %v2188_v19 = vpop.f32.mrf.mxu0 }
 0x101   : > { %v466_v20 = vadd.f32 %v465_v17, %v358_v46 }
 0x102   : > { %v2157_v21 = vpop.f32.mrf.mxu1  ;;  %v610_v22 = vpop.f32.mrf.mxu0 }
 0x103   : > { %v633_v23 = vadd.f32 %v602_v7, %v466_v20 }
 0x104   : > { %v470_v63 = vpop.f32.mrf.mxu1  ;;  %v2189_v24 = vpop.f32.mrf.mxu0 }
 0x105   : > { %v471_v25 = vadd.f32 %v470_v63, %v363_v35 }
 0x106   : > { %v2160_v5 = vpop.f32.mrf.mxu1  ;;  %v615_v15 = vpop.f32.mrf.mxu0 }
 0x107   : > { %v634_v26 = vadd.f32 %v607_v13, %v471_v25 }
 0x108   : > { %v473_v9 = vpop.f32.mrf.mxu1  ;;  %v2192_v18 = vpop.f32.mrf.mxu0 }
 0x109   : > { %v474_v27 = vadd.f32 %v473_v9, %v366_v38 }
 0x10a   : > { %v2161_v29 = vpop.f32.mrf.mxu1  ;;  %v618_v30 = vpop.f32.mrf.mxu0 }
 0x10b   : > { %v635_v31 = vadd.f32 %v610_v22, %v474_v27 }
 0x10c   : > { %v478_v32 = vpop.f32.mrf.mxu1  ;;  %v2193_v33 = vpop.f32.mrf.mxu0 }
 0x10d   : > { %v479_v6 = vadd.f32 %v478_v32, %v371_v14 }
 0x10e   : > { %v2164_v28 = vpop.f32.mrf.mxu1  ;;  %v623_v34 = vpop.f32.mrf.mxu0 }
 0x10f   : > { %v636_v36 = vadd.f32 %v615_v15, %v479_v6 }
 0x110   : > { %v481_v37 = vpop.f32.mrf.mxu1  ;;  %v2196_v39 = vpop.f32.mrf.mxu0 }
 0x111   : > { %v482_v40 = vadd.f32 %v481_v37, %v374_v44 }
 0x112   : > { %v2165_v56 = vpop.f32.mrf.mxu1  ;;  %v626_v35 = vpop.f32.mrf.mxu0 }
 0x113   : > { %v637_v41 = vadd.f32 %v618_v30, %v482_v40 }
 0x114   : > { %v486_v42 = vpop.f32.mrf.mxu1  ;;  %v2197_v43 = vpop.f32.mrf.mxu0 }
 0x115   : > { %v487_v1 = vadd.f32 %v486_v42, %v379_v47 }
 0x116   : > { %v2168_v45 = vpop.f32.mrf.mxu1  ;;  %v961_v38 = vpop.f32.mrf.mxu0 }
 0x117   : > { %v638_v46 = vadd.f32 %v623_v34, %v487_v1 }
 0x118   : > { %v489_v57 = vpop.f32.mrf.mxu1  ;;  %v2236_v48 = vpop.f32.mrf.mxu0 }
 0x119   : > { %v490_v49 = vadd.f32 %v489_v57, %v382_v50 }
 0x11a   : > { %v2169_v51 = vpop.f32.mrf.mxu1  ;;  %v964_v14 = vpop.f32.mrf.mxu0 }
 0x11b   : > { %v639_v52 = vadd.f32 %v626_v35, %v490_v49 }
 0x11c   : > { %v772_v53 = vpop.f32.mrf.mxu1  ;;  %v2237_v54 = vpop.f32.mrf.mxu0 }
 0x11d   : > { %v811_v55 = vadd.f32 %v772_v53, %v630_v62 }
 0x11e   : > { %v2208_v58 = vpop.f32.mrf.mxu1  ;;  %v969_v44 = vpop.f32.mrf.mxu0 }
 0x11f   : > { %v2953_v60 = vadd.f32 %v961_v38, %v811_v55 }
 0x120   : > { %v775_v61 = vpop.f32.mrf.mxu1  ;;  %v2240_v0 = vpop.f32.mrf.mxu0 }
 0x121   : > { %v812_v2 = vadd.f32 %v775_v61, %v631_v8 }
 0x122   : > { %v2209_v47 = vpop.f32.mrf.mxu1  ;;  %v972_v3 = vpop.f32.mrf.mxu0 }
 0x123   : > { %v2955_v4 = vadd.f32 %v964_v14, %v812_v2 }
 0x124   : > { %v780_v7 = vpop.f32.mrf.mxu1  ;;  %v2241_v10 = vpop.f32.mrf.mxu0 }
 0x125   : > { %v813_v50 = vadd.f32 %v780_v7, %v632_v16 }
 0x126   : > { %v2212_v11 = vpop.f32.mrf.mxu1  ;;  %v977_v59 = vpop.f32.mrf.mxu0 }
 0x127   : > { %v2957_v12 = vadd.f32 %v969_v44, %v813_v50 }
 0x128   : > { %v783_v13 = vpop.f32.mrf.mxu1  ;;  %v2244_v62 = vpop.f32.mrf.mxu0 }
 0x129   : > { %v814_v17 = vadd.f32 %v783_v13, %v633_v23 }
 0x12a   : > { %v2213_v19 = vpop.f32.mrf.mxu1  ;;  %v980_v20 = vpop.f32.mrf.mxu0 }
 0x12b   : > { %v2959_v21 = vadd.f32 %v972_v3, %v814_v17 }
 0x12c   : > { %v788_v22 = vpop.f32.mrf.mxu1  ;;  %v2245_v8 = vpop.f32.mrf.mxu0 }
 0x12d   : > { %v815_v63 = vadd.f32 %v788_v22, %v634_v26 }
 0x12e   : > { %v2216_v24 = vpop.f32.mrf.mxu1  ;;  %v985_v25 = vpop.f32.mrf.mxu0 }
 0x12f   : > { %v2961_v5 = vadd.f32 %v977_v59, %v815_v63 }
 0x130   : > { %v791_v15 = vpop.f32.mrf.mxu1  ;;  %v2248_v16 = vpop.f32.mrf.mxu0 }
 0x131   : > { %v816_v9 = vadd.f32 %v791_v15, %v635_v31 }
 0x132   : > { %v2217_v18 = vpop.f32.mrf.mxu1  ;;  %v988_v27 = vpop.f32.mrf.mxu0 }
 0x133   : > { %v2963_v29 = vadd.f32 %v980_v20, %v816_v9 }
 0x134   : > { %v796_v30 = vpop.f32.mrf.mxu1  ;;  %v2249_v23 = vpop.f32.mrf.mxu0 }
 0x135   : > { %v817_v32 = vadd.f32 %v796_v30, %v636_v36 }
 0x136   : > { %v2220_v33 = vpop.f32.mrf.mxu1  ;;  %v993_v6 = vpop.f32.mrf.mxu0 }
 0x137   : > { %v2965_v28 = vadd.f32 %v985_v25, %v817_v32 }
 0x138   : > { %v799_v34 = vpop.f32.mrf.mxu1  ;;  %v2252_v26 = vpop.f32.mrf.mxu0 }
 0x139   : > { %v818_v37 = vadd.f32 %v799_v34, %v637_v41 }
 0x13a   : > { %v2221_v39 = vpop.f32.mrf.mxu1  ;;  %v996_v40 = vpop.f32.mrf.mxu0 }
 0x13b   : > { %v2967_v56 = vadd.f32 %v988_v27, %v818_v37 }
 0x13c   : > { %v804_v35 = vpop.f32.mrf.mxu1  ;;  %v2253_v31 = vpop.f32.mrf.mxu0 }
 0x13d   : > { %v819_v42 = vadd.f32 %v804_v35, %v638_v46 }
 0x13e   : > { %v2224_v43 = vpop.f32.mrf.mxu1  ;;  %v1289_v1 = vpop.f32.mrf.mxu0 }
 0x13f   : > { %v2969_v45 = vadd.f32 %v993_v6, %v819_v42 }
 0x140   : > { %v807_v38 = vpop.f32.mrf.mxu1  ;;  %v2292_v36 = vpop.f32.mrf.mxu0 }
 0x141   : > { %v820_v57 = vadd.f32 %v807_v38, %v639_v52 }
 0x142   : > { %v2225_v48 = vpop.f32.mrf.mxu1  ;;  %v1292_v49 = vpop.f32.mrf.mxu0 }
 0x143   : > { %v2971_v51 = vadd.f32 %v996_v40, %v820_v57 }
 0x144   : > { %v1108_v14 = vpop.f32.mrf.mxu1  ;;  %v2293_v41 = vpop.f32.mrf.mxu0 }
 0x145   : > { %v1147_v32 = vadd.f32 %v1108_v14, %v2953_v60  ;;  %v2999_v60 = vld [vmem:[%s3044_s2] ss:$0 sm:$0xff] }
 0x146   : > { %v2264_v53 = vpop.f32.mrf.mxu1  ;;  %v1297_v54 = vpop.f32.mrf.mxu0 }
 0x147   : > { %v1328_v39 = vadd.f32 %v1289_v1, %v1147_v32 }
 0x148   : > { %v1111_v55 = vpop.f32.mrf.mxu1  ;;  %v2296_v58 = vpop.f32.mrf.mxu0 }
 0x149   : > { %v1148_v37 = vadd.f32 %v1111_v55, %v2955_v4 }
 0x14a   : > { %v2265_v44 = vpop.f32.mrf.mxu1  ;;  %v1300_v61 = vpop.f32.mrf.mxu0 }
 0x14b   : > { %v1329_v57 = vadd.f32 %v1292_v49, %v1148_v37 }
 0x14c   : > { %v1116_v46 = vpop.f32.mrf.mxu1  ;;  %v2297_v0 = vpop.f32.mrf.mxu0 }
 0x14d   : > { %v1149_v38 = vadd.f32 %v1116_v46, %v2957_v12 }
 0x14e   : > { %v2268_v2 = vpop.f32.mrf.mxu1  ;;  %v2973_v47 = vpop.f32.mrf.mxu0 }
 0x14f   : > { %v1330_v44 = vadd.f32 %v1297_v54, %v1149_v38 }
 0x150   : > { %v1119_v3 = vpop.f32.mrf.mxu1  ;;  %v2300_v7 = vpop.f32.mrf.mxu0 }
 0x151   : > { %v1150_v4 = vadd.f32 %v1119_v3, %v2959_v21 }
 0x152   : > { %v2269_v52 = vpop.f32.mrf.mxu1  ;;  %v2975_v10 = vpop.f32.mrf.mxu0 }
 0x153   : > { %v1331_v7 = vadd.f32 %v1300_v61, %v1150_v4 }
 0x154   : > { %v1124_v50 = vpop.f32.mrf.mxu1  ;;  %v2301_v11 = vpop.f32.mrf.mxu0 }
 0x155   : > { %v1151_v11 = vadd.f32 %v1124_v50, %v2961_v5 }
 0x156   : > { %v2272_v59 = vpop.f32.mrf.mxu1  ;;  %v2977_v13 = vpop.f32.mrf.mxu0 }
 0x158   : > { %v1127_v62 = vpop.f32.mrf.mxu1  ;;  %v2304_v17 = vpop.f32.mrf.mxu0 }
 0x15a   : > { %v2273_v19 = vpop.f32.mrf.mxu1  ;;  %v2979_v20 = vpop.f32.mrf.mxu0 }
 0x15c   : > { %v2981_v22 = vpop.f32.mrf.mxu1  ;;  %v2305_v8 = vpop.f32.mrf.mxu0 }
 0x15e   : > { %v2276_v63 = vpop.f32.mrf.mxu1  ;;  %v2983_v24 = vpop.f32.mrf.mxu0 }
 0x15f   : > { %v1152_v63 = vadd.f32 %v1127_v62, %v2963_v29  ;;  %v1153_v29 = vadd.f32 %v2981_v22, %v2965_v28 }
 0x160   : > { %v2985_v25 = vpop.f32.mrf.mxu1  ;;  %v2308_v15 = vpop.f32.mrf.mxu0 }
 0x162   : > { %v2277_v16 = vpop.f32.mrf.mxu1  ;;  %v2987_v9 = vpop.f32.mrf.mxu0 }
 0x163   : > { %v1332_v16 = vadd.f32 %v2973_v47, %v1151_v11 }
 0x164   : > { %v2989_v18 = vpop.f32.mrf.mxu1  ;;  %v2309_v27 = vpop.f32.mrf.mxu0 }
 0x166   : > { %v2280_v30 = vpop.f32.mrf.mxu1  ;;  %v1625_v23 = vpop.f32.mrf.mxu0 }
 0x168   : > { %v2992_v33 = vpop.f32.mrf.mxu1  ;;  %v2348_v6 = vpop.f32.mrf.mxu0 }
 0x16a   : > { %v2281_v34 = vpop.f32.mrf.mxu1  ;;  %v1628_v26 = vpop.f32.mrf.mxu0 }
 0x16b   : > { %v1333_v34 = vadd.f32 %v2975_v10, %v1152_v63 }
 0x16c   : > { %v1478_v40 = vpop.f32.mrf.mxu1  ;;  %v2349_v35 = vpop.f32.mrf.mxu0 }
 0x16d   : > { %v1517_v31 = vadd.f32 %v1478_v40, %v1328_v39 }
 0x16e   : > { %v2320_v42 = vpop.f32.mrf.mxu1  ;;  %v1633_v43 = vpop.f32.mrf.mxu0 }
 0x16f   : > { %v1664_v36 = vadd.f32 %v1625_v23, %v1517_v31  ;;  %v1154_v42 = vadd.f32 %v2985_v25, %v2967_v56  ;;  %v1155_v56 = vadd.f32 %v2989_v18, %v2969_v45 }
 0x170   : > { %v1481_v48 = vpop.f32.mrf.mxu1  ;;  %v2352_v14 = vpop.f32.mrf.mxu0 }
 0x171   : > { %v1518_v41 = vadd.f32 %v1481_v48, %v1329_v57  ;;  %v1681_v55 = vadd.f32 %v2999_v60, %v1664_v36  ;;  %v1334_v57 = vadd.f32 %v2977_v13, %v1153_v29  ;;  %v1335_v4 = vadd.f32 %v2979_v20, %v1154_v42 }
 0x172   : > { %v2321_v1 = vpop.f32.mrf.mxu1  ;;  %v1636_v53 = vpop.f32.mrf.mxu0 }
 0x173   : > { %v1665_v58 = vadd.f32 %v1628_v26, %v1518_v41  ;;  %v1691_v59 = vmax.f32 %v1681_v55, 0.0 }
 0x174   : > { %v1486_v12 = vpop.f32.mrf.mxu1  ;;  %v2353_v46 = vpop.f32.mrf.mxu0 }
 0x175   : > { %v1682_v49 = vadd.f32 %v2999_v60, %v1665_v58  ;;  %v1519_v0 = vadd.f32 %v1486_v12, %v1330_v44 }
 0x176   : > { %v2324_v2 = vpop.f32.mrf.mxu1  ;;  %v1641_v52 = vpop.f32.mrf.mxu0 }
 0x177   : > { %v1692_v17 = vmax.f32 %v1682_v49, 0.0  ;;  %v1666_v21 = vadd.f32 %v1633_v43, %v1519_v0  ;;  %v1156_v0 = vadd.f32 %v2992_v33, %v2971_v51 }
 0x178   : > { %v1489_v54 = vpop.f32.mrf.mxu1  ;;  %v2356_v3 = vpop.f32.mrf.mxu0 }
 0x179   : > { %v2007_v19 = vpack.c.bf16 %v1692_v17, %v1691_v59  ;;  %v1520_v8 = vadd.f32 %v1489_v54, %v1331_v7  ;;  %v1683_v5 = vadd.f32 %v2999_v60, %v1666_v21  ;;  %v1336_v7 = vadd.f32 %v2983_v24, %v1155_v56 }
 0x17a   : > { %v2325_v15 = vpop.f32.mrf.mxu1  ;;  %v1644_v61 = vpop.f32.mrf.mxu0  ;;  %v1337_v3 = vadd.f32 %v2987_v9, %v1156_v0 }
 0x17b   : > { %2008 = vst [vmem:[%s3009_s21] sm:$0xff] %v2007_v19   ;;  %v1667_v50 = vadd.f32 %v1636_v53, %v1520_v8  ;;  %v1693_v62 = vmax.f32 %v1683_v5, 0.0 }
 0x17c   : > { %v1494_v27 = vpop.f32.mrf.mxu1  ;;  %v2357_v30 = vpop.f32.mrf.mxu0 }
 0x17d   : > { %v1684_v23 = vadd.f32 %v2999_v60, %v1667_v50  ;;  %v1521_v32 = vadd.f32 %v1494_v27, %v1332_v16 }
 0x17e   : > { %v2328_v6 = vpop.f32.mrf.mxu1  ;;  %v1649_v26 = vpop.f32.mrf.mxu0 }
 0x17f   : > { %v1694_v37 = vmax.f32 %v1684_v23, 0.0  ;;  %v1668_v39 = vadd.f32 %v1641_v52, %v1521_v32 }
 0x180   : > { %v1497_v40 = vpop.f32.mrf.mxu1  ;;  %v2360_v35 = vpop.f32.mrf.mxu0 }
 0x181   : > { %v2012_v31 = vpack.c.bf16 %v1694_v37, %v1693_v62  ;;  %v1522_v47 = vadd.f32 %v1497_v40, %v1333_v34  ;;  %v1685_v36 = vadd.f32 %v2999_v60, %v1668_v39 }
 0x182   : > { %v2329_v43 = vpop.f32.mrf.mxu1  ;;  %v1652_v38 = vpop.f32.mrf.mxu0 }
 0x183   : > { %2029 = vst [vmem:[%s3009_s21 + $0x8] sm:$0xff] %v2012_v31   ;;  %v1669_v10 = vadd.f32 %v1644_v61, %v1522_v47  ;;  %v1695_v25 = vmax.f32 %v1685_v36, 0.0 }
 0x184   : > { %v1502_v48 = vpop.f32.mrf.mxu1  ;;  %v2361_v28 = vpop.f32.mrf.mxu0 }
 0x185   : > { %v1686_v22 = vadd.f32 %v2999_v60, %v1669_v10  ;;  %v1523_v14 = vadd.f32 %v1502_v48, %v1334_v57 }
 0x186   : > { %v2332_v41 = vpop.f32.mrf.mxu1  ;;  %v1657_v1 = vpop.f32.mrf.mxu0 }
 0x187   : > { %v1696_v53 = vmax.f32 %v1686_v22, 0.0  ;;  %v1670_v55 = vadd.f32 %v1649_v26, %v1523_v14 }
 0x188   : > { %v1505_v58 = vpop.f32.mrf.mxu1  ;;  %v2364_v44 = vpop.f32.mrf.mxu0 }
 0x189   : > { %v2017_v12 = vpack.c.bf16 %v1696_v53, %v1695_v25  ;;  %v1524_v13 = vadd.f32 %v1505_v58, %v1335_v4  ;;  %v1687_v2 = vadd.f32 %v2999_v60, %v1670_v55 }
 0x18a   : > { %v2333_v46 = vpop.f32.mrf.mxu1  ;;  %v1660_v49 = vpop.f32.mrf.mxu0 }
 0x18b   : > { %2030 = vst [vmem:[%s3009_s21 + $0x10] sm:$0xff] %v2017_v12   ;;  %v1671_v20 = vadd.f32 %v1652_v38, %v1524_v13  ;;  %v1697_v17 = vmax.f32 %v1687_v2, 0.0 }
 0x18c   : > { %v1510_v45 = vpop.f32.mrf.mxu1  ;;  %v2365_v18 = vpop.f32.mrf.mxu0 }
 0x18d   : > { %v1688_v52 = vadd.f32 %v2999_v60, %v1671_v20  ;;  %v1525_v11 = vadd.f32 %v1510_v45, %v1336_v7 }
 0x18e   : > { %v2336_v59 = vpop.f32.mrf.mxu1 }
 0x18f   : > { %v1698_v21 = vmax.f32 %v1688_v52, 0.0  ;;  %v1672_v54 = vadd.f32 %v1657_v1, %v1525_v11 }
 0x190   : > { %v1513_v51 = vpop.f32.mrf.mxu1 }
 0x191   : > { %v2022_v33 = vpack.c.bf16 %v1698_v21, %v1697_v17  ;;  %v1526_v19 = vadd.f32 %v1513_v51, %v1337_v3  ;;  %v1689_v63 = vadd.f32 %v2999_v60, %v1672_v54 }
 0x192   : > { %v2337_v8 = vpop.f32.mrf.mxu1 }
 0x193   : > { %2031 = vst [vmem:[%s3009_s21 + $0x18] sm:$0xff] %v2022_v33   ;;  %v1673_v24 = vadd.f32 %v1660_v49, %v1526_v19  ;;  %v1699_v61 = vmax.f32 %v1689_v63, 0.0 }
 0x195   : > { %v1690_v15 = vadd.f32 %v2999_v60, %v1673_v24 }
 0x197   : > { %v1700_v5 = vmax.f32 %v1690_v15, 0.0 }
 0x199   : > { %v2027_v50 = vpack.c.bf16 %v1700_v5, %v1699_v61 }
 0x19b   : > { %2032 = vst [vmem:[%s3009_s21 + $0x20] sm:$0xff] %v2027_v50  }
 0x19c PF: > { %s13_s12 = sadd.s32 1, %s2451_s12  }
 0x19d   : > { %p10_p4 = scmp.ge.s32.totalorder %s13_s12, 4  }
 0x19f   :  { %12 = sbr.rel (!%p10_p4) target bundleno = 1 (0x1), region = 70 }

// kernel: down_forward.5
= control target key start
LH: loop header
LB: loop body
LE: loop exit
PB: predicated region body
PF: predicated region fallthrough
CT: control target
= control target key end

     0   :  { %s2795_s12 = smov 0   ;;  %s3452_s0 = inlined_call_operand.vmem [shape: bf16[2,110,128], index: 0, kind: input, shape index: {}]   ;;  %s3453_s1 = inlined_call_operand.vmem [shape: bf16[9,128,128], index: 1, kind: input, shape index: {}]   ;;  %s3454_s2 = inlined_call_operand.vmem [shape: f32[1,128], index: 2, kind: input, shape index: {}]   ;;  %s3455_s3 = inlined_call_operand.vmem [shape: f32[2,80,128], index: 3, kind: output, shape index: {}]  }
   0x1 LB: > { %s1968_s13 = sadd.s32 4294967295, %s2771_s12   ;;  %p1972_p0 = scmp.ge.s32.totalorder %s2771_s12, 1  ;;  %s2771_s12 = sphi %s2795_s12, %s13_s12  }
   0x2   : > { %p137_p1 = scmp.lt.s32.totalorder %s2771_s12, 3 }
   0x4   : > { %p138_p2 = pnand %p1972_p0, %p137_p1 }
   0x5   : > { %p161_p3 = scmp.lt.s32.totalorder (!%p138_p2), %s1968_s13, 1 }
   0x6   : > { %141 = sbr.rel (%p138_p2) target bundleno = 424 (0x1a8), region = 32 }
   0xb   : > { %v2670_v0 = vld [vmem:[%s3453_s1 + $0x78] sm:$0xff]   ;;  %v2773_v1 = vmov 0.0   ;;  %v2672_v3 = vld [vmem:[%s3453_s1 + $0x70] sm:$0xff]   ;;  %vm2774_vm0 = vmmov 0   ;;  %s3457_s13 = smov (!%p161_p3, %s1968_s13), 1  ;;  %v2674_v5 = vld [vmem:[%s3453_s1 + $0x68] sm:$0xff]  }
   0xc   : > { %2318 = vmatprep.subr.bf16.mxu0 %v2773_v1  ;;  %2354 = vmatprep.subr.bf16.mxu1 %v2773_v1  ;;  %v2671_v2 = vld [vmem:[%s3453_s1 + $0x38] sm:$0xff]   ;;  %v2673_v4 = vld [vmem:[%s3453_s1 + $0x30] sm:$0xff]   ;;  %v2675_v6 = vld [vmem:[%s3453_s1 + $0x28] sm:$0xff]   ;;  %s2658_s26 = smul.u32 56, %s3457_s13  ;;  %vm244_vm1 = vsmask.f32 7424 }
   0xd   : > { %2319 = vmatpush3.bf16.msra.mxu0 %v2670_v0  ;;  %2334 = vmatprep.mubr.msk.bf16.mxu0 %vm2774_vm0, %v2773_v1  ;;  %v2676_v7 = vld [vmem:[%s3453_s1 + $0x60] sm:$0xff]   ;;  %v2678_v9 = vld [vmem:[%s3453_s1 + $0x58] sm:$0xff]   ;;  %v2680_v13 = vld [vmem:[%s3453_s1 + $0x50] sm:$0xff]   ;;  %vm562_vm2 = vcmask 1046528   ;;  %vm934_vm3 = vsmask.f32 6400 }
   0xe   : > { %2355 = vmatpush3.bf16.msra.mxu1 %v2671_v2  ;;  %2320 = vmatprep.subr.bf16.mxu0 %v2773_v1  ;;  %v2677_v8 = vld [vmem:[%s3453_s1 + $0x20] sm:$0xff]   ;;  %s2845_s6 = scalar_lea.vmem %s3452_s0, %s2658_s26  ;;  %v2679_v10 = vld [vmem:[%s3453_s1 + $0x18] sm:$0xff]   ;;  %v2681_v16 = vld [vmem:[%s3453_s1 + $0x10] sm:$0xff]   ;;  %vm1145_vm4 = vcmask 1045504   ;;  %vm1517_vm5 = vsmask.f32 5376 }
   0xf   : > { %2356 = vmatprep.subr.bf16.mxu1 %v2773_v1  ;;  %2370 = vmatprep.mubr.msk.bf16.mxu1 %vm2774_vm0, %v2773_v1  ;;  %v172_v11 = vld [vmem:[%s2845_s6] sm:$0xf]  ;;  %v2857_v12 = vld [vmem:[%s2845_s6 + $0x4] sm:$0xf]  ;;  %v2864_v15 = vld [vmem:[%s2845_s6 + $0x8] sm:$0xff]   ;;  %vm1728_vm6 = vcmask 1044480  }
  0x10   : > { %v1991_v14 = vcombine.low %v172_v11, %v2857_v12  ;;  %v2682_v18 = vld [vmem:[%s3453_s1 + $0x48] sm:$0xff]   ;;  %v253_v21 = vshll.u32 %v2864_v15, 16  ;;  %v2684_v23 = vld [vmem:[%s3453_s1 + $0x40] sm:$0xff]   ;;  %v2887_v27 = vld [vmem:[%s2845_s6 + $0x10] sm:$0xff]   ;;  %v257_v30 = vshrl.u32 %v2864_v15, 16 }
  0x11   : > { %2321 = vmatpush3.bf16.msra.mxu0 %v2672_v3  ;;  %v2683_v22 = vld [vmem:[%s3453_s1 + $0x8] sm:$0xff]   ;;  %v2685_v24 = vld [vmem:[%s3453_s1] sm:$0xff]   ;;  %v2688_v28 = vld [vmem:[%s3453_s1 + $0xb8] sm:$0xff]   ;;  %v261_v31 = vshll.u32 %v2887_v27, 16  ;;  %v265_v41 = vshrl.u32 %v2887_v27, 16 }
  0x12   : > { %2357 = vmatpush3.bf16.msra.mxu1 %v2673_v4  ;;  %2322 = vmatprep.subr.bf16.mxu0 %v2773_v1  ;;  %v248_v17 = vshll.u32 %v1991_v14, 16  ;;  %v246_v19 = vshrl.u32 %v1991_v14, 16  ;;  %v255_v26 = vrot.slane %v253_v21, 1  ;;  %v2691_v32 = vld [vmem:[%s3453_s1 + $0xf8] sm:$0xff]   ;;  %v2689_v34 = vld [vmem:[%s3453_s1 + $0xb0] sm:$0xff]   ;;  %v2692_v40 = vld [vmem:[%s3453_s1 + $0xa8] sm:$0xff]  }
  0x13   : > { %2358 = vmatprep.subr.bf16.mxu1 %v2773_v1  ;;  %v2903_v33 = vld [vmem:[%s2845_s6 + $0x18] sm:$0xff]   ;;  %v263_v36 = vrot.slane %v261_v31, 1  ;;  %v2693_v37 = vld [vmem:[%s3453_s1 + $0xf0] sm:$0xff]   ;;  %v2696_v42 = vld [vmem:[%s3453_s1 + $0xe8] sm:$0xff]   ;;  %v566_v21 = vrot.slane %v2887_v27, 1 }
  0x14   : > { %v250_v20 = vrot.slane %v248_v17, 1  ;;  %v259_v35 = vor.u32 %v257_v30, %v255_v26  ;;  %v269_v38 = vshll.u32 %v2903_v33, 16  ;;  %v2695_v44 = vld [vmem:[%s3453_s1 + $0xa0] sm:$0xff]   ;;  %v2697_v48 = vld [vmem:[%s3453_s1 + $0x98] sm:$0xff]   ;;  %v273_v50 = vshrl.u32 %v2903_v33, 16  ;;  %v2701_v56 = vld [vmem:[%s3453_s1 + $0x90] sm:$0xff]  }
  0x15   : > { %2323 = vmatpush3.bf16.msra.mxu0 %v2674_v5  ;;  %v2932_v45 = vld [vmem:[%s2845_s6 + $0x20] sm:$0xff]   ;;  %v267_v46 = vor.u32 %v265_v41, %v263_v36  ;;  %v2700_v52 = vld [vmem:[%s3453_s1 + $0xd8] sm:$0xff]   ;;  %v2955_v53 = vld [vmem:[%s2845_s6 + $0x28] ss:$0 sps:$4 sm:$0x11]  }
  0x16   : > { %2359 = vmatpush3.bf16.msra.mxu1 %v2675_v6  ;;  %2324 = vmatprep.subr.bf16.mxu0 %v2773_v1  ;;  %v251_v25 = vor.u32 %v250_v20, %v246_v19  ;;  %v264_v39 = vsel %vm244_vm1, %v259_v35, %v263_v36  ;;  %v271_v43 = vrot.slane %v269_v38, 1  ;;  %v2698_v47 = vld [vmem:[%s3453_s1 + $0xe0] sm:$0xff]   ;;  %v277_v51 = vshll.u32 %v2932_v45, 16  ;;  %v2702_v57 = vld [vmem:[%s3453_s1 + $0xd0] sm:$0xff]   ;;  %v2703_v61 = vld [vmem:[%s3453_s1 + $0x88] sm:$0xff]  }
  0x17   : > { %2360 = vmatprep.subr.bf16.mxu1 %v2773_v1  ;;  %v281_v59 = vshrl.u32 %v2932_v45, 16  ;;  %v285_v60 = vshll.u32 %v2955_v53, 16  ;;  %v2705_v62 = vld [vmem:[%s3453_s1 + $0xc8] sm:$0xff]   ;;  %v2706_v63 = vld [vmem:[%s3453_s1 + $0x80] sm:$0xff]   ;;  %v2711_v17 = vld [vmem:[%s3453_s1 + $0x138] sm:$0xff]   ;;  %v570_v38 = vrot.slane %v2932_v45, 1 }
  0x18   : > { %v256_v29 = vsel %vm244_vm1, %v251_v25, %v255_v26  ;;  %v272_v49 = vsel %vm244_vm1, %v267_v46, %v271_v43  ;;  %v275_v54 = vor.u32 %v273_v50, %v271_v43  ;;  %v279_v55 = vrot.slane %v277_v51, 1  ;;  %v2707_v3 = vld [vmem:[%s3453_s1 + $0xc0] sm:$0xff]   ;;  %v2997_v6 = vld [vmem:[%s2845_s6 + $0x8] sm:$0xf]  ;;  %v3024_v19 = vld [vmem:[%s2845_s6 + $0x14] sm:$0xff]  }
  0x19   : > { %2325 = vmatpush3.bf16.msra.mxu0 %v2676_v7  ;;  %v287_v2 = vrot.slane %v285_v60, 1  ;;  %v541_v4 = vld [vmem:[%s2845_s6] sm:$0xe]  ;;  %v710_v5 = vld [vmem:[%s2845_s6 + $0x4] sm:$0xe]  ;;  %v2712_v20 = vld [vmem:[%s3453_s1 + $0x130] sm:$0xff]  }
  0x1a   : > { %2361 = vmatpush3.bf16.msra.mxu1 %v2677_v8  ;;  %2326 = vmatprep.subr.bf16.mxu0 %v2773_v1  ;;  %v280_v58 = vsel %vm244_vm1, %v275_v54, %v279_v55  ;;  %v283_v0 = vor.u32 %v281_v59, %v279_v55  ;;  %v2029_v8 = vcombine.low %v541_v4, %v2857_v12  ;;  %v564_v12 = vrot.slane %v2864_v15, 1  ;;  %v2715_v25 = vld [vmem:[%s3453_s1 + $0x128] sm:$0xff]   ;;  %v2718_v30 = vld [vmem:[%s3453_s1 + $0x120] sm:$0xff]   ;;  %v2725_v41 = vld [vmem:[%s3453_s1 + $0x150] sm:$0xff]  }
  0x1b   : > { %2362 = vmatprep.subr.bf16.mxu1 %v2773_v1  ;;  %v3077_v36 = vld [vmem:[%s2845_s6 + $0x24] sm:$0xff]   ;;  %v2727_v43 = vld [vmem:[%s2845_s6 + $0x2c] ss:$0 sps:$4 sm:$0x11]  }
  0x1c   : > { %v288_v7 = vsel %vm244_vm1, %v283_v0, %v287_v2  ;;  %v563_v11 = vrot.slane %v2029_v8, 1  ;;  %v2728_v46 = vld [vmem:[%s3453_s1 + $0x148] sm:$0xff]   ;;  %v2730_v54 = vld [vmem:[%s3453_s1 + $0x140] sm:$0xff]   ;;  %v953_v2 = vshrl.u32 %v3024_v19, 16 }
  0x1d   : > { %2327 = vmatpush3.bf16.msra.mxu0 %v2678_v9  ;;  %v3003_v9 = vcombine.low %v710_v5, %v2997_v6  ;;  %v1124_v55 = vld [vmem:[%s2845_s6 + $0x4] sm:$0xc] }
  0x1e   : > { %2363 = vmatpush3.bf16.msra.mxu1 %v2679_v10  ;;  %2328 = vmatprep.subr.bf16.mxu0 %v2773_v1  ;;  %v3006_v10 = vld [vmem:[%s2845_s6 + $0xc] sm:$0xff]   ;;  %v955_v8 = vrot.slane %v953_v2, 1 }
  0x1f   : > { %2364 = vmatprep.subr.bf16.mxu1 %v2773_v1  ;;  %v944_v50 = vshrl.u32 %v3006_v10, 16  ;;  %v947_v51 = vshll.u32 %v3006_v10, 16  ;;  %v1147_v5 = vrot.slane %v3006_v10, 2 }
  0x21   : > { %2329 = vmatpush3.bf16.msra.mxu0 %v2680_v13  ;;  %v766_v13 = vrot.slane %v3003_v9, 1  ;;  %v946_v59 = vrot.slane %v944_v50, 1  ;;  %v949_v60 = vrot.slane %v947_v51, 2  ;;  %v3222_v51 = vld [vmem:[%s2845_s6 + $0x10] sm:$0xff]  }
  0x22   : > { %2365 = vmatpush3.bf16.msra.mxu1 %v2681_v16  ;;  %2330 = vmatprep.subr.bf16.mxu0 %v2773_v1  ;;  %v565_v16 = vsel %vm562_vm2, %v563_v11, %v564_v12 }
  0x23   : > { %2366 = vmatprep.subr.bf16.mxu1 %v2773_v1  ;;  %v950_v0 = vor.u32 %v949_v60, %v946_v59  ;;  %v1530_v59 = vshll.u32 %v3222_v51, 16  ;;  %v2748_v60 = vld [vmem:[%s3453_s1 + $0x1c0] sm:$0xff]  }
  0x25   : > { %2331 = vmatpush3.bf16.msra.mxu0 %v2682_v18 }
  0x26   : > { %2367 = vmatpush3.bf16.msra.mxu1 %v2683_v22  ;;  %2332 = vmatprep.subr.bf16.mxu0 %v2773_v1  ;;  %v769_v22 = vrot.slane %v3024_v19, 1 }
  0x27   : > { %2368 = vmatprep.subr.bf16.mxu1 %v2773_v1 }
  0x29   : > { %2333 = vmatpush3.bf16.msra.mxu0 %v2684_v23  ;;  %v2716_v23 = vld [vmem:[%s3453_s1 + $0x170] sm:$0xff]  }
  0x2a   : > { %2369 = vmatpush3.bf16.msra.mxu1 %v2685_v24  ;;  %2390 = vmatprep.subr.bf16.mxu0 %v2773_v1  ;;  %v567_v24 = vsel %vm562_vm2, %v564_v12, %v566_v21  ;;  %v2734_v12 = vld [vmem:[%s3453_s1 + $0x1f8] sm:$0xff]  }
  0x2b   : > { %2426 = vmatprep.subr.bf16.mxu1 %v2773_v1 }
  0x2c   : > { %2335 = vmatmul.mubr.bf16.vlgmr.msra.gmra.mxu0 %v256_v29  ;;  %v568_v29 = vrot.slane %v2903_v33, 1 }
  0x2d   : > { %2371 = vmatmul.mubr.bf16.vlgmr.msra.gmra.mxu1 %v1991_v14  ;;  %2391 = vmatpush3.bf16.msra.mxu0 %v2688_v28  ;;  %v767_v14 = vrot.slane %v3006_v10, 1  ;;  %v2719_v28 = vld [vmem:[%s3453_s1 + $0x168] sm:$0xff]   ;;  %v2733_v10 = vld [vmem:[%s3453_s1 + $0x1b0] sm:$0xff]  }
  0x2e   : > { %2392 = vmatprep.subr.bf16.mxu0 %v2773_v1  ;;  %2338 = vmatprep.mubr.msk.bf16.mxu0 %vm2774_vm0, %v2773_v1 }
  0x2f   : > { %2374 = vmatprep.mubr.msk.bf16.mxu1 %vm2774_vm0, %v2773_v1  ;;  %2427 = vmatpush3.bf16.msra.mxu1 %v2691_v32  ;;  %v768_v18 = vsel %vm562_vm2, %v766_v13, %v767_v14  ;;  %v770_v26 = vsel %vm562_vm2, %v767_v14, %v769_v22  ;;  %v2721_v32 = vld [vmem:[%s3453_s1 + $0x160] sm:$0xff]  }
  0x30   : > { %2428 = vmatprep.subr.bf16.mxu1 %v2773_v1 }
  0x31   : > { %2393 = vmatpush3.bf16.msra.mxu0 %v2689_v34  ;;  %v2720_v34 = vld [vmem:[%s3453_s1 + $0x118] sm:$0xff]  }
  0x32   : > { %2394 = vmatprep.subr.bf16.mxu0 %v2773_v1 }
  0x33   : > { %2429 = vmatpush3.bf16.msra.mxu1 %v2693_v37  ;;  %v2723_v37 = vld [vmem:[%s3453_s1 + $0x158] sm:$0xff]  }
  0x34   : > { %2339 = vmatmul.mubr.bf16.gmra.mxu0 %v264_v39  ;;  %2430 = vmatprep.subr.bf16.mxu1 %v2773_v1  ;;  %v2724_v39 = vld [vmem:[%s3453_s1 + $0x110] sm:$0xff]  }
  0x35   : > { %2375 = vmatmul.mubr.bf16.gmra.mxu1 %v2864_v15  ;;  %2395 = vmatpush3.bf16.msra.mxu0 %v2692_v40  ;;  %v2714_v15 = vld [vmem:[%s3453_s1 + $0x178] sm:$0xff]   ;;  %v773_v40 = vrot.slane %v3077_v36, 1 }
  0x36   : > { %2342 = vmatprep.mubr.msk.bf16.mxu0 %vm2774_vm0, %v2773_v1  ;;  %2378 = vmatprep.mubr.msk.bf16.mxu1 %vm2774_vm0, %v2773_v1 }
  0x37   : > { %2396 = vmatprep.subr.bf16.mxu0 %v2773_v1  ;;  %2431 = vmatpush3.bf16.msra.mxu1 %v2696_v42  ;;  %v571_v42 = vsel %vm562_vm2, %v568_v29, %v570_v38 }
  0x38   : > { %2432 = vmatprep.subr.bf16.mxu1 %v2773_v1 }
  0x39   : > { %2397 = vmatpush3.bf16.msra.mxu0 %v2695_v44 }
  0x3a   : > { %2398 = vmatprep.subr.bf16.mxu0 %v2773_v1 }
  0x3b   : > { %2433 = vmatpush3.bf16.msra.mxu1 %v2698_v47  ;;  %v572_v47 = vrot.slane %v2955_v53, 1  ;;  %v2729_v53 = vld [vmem:[%s3453_s1 + $0x100] sm:$0xff]  }
  0x3c   : > { %2343 = vmatmul.mubr.bf16.gmra.mxu0 %v272_v49  ;;  %2434 = vmatprep.subr.bf16.mxu1 %v2773_v1  ;;  %v939_v49 = vshll.u32 %v3003_v9, 16 }
  0x3d   : > { %2379 = vmatmul.mubr.bf16.gmra.mxu1 %v2887_v27  ;;  %2399 = vmatpush3.bf16.msra.mxu0 %v2697_v48  ;;  %v3050_v27 = vld [vmem:[%s2845_s6 + $0x1c] sm:$0xff]   ;;  %v936_v48 = vshrl.u32 %v3003_v9, 16 }
  0x3e   : > { %2346 = vmatprep.mubr.msk.bf16.mxu0 %vm2774_vm0, %v2773_v1  ;;  %2382 = vmatprep.mubr.msk.bf16.mxu1 %vm2774_vm0, %v2773_v1  ;;  %v771_v31 = vrot.slane %v3050_v27, 1  ;;  %v962_v14 = vshrl.u32 %v3050_v27, 16 }
  0x3f   : > { %2400 = vmatprep.subr.bf16.mxu0 %v2773_v1  ;;  %2435 = vmatpush3.bf16.msra.mxu1 %v2700_v52  ;;  %v775_v52 = vrot.slane %v2727_v43, 1  ;;  %v2743_v43 = vld [vmem:[%s3453_s1 + $0x1d0] sm:$0xff]  }
  0x40   : > { %2436 = vmatprep.subr.bf16.mxu1 %v2773_v1  ;;  %v772_v35 = vsel %vm562_vm2, %v769_v22, %v771_v31  ;;  %v774_v44 = vsel %vm562_vm2, %v771_v31, %v773_v40 }
  0x41   : > { %2401 = vmatpush3.bf16.msra.mxu0 %v2701_v56  ;;  %v573_v56 = vsel %vm562_vm2, %v570_v38, %v572_v47 }
  0x42   : > { %2402 = vmatprep.subr.bf16.mxu0 %v2773_v1 }
  0x43   : > { %2437 = vmatpush3.bf16.msra.mxu1 %v2702_v57  ;;  %v938_v57 = vrot.slane %v936_v48, 1 }
  0x44   : > { %2347 = vmatmul.mubr.bf16.gmra.mxu0 %v280_v58  ;;  %2438 = vmatprep.subr.bf16.mxu1 %v2773_v1  ;;  %v941_v58 = vrot.slane %v939_v49, 2 }
  0x45   : > { %2383 = vmatmul.mubr.bf16.gmra.mxu1 %v2903_v33  ;;  %2350 = vmatprep.mubr.msk.bf16.mxu0 %vm2774_vm0, %v2773_v1  ;;  %v569_v33 = vsel %vm562_vm2, %v566_v21, %v568_v29  ;;  %v964_v21 = vrot.slane %v962_v14, 1  ;;  %v1151_v29 = vrot.slane %v3050_v27, 2 }
  0x46   : > { %2386 = vmatprep.mubr.msk.bf16.mxu1 %vm2774_vm0, %v2773_v1  ;;  %2403 = vmatpush3.bf16.msra.mxu0 %v2703_v61  ;;  %v776_v61 = vsel %vm562_vm2, %v773_v40, %v775_v52  ;;  %v2746_v52 = vld [vmem:[%s3453_s1 + $0x1c8] sm:$0xff]  }
  0x47   : > { %2439 = vmatpush3.bf16.msra.mxu1 %v2705_v62  ;;  %2404 = vmatprep.subr.bf16.mxu0 %v2773_v1  ;;  %v2109_v62 = vcombine.low %v1124_v55, %v2997_v6  ;;  %v2747_v55 = vld [vmem:[%s3453_s1 + $0x180] sm:$0xff]  }
  0x48   : > { %2440 = vmatprep.subr.bf16.mxu1 %v2773_v1 }
  0x49   : > { %v1146_v4 = vrot.slane %v2109_v62, 2 }
  0x4a   : > { %2405 = vmatpush3.bf16.msra.mxu0 %v2706_v63  ;;  %v942_v63 = vor.u32 %v941_v58, %v938_v57  ;;  %v1527_v58 = vshrl.u32 %v3222_v51, 16 }
  0x4b   : > { %2441 = vmatpush3.bf16.msra.mxu1 %v2707_v3  ;;  %2462 = vmatprep.subr.bf16.mxu0 %v2773_v1  ;;  %v956_v3 = vshll.u32 %v3024_v19, 16  ;;  %v1148_v11 = vsel %vm1145_vm4, %v1146_v4, %v1147_v5  ;;  %v3245_v4 = vld [vmem:[%s2845_s6 + $0x18] sm:$0xff]  }
  0x4c   : > { %2351 = vmatmul.mubr.bf16.gmra.mxu0 %v288_v7  ;;  %2498 = vmatprep.subr.bf16.mxu1 %v2773_v1  ;;  %v951_v6 = vsel %vm934_vm3, %v942_v63, %v950_v0  ;;  %v2732_v7 = vld [vmem:[%s3453_s1 + $0x1b8] sm:$0xff]   ;;  %v1529_v2 = vrot.slane %v1527_v58, 2 }
  0x4d   : > { %2387 = vmatmul.mubr.bf16.gmra.mxu1 %v2932_v45  ;;  %2406 = vmatprep.mubr.msk.bf16.mxu0 %vm2774_vm0, %v2773_v1  ;;  %v2726_v45 = vld [vmem:[%s3453_s1 + $0x108] sm:$0xff]   ;;  %v958_v9 = vrot.slane %v956_v3, 2  ;;  %v1532_v3 = vrot.slane %v1530_v59, 3 }
  0x4e   : > { %2442 = vmatprep.mubr.msk.bf16.mxu1 %vm2774_vm0, %v2773_v1 }
  0x4f   : > { %v959_v13 = vor.u32 %v958_v9, %v955_v8  ;;  %v1533_v8 = vor.u32 %v1532_v3, %v1529_v2  ;;  %v1536_v9 = vshrl.u32 %v3245_v4, 16 }
  0x51   : > { %v1538_v14 = vrot.slane %v1536_v9, 2 }
  0x54   : > { %2407 = vmatmul.mubr.bf16.vlgmr.msra.gmra.mxu0 %v565_v16  ;;  %v965_v16 = vshll.u32 %v3050_v27, 16 }
  0x55   : > { %2443 = vmatmul.mubr.bf16.vlgmr.msra.gmra.mxu1 %v768_v18  ;;  %2463 = vmatpush3.bf16.msra.mxu0 %v2711_v17  ;;  %v1149_v17 = vrot.slane %v3024_v19, 2  ;;  %v2736_v18 = vld [vmem:[%s3453_s1 + $0x1f0] sm:$0xff]  }
  0x56   : > { %2464 = vmatprep.subr.bf16.mxu0 %v2773_v1  ;;  %2410 = vmatprep.mubr.msk.bf16.mxu0 %vm2774_vm0, %v2773_v1  ;;  %v967_v22 = vrot.slane %v965_v16, 2 }
  0x57   : > { %2446 = vmatprep.mubr.msk.bf16.mxu1 %vm2774_vm0, %v2773_v1  ;;  %2499 = vmatpush3.bf16.msra.mxu1 %v2714_v15  ;;  %v960_v15 = vsel %vm934_vm3, %v950_v0, %v959_v13  ;;  %v1150_v19 = vsel %vm1145_vm4, %v1147_v5, %v1149_v17  ;;  %v1152_v27 = vsel %vm1145_vm4, %v1149_v17, %v1151_v29  ;;  %v3262_v17 = vld [vmem:[%s2845_s6 + $0x20] sm:$0xff]  }
  0x58   : > { %2500 = vmatprep.subr.bf16.mxu1 %v2773_v1 }
  0x59   : > { %2465 = vmatpush3.bf16.msra.mxu0 %v2712_v20  ;;  %v2735_v20 = vld [vmem:[%s3453_s1 + $0x1a8] sm:$0xff]  }
  0x5a   : > { %2466 = vmatprep.subr.bf16.mxu0 %v2773_v1 }
  0x5b   : > { %2501 = vmatpush3.bf16.msra.mxu1 %v2716_v23  ;;  %v2738_v23 = vld [vmem:[%s3453_s1 + $0x1e8] sm:$0xff]  }
  0x5c   : > { %2411 = vmatmul.mubr.bf16.gmra.mxu0 %v567_v24  ;;  %2502 = vmatprep.subr.bf16.mxu1 %v2773_v1  ;;  %v968_v24 = vor.u32 %v967_v22, %v964_v21  ;;  %v1545_v21 = vshrl.u32 %v3262_v17, 16  ;;  %v1548_v22 = vshll.u32 %v3262_v17, 16 }
  0x5d   : > { %2447 = vmatmul.mubr.bf16.gmra.mxu1 %v770_v26  ;;  %2467 = vmatpush3.bf16.msra.mxu0 %v2715_v25  ;;  %v2737_v25 = vld [vmem:[%s3453_s1 + $0x1a0] sm:$0xff]   ;;  %v971_v26 = vshrl.u32 %v3077_v36, 16 }
  0x5e   : > { %2414 = vmatprep.mubr.msk.bf16.mxu0 %vm2774_vm0, %v2773_v1  ;;  %2450 = vmatprep.mubr.msk.bf16.mxu1 %vm2774_vm0, %v2773_v1  ;;  %v969_v31 = vsel %vm934_vm3, %v959_v13, %v968_v24 }
  0x5f   : > { %2468 = vmatprep.subr.bf16.mxu0 %v2773_v1  ;;  %2503 = vmatpush3.bf16.msra.mxu1 %v2719_v28  ;;  %v974_v28 = vshll.u32 %v3077_v36, 16 }
  0x60   : > { %2504 = vmatprep.subr.bf16.mxu1 %v2773_v1 }
  0x61   : > { %2469 = vmatpush3.bf16.msra.mxu0 %v2718_v30  ;;  %v2740_v30 = vld [vmem:[%s3453_s1 + $0x1e0] sm:$0xff]  }
  0x62   : > { %2470 = vmatprep.subr.bf16.mxu0 %v2773_v1 }
  0x63   : > { %2505 = vmatpush3.bf16.msra.mxu1 %v2721_v32  ;;  %v2739_v32 = vld [vmem:[%s3453_s1 + $0x198] sm:$0xff]  }
  0x64   : > { %2415 = vmatmul.mubr.bf16.gmra.mxu0 %v569_v33  ;;  %2506 = vmatprep.subr.bf16.mxu1 %v2773_v1  ;;  %v973_v33 = vrot.slane %v971_v26, 1  ;;  %v1550_v26 = vrot.slane %v1548_v22, 3 }
  0x65   : > { %2451 = vmatmul.mubr.bf16.gmra.mxu1 %v772_v35  ;;  %2471 = vmatpush3.bf16.msra.mxu0 %v2720_v34  ;;  %v976_v34 = vrot.slane %v974_v28, 2  ;;  %v2745_v35 = vld [vmem:[%s2845_s6 + $0x2c] ss:$0 sps:$4 sm:$0x33]  }
  0x66   : > { %2418 = vmatprep.mubr.msk.bf16.mxu0 %vm2774_vm0, %v2773_v1  ;;  %2454 = vmatprep.mubr.msk.bf16.mxu1 %vm2774_vm0, %v2773_v1  ;;  %v980_v40 = vshrl.u32 %v2745_v35, 16  ;;  %v3283_v28 = vld [vmem:[%s2845_s6 + $0x28] sm:$0xff]  }
  0x67   : > { %2472 = vmatprep.subr.bf16.mxu0 %v2773_v1  ;;  %2507 = vmatpush3.bf16.msra.mxu1 %v2723_v37  ;;  %v2741_v37 = vld [vmem:[%s3453_s1 + $0x1d8] sm:$0xff]   ;;  %v977_v38 = vor.u32 %v976_v34, %v973_v33  ;;  %v1557_v33 = vshll.u32 %v3283_v28, 16 }
  0x68   : > { %2508 = vmatprep.subr.bf16.mxu1 %v2773_v1  ;;  %v982_v47 = vrot.slane %v980_v40, 1  ;;  %v1356_v40 = vrot.slane %v3283_v28, 2 }
  0x69   : > { %2473 = vmatpush3.bf16.msra.mxu0 %v2724_v39  ;;  %v2742_v39 = vld [vmem:[%s3453_s1 + $0x190] sm:$0xff]  }
  0x6a   : > { %2474 = vmatprep.subr.bf16.mxu0 %v2773_v1 }
  0x6b   : > { %2509 = vmatpush3.bf16.msra.mxu1 %v2725_v41  ;;  %v983_v41 = vshll.u32 %v2745_v35, 16 }
  0x6c   : > { %2419 = vmatmul.mubr.bf16.gmra.mxu0 %v571_v42  ;;  %2510 = vmatprep.subr.bf16.mxu1 %v2773_v1  ;;  %v1153_v42 = vrot.slane %v3077_v36, 2  ;;  %v2744_v36 = vld [vmem:[%s3453_s1 + $0x188] sm:$0xff]  }
  0x6d   : > { %2455 = vmatmul.mubr.bf16.gmra.mxu1 %v774_v44  ;;  %2422 = vmatprep.mubr.msk.bf16.mxu0 %vm2774_vm0, %v2773_v1  ;;  %v1293_v44 = vld [vmem:[%s2845_s6 + $0x8] sm:$0xc]  ;;  %v985_v48 = vrot.slane %v983_v41, 2  ;;  %v2759_v41 = vld [vmem:[%s3453_s1 + $0x210] sm:$0xff]  }
  0x6e   : > { %2458 = vmatprep.mubr.msk.bf16.mxu1 %vm2774_vm0, %v2773_v1  ;;  %2475 = vmatpush3.bf16.msra.mxu0 %v2726_v45  ;;  %v3211_v45 = vld [vmem:[%s2845_s6 + $0xc] sm:$0xf]  ;;  %v1154_v49 = vsel %vm1145_vm4, %v1151_v29, %v1153_v42  ;;  %v1354_v29 = vrot.slane %v3262_v17, 2 }
  0x6f   : > { %2511 = vmatpush3.bf16.msra.mxu1 %v2728_v46  ;;  %2476 = vmatprep.subr.bf16.mxu0 %v2773_v1  ;;  %v978_v46 = vsel %vm934_vm3, %v968_v24, %v977_v38  ;;  %v2134_v50 = vcombine.low %v1293_v44, %v3211_v45 }
  0x70   : > { %2512 = vmatprep.subr.bf16.mxu1 %v2773_v1 }
  0x71   : > { %v1522_v57 = vshll.u32 %v2134_v50, 16  ;;  %v1349_v5 = vrot.slane %v2134_v50, 2 }
  0x72   : > { %2477 = vmatpush3.bf16.msra.mxu0 %v2729_v53  ;;  %v986_v53 = vor.u32 %v985_v48, %v982_v47  ;;  %v2761_v47 = vld [vmem:[%s2845_s6 + $0x30] ss:$0 sps:$4 sm:$0x33]  }
  0x73   : > { %2513 = vmatpush3.bf16.msra.mxu1 %v2730_v54  ;;  %2534 = vmatprep.subr.bf16.mxu0 %v2773_v1  ;;  %v1155_v54 = vrot.slane %v2745_v35, 2  ;;  %v1524_v0 = vrot.slane %v1522_v57, 3  ;;  %v2757_v35 = vld [vmem:[%s3453_s1 + $0x218] sm:$0xff]  }
  0x74   : > { %2423 = vmatmul.mubr.bf16.gmra.mxu0 %v573_v56  ;;  %2570 = vmatprep.subr.bf16.mxu1 %v2773_v1  ;;  %v1519_v56 = vshrl.u32 %v2134_v50, 16 }
  0x75   : > { %2459 = vmatmul.mubr.bf16.gmra.mxu1 %v776_v61  ;;  %2478 = vmatprep.mubr.msk.bf16.mxu0 %vm2774_vm0, %v2773_v1  ;;  %v987_v61 = vsel %vm934_vm3, %v977_v38, %v986_v53  ;;  %v1156_v62 = vsel %vm1145_vm4, %v1153_v42, %v1155_v54  ;;  %v1559_v38 = vrot.slane %v1557_v33, 3  ;;  %v2763_v54 = vld [vmem:[%s3453_s1 + $0x200] sm:$0xff]  }
  0x76   : > { %2514 = vmatprep.mubr.msk.bf16.mxu1 %vm2774_vm0, %v2773_v1  ;;  %v1521_v63 = vrot.slane %v1519_v56, 2 }
  0x7c   : > { %2479 = vmatmul.mubr.bf16.vlgmr.msra.gmra.mxu0 %v951_v6  ;;  %v1350_v6 = vrot.slane %v3222_v51, 2 }
  0x7d   : > { %2515 = vmatmul.mubr.bf16.vlgmr.msra.gmra.mxu1 %v1148_v11  ;;  %2535 = vmatpush3.bf16.msra.mxu0 %v2732_v7  ;;  %v1525_v7 = vor.u32 %v1524_v0, %v1521_v63  ;;  %v1539_v11 = vshll.u32 %v3245_v4, 16  ;;  %v1732_v0 = vrot.slane %v3245_v4, 3 }
  0x7e   : > { %2536 = vmatprep.subr.bf16.mxu0 %v2773_v1  ;;  %2482 = vmatprep.mubr.msk.bf16.mxu0 %vm2774_vm0, %v2773_v1 }
  0x7f   : > { %2518 = vmatprep.mubr.msk.bf16.mxu1 %vm2774_vm0, %v2773_v1  ;;  %2571 = vmatpush3.bf16.msra.mxu1 %v2734_v12  ;;  %v1351_v12 = vsel %vm1145_vm4, %v1349_v5, %v1350_v6  ;;  %v1534_v13 = vsel %vm1517_vm5, %v1525_v7, %v1533_v8  ;;  %v1541_v16 = vrot.slane %v1539_v11, 3 }
  0x80   : > { %2572 = vmatprep.subr.bf16.mxu1 %v2773_v1 }
  0x81   : > { %2537 = vmatpush3.bf16.msra.mxu0 %v2733_v10  ;;  %v2751_v10 = vld [vmem:[%s3453_s1 + $0x238] sm:$0xff]  }
  0x82   : > { %2538 = vmatprep.subr.bf16.mxu0 %v2773_v1 }
  0x83   : > { %2573 = vmatpush3.bf16.msra.mxu1 %v2736_v18  ;;  %v2752_v18 = vld [vmem:[%s3453_s1 + $0x230] sm:$0xff]  }
  0x84   : > { %2483 = vmatmul.mubr.bf16.gmra.mxu0 %v960_v15  ;;  %2574 = vmatprep.subr.bf16.mxu1 %v2773_v1  ;;  %v1352_v15 = vrot.slane %v3245_v4, 2 }
  0x85   : > { %2519 = vmatmul.mubr.bf16.gmra.mxu1 %v1150_v19  ;;  %2539 = vmatpush3.bf16.msra.mxu0 %v2735_v20  ;;  %v1542_v20 = vor.u32 %v1541_v16, %v1538_v14 }
  0x86   : > { %2486 = vmatprep.mubr.msk.bf16.mxu0 %vm2774_vm0, %v2773_v1  ;;  %2522 = vmatprep.mubr.msk.bf16.mxu1 %vm2774_vm0, %v2773_v1  ;;  %v1353_v19 = vsel %vm1145_vm4, %v1350_v6, %v1352_v15  ;;  %v1355_v34 = vsel %vm1145_vm4, %v1352_v15, %v1354_v29 }
  0x87   : > { %2540 = vmatprep.subr.bf16.mxu0 %v2773_v1  ;;  %2575 = vmatpush3.bf16.msra.mxu1 %v2738_v23  ;;  %v2754_v23 = vld [vmem:[%s3453_s1 + $0x228] sm:$0xff]   ;;  %v1543_v24 = vsel %vm1517_vm5, %v1533_v8, %v1542_v20 }
  0x88   : > { %2576 = vmatprep.subr.bf16.mxu1 %v2773_v1 }
  0x89   : > { %2541 = vmatpush3.bf16.msra.mxu0 %v2737_v25  ;;  %v1547_v25 = vrot.slane %v1545_v21, 2 }
  0x8a   : > { %2542 = vmatprep.subr.bf16.mxu0 %v2773_v1 }
  0x8b   : > { %2577 = vmatpush3.bf16.msra.mxu1 %v2740_v30  ;;  %v2756_v30 = vld [vmem:[%s3453_s1 + $0x220] sm:$0xff]  }
  0x8c   : > { %2487 = vmatmul.mubr.bf16.gmra.mxu0 %v969_v31  ;;  %2578 = vmatprep.subr.bf16.mxu1 %v2773_v1  ;;  %v1551_v31 = vor.u32 %v1550_v26, %v1547_v25 }
  0x8d   : > { %2523 = vmatmul.mubr.bf16.gmra.mxu1 %v1152_v27  ;;  %2543 = vmatpush3.bf16.msra.mxu0 %v2739_v32  ;;  %v1554_v32 = vshrl.u32 %v3283_v28, 16 }
  0x8e   : > { %2490 = vmatprep.mubr.msk.bf16.mxu0 %vm2774_vm0, %v2773_v1  ;;  %2526 = vmatprep.mubr.msk.bf16.mxu1 %vm2774_vm0, %v2773_v1  ;;  %v1552_v27 = vsel %vm1517_vm5, %v1542_v20, %v1551_v31 }
  0x8f   : > { %2544 = vmatprep.subr.bf16.mxu0 %v2773_v1  ;;  %2579 = vmatpush3.bf16.msra.mxu1 %v2741_v37  ;;  %v1556_v37 = vrot.slane %v1554_v32, 2 }
  0x90   : > { %2580 = vmatprep.subr.bf16.mxu1 %v2773_v1 }
  0x91   : > { %2545 = vmatpush3.bf16.msra.mxu0 %v2742_v39  ;;  %v3305_v39 = vld [vmem:[%s2845_s6 + $0x30] ss:$0 sps:$4 sm:$0x77]   ;;  %v1560_v42 = vor.u32 %v1559_v38, %v1556_v37 }
  0x92   : > { %2546 = vmatprep.subr.bf16.mxu0 %v2773_v1  ;;  %v1566_v44 = vshll.u32 %v3305_v39, 16 }
  0x93   : > { %2581 = vmatpush3.bf16.msra.mxu1 %v2743_v43  ;;  %v1563_v43 = vshrl.u32 %v3305_v39, 16  ;;  %v1561_v48 = vsel %vm1517_vm5, %v1551_v31, %v1560_v42 }
  0x94   : > { %2491 = vmatmul.mubr.bf16.gmra.mxu0 %v978_v46  ;;  %2582 = vmatprep.subr.bf16.mxu1 %v2773_v1  ;;  %v1357_v46 = vsel %vm1145_vm4, %v1354_v29, %v1356_v40  ;;  %v1568_v50 = vrot.slane %v1566_v44, 3 }
  0x95   : > { %2527 = vmatmul.mubr.bf16.gmra.mxu1 %v1154_v49  ;;  %2494 = vmatprep.mubr.msk.bf16.mxu0 %vm2774_vm0, %v2773_v1  ;;  %v2760_v49 = vld [vmem:[%s3453_s1 + $0x208] sm:$0xff]  }
  0x96   : > { %2530 = vmatprep.mubr.msk.bf16.mxu1 %vm2774_vm0, %v2773_v1  ;;  %2547 = vmatpush3.bf16.msra.mxu0 %v2744_v36  ;;  %v1565_v36 = vrot.slane %v1563_v43, 2 }
  0x97   : > { %2583 = vmatpush3.bf16.msra.mxu1 %v2746_v52  ;;  %2548 = vmatprep.subr.bf16.mxu0 %v2773_v1  ;;  %v1358_v52 = vrot.slane %v2761_v47, 2 }
  0x98   : > { %2584 = vmatprep.subr.bf16.mxu1 %v2773_v1  ;;  %v1569_v53 = vor.u32 %v1568_v50, %v1565_v36 }
  0x99   : > { %v1359_v56 = vsel %vm1145_vm4, %v1356_v40, %v1358_v52 }
  0x9a   : > { %2549 = vmatpush3.bf16.msra.mxu0 %v2747_v55  ;;  %v1707_v55 = vld [vmem:[%s2845_s6 + $0x8] sm:$0x8]  ;;  %v1570_v58 = vsel %vm1517_vm5, %v1560_v42, %v1569_v53  ;;  %s2659_s6 = smul.u32 80, %s3457_s13 }
  0x9b   : > { %2585 = vmatpush3.bf16.msra.mxu1 %v2748_v60  ;;  %2606 = vmatprep.subr.bf16.mxu0 %v2773_v1  ;;  %v2189_v57 = vcombine.low %v1707_v55, %v3211_v45  ;;  %v1730_v60 = vrot.slane %v3222_v51, 3  ;;  %v1736_v45 = vrot.slane %v3283_v28, 3  ;;  %v1738_v51 = vrot.slane %v3305_v39, 3 }
  0x9c   : > { %2495 = vmatmul.mubr.bf16.gmra.mxu0 %v987_v61  ;;  %2642 = vmatprep.subr.bf16.mxu1 %v2773_v1  ;;  %v1734_v61 = vrot.slane %v3262_v17, 3  ;;  %s3417_s20 = scalar_lea.vmem %s3455_s3, %s2659_s6 }
  0x9d   : > { %2531 = vmatmul.mubr.bf16.gmra.mxu1 %v1156_v62  ;;  %2550 = vmatprep.mubr.msk.bf16.mxu0 %vm2774_vm0, %v2773_v1  ;;  %v1729_v59 = vrot.slane %v2189_v57, 3  ;;  %v1733_v2 = vsel %vm1728_vm6, %v1730_v60, %v1732_v0  ;;  %v1739_v3 = vsel %vm1728_vm6, %v1736_v45, %v1738_v51 }
  0x9e   : > { %2586 = vmatprep.mubr.msk.bf16.mxu1 %vm2774_vm0, %v2773_v1  ;;  %v1737_v63 = vsel %vm1728_vm6, %v1734_v61, %v1736_v45  ;;  %v1735_v5 = vsel %vm1728_vm6, %v1732_v0, %v1734_v61 }
  0x9f   : > { %v1731_v62 = vsel %vm1728_vm6, %v1729_v59, %v1730_v60 }
  0xa4   : > { %2551 = vmatmul.mubr.bf16.vlgmr.msra.gmra.mxu0 %v1351_v12 }
  0xa5   : > { %2587 = vmatmul.mubr.bf16.vlgmr.msra.gmra.mxu1 %v1534_v13  ;;  %2607 = vmatpush3.bf16.msra.mxu0 %v2751_v10 }
  0xa6   : > { %2608 = vmatprep.subr.bf16.mxu0 %v2773_v1  ;;  %2554 = vmatprep.mubr.msk.bf16.mxu0 %vm2774_vm0, %v2773_v1 }
  0xa7   : > { %2590 = vmatprep.mubr.msk.bf16.mxu1 %vm2774_vm0, %v2773_v1  ;;  %2650 = vmatpush3.bf16.msra.mxu1 %v2751_v10 }
  0xa8   : > { %2643 = vmatprep.subr.bf16.mxu1 %v2773_v1 }
  0xa9   : > { %2609 = vmatpush3.bf16.msra.mxu0 %v2752_v18 }
  0xaa   : > { %2610 = vmatprep.subr.bf16.mxu0 %v2773_v1 }
  0xab   : > { %2651 = vmatpush3.bf16.msra.mxu1 %v2752_v18 }
  0xac   : > { %2555 = vmatmul.mubr.bf16.gmra.mxu0 %v1353_v19  ;;  %2644 = vmatprep.subr.bf16.mxu1 %v2773_v1 }
  0xad   : > { %2591 = vmatmul.mubr.bf16.gmra.mxu1 %v1543_v24  ;;  %2611 = vmatpush3.bf16.msra.mxu0 %v2754_v23 }
  0xae   : > { %2558 = vmatprep.mubr.msk.bf16.mxu0 %vm2774_vm0, %v2773_v1  ;;  %2594 = vmatprep.mubr.msk.bf16.mxu1 %vm2774_vm0, %v2773_v1 }
  0xaf   : > { %2612 = vmatprep.subr.bf16.mxu0 %v2773_v1  ;;  %2652 = vmatpush3.bf16.msra.mxu1 %v2754_v23 }
  0xb0   : > { %2645 = vmatprep.subr.bf16.mxu1 %v2773_v1 }
  0xb1   : > { %2613 = vmatpush3.bf16.msra.mxu0 %v2756_v30 }
  0xb2   : > { %2614 = vmatprep.subr.bf16.mxu0 %v2773_v1 }
  0xb3   : > { %2653 = vmatpush3.bf16.msra.mxu1 %v2756_v30 }
  0xb4   : > { %2559 = vmatmul.mubr.bf16.gmra.mxu0 %v1355_v34  ;;  %2646 = vmatprep.subr.bf16.mxu1 %v2773_v1 }
  0xb5   : > { %2595 = vmatmul.mubr.bf16.gmra.mxu1 %v1552_v27  ;;  %2615 = vmatpush3.bf16.msra.mxu0 %v2757_v35 }
  0xb6   : > { %2562 = vmatprep.mubr.msk.bf16.mxu0 %vm2774_vm0, %v2773_v1  ;;  %2598 = vmatprep.mubr.msk.bf16.mxu1 %vm2774_vm0, %v2773_v1 }
  0xb7   : > { %2654 = vmatpush3.bf16.msra.mxu1 %v2757_v35  ;;  %2616 = vmatprep.subr.bf16.mxu0 %v2773_v1 }
  0xb8   : > { %2647 = vmatprep.subr.bf16.mxu1 %v2773_v1 }
  0xb9   : > { %2617 = vmatpush3.bf16.msra.mxu0 %v2759_v41 }
  0xba   : > { %2618 = vmatprep.subr.bf16.mxu0 %v2773_v1 }
  0xbb   : > { %2655 = vmatpush3.bf16.msra.mxu1 %v2759_v41 }
  0xbc   : > { %2563 = vmatmul.mubr.bf16.gmra.mxu0 %v1357_v46  ;;  %2648 = vmatprep.subr.bf16.mxu1 %v2773_v1 }
  0xbd   : > { %2599 = vmatmul.mubr.bf16.gmra.mxu1 %v1561_v48  ;;  %2566 = vmatprep.mubr.msk.bf16.mxu0 %vm2774_vm0, %v2773_v1 }
  0xbe   : > { %2602 = vmatprep.mubr.msk.bf16.mxu1 %vm2774_vm0, %v2773_v1  ;;  %2619 = vmatpush3.bf16.msra.mxu0 %v2760_v49 }
  0xbf   : > { %2656 = vmatpush3.bf16.msra.mxu1 %v2760_v49  ;;  %2620 = vmatprep.subr.bf16.mxu0 %v2773_v1 }
  0xc0   : > { %2649 = vmatprep.subr.bf16.mxu1 %v2773_v1 }
  0xc2   : > { %2621 = vmatpush3.bf16.msra.mxu0 %v2763_v54 }
  0xc3   : > { %2657 = vmatpush3.bf16.msra.mxu1 %v2763_v54 }
  0xc4   : > { %2567 = vmatmul.mubr.bf16.gmra.mxu0 %v1359_v56 }
  0xc5   : > { %2603 = vmatmul.mubr.bf16.gmra.mxu1 %v1570_v58  ;;  %2622 = vmatprep.mubr.msk.bf16.mxu0 %vm2774_vm0, %v2773_v1 }
  0xc6   : > { %2634 = vmatprep.mubr.msk.bf16.mxu1 %vm2774_vm0, %v2773_v1 }
  0xcc   : > { %2623 = vmatmul.mubr.bf16.vlgmr.msra.gmra.mxu0 %v1731_v62 }
  0xcd   : > { %2635 = vmatmul.mubr.bf16.vlgmr.msra.gmra.mxu1 %v1737_v63  ;;  %2626 = vmatprep.mubr.msk.bf16.mxu0 %vm2774_vm0, %v2773_v1 }
  0xce   : > { %2638 = vmatprep.mubr.msk.bf16.mxu1 %vm2774_vm0, %v2773_v1 }
  0xd4   : > { %2627 = vmatmul.mubr.bf16.gmra.mxu0 %v1733_v2 }
  0xd5   : > { %2639 = vmatmul.mubr.bf16.gmra.mxu1 %v1739_v3  ;;  %2630 = vmatprep.mubr.msk.bf16.mxu0 %vm2774_vm0, %v2773_v1 }
  0xdc   : > { %2631 = vmatmul.mubr.bf16.gmra.mxu0 %v1735_v5 }
  0xec   : > { %v376_v6 = vpop.f32.mrf.mxu0 }
  0xed   : > { %v502_v7 = vpop.f32.mrf.mxu1 }
  0xee   : > { %v503_v4 = vadd.f32 %v502_v7, %v376_v6  ;;  %v2336_v8 = vpop.f32.mrf.mxu0 }
  0xef   : > { %v2372_v9 = vpop.f32.mrf.mxu1 }
  0xf0   : > { %v379_v11 = vpop.f32.mrf.mxu0 }
  0xf1   : > { %v505_v12 = vpop.f32.mrf.mxu1 }
  0xf2   : > { %v506_v10 = vadd.f32 %v505_v12, %v379_v11  ;;  %v2337_v13 = vpop.f32.mrf.mxu0 }
  0xf3   : > { %v2373_v14 = vpop.f32.mrf.mxu1 }
  0xf4   : > { %v384_v16 = vpop.f32.mrf.mxu0 }
  0xf5   : > { %v510_v17 = vpop.f32.mrf.mxu1 }
  0xf6   : > { %v511_v18 = vadd.f32 %v510_v17, %v384_v16  ;;  %v2340_v15 = vpop.f32.mrf.mxu0 }
  0xf7   : > { %v2376_v20 = vpop.f32.mrf.mxu1 }
  0xf8   : > { %v387_v21 = vpop.f32.mrf.mxu0 }
  0xf9   : > { %v513_v1 = vpop.f32.mrf.mxu1 }
  0xfa   : > { %v514_v22 = vadd.f32 %v513_v1, %v387_v21  ;;  %v2341_v19 = vpop.f32.mrf.mxu0 }
  0xfb   : > { %v2377_v23 = vpop.f32.mrf.mxu1 }
  0xfc   : > { %v392_v24 = vpop.f32.mrf.mxu0 }
  0xfd   : > { %v518_v25 = vpop.f32.mrf.mxu1 }
  0xfe   : > { %v519_v26 = vadd.f32 %v518_v25, %v392_v24  ;;  %v2344_v28 = vpop.f32.mrf.mxu0 }
  0xff   : > { %v2380_v29 = vpop.f32.mrf.mxu1 }
 0x100   : > { %v395_v30 = vpop.f32.mrf.mxu0 }
 0x101   : > { %v521_v31 = vpop.f32.mrf.mxu1 }
 0x102   : > { %v522_v32 = vadd.f32 %v521_v31, %v395_v30  ;;  %v2345_v33 = vpop.f32.mrf.mxu0 }
 0x103   : > { %v2381_v34 = vpop.f32.mrf.mxu1 }
 0x104   : > { %v400_v35 = vpop.f32.mrf.mxu0 }
 0x105   : > { %v526_v27 = vpop.f32.mrf.mxu1 }
 0x106   : > { %v527_v37 = vadd.f32 %v526_v27, %v400_v35  ;;  %v2348_v38 = vpop.f32.mrf.mxu0 }
 0x107   : > { %v2384_v39 = vpop.f32.mrf.mxu1 }
 0x108   : > { %v403_v40 = vpop.f32.mrf.mxu0 }
 0x109   : > { %v529_v41 = vpop.f32.mrf.mxu1 }
 0x10a   : > { %v530_v42 = vadd.f32 %v529_v41, %v403_v40  ;;  %v2349_v43 = vpop.f32.mrf.mxu0 }
 0x10b   : > { %v2385_v44 = vpop.f32.mrf.mxu1 }
 0x10c   : > { %v408_v46 = vpop.f32.mrf.mxu0 }
 0x10d   : > { %v534_v47 = vpop.f32.mrf.mxu1 }
 0x10e   : > { %v535_v48 = vadd.f32 %v534_v47, %v408_v46  ;;  %v2352_v49 = vpop.f32.mrf.mxu0 }
 0x10f   : > { %v2388_v36 = vpop.f32.mrf.mxu1 }
 0x110   : > { %v411_v50 = vpop.f32.mrf.mxu0 }
 0x111   : > { %v537_v52 = vpop.f32.mrf.mxu1 }
 0x112   : > { %v538_v53 = vadd.f32 %v537_v52, %v411_v50  ;;  %v2353_v54 = vpop.f32.mrf.mxu0 }
 0x113   : > { %v2389_v55 = vpop.f32.mrf.mxu1 }
 0x114   : > { %v661_v56 = vpop.f32.mrf.mxu0 }
 0x115   : > { %v700_v57 = vadd.f32 %v661_v56, %v503_v4  ;;  %v864_v58 = vpop.f32.mrf.mxu1 }
 0x116   : > { %v2408_v59 = vpop.f32.mrf.mxu0 }
 0x117   : > { %v903_v60 = vadd.f32 %v864_v58, %v700_v57  ;;  %v2444_v61 = vpop.f32.mrf.mxu1 }
 0x118   : > { %v664_v45 = vpop.f32.mrf.mxu0 }
 0x119   : > { %v701_v62 = vadd.f32 %v664_v45, %v506_v10  ;;  %v867_v63 = vpop.f32.mrf.mxu1 }
 0x11a   : > { %v2409_v0 = vpop.f32.mrf.mxu0 }
 0x11b   : > { %v904_v51 = vadd.f32 %v867_v63, %v701_v62  ;;  %v2445_v2 = vpop.f32.mrf.mxu1 }
 0x11c   : > { %v669_v3 = vpop.f32.mrf.mxu0 }
 0x11d   : > { %v702_v5 = vadd.f32 %v669_v3, %v511_v18  ;;  %v872_v6 = vpop.f32.mrf.mxu1 }
 0x11e   : > { %v2412_v7 = vpop.f32.mrf.mxu0 }
 0x11f   : > { %v905_v8 = vadd.f32 %v872_v6, %v702_v5  ;;  %v2448_v9 = vpop.f32.mrf.mxu1 }
 0x120   : > { %v672_v11 = vpop.f32.mrf.mxu0 }
 0x121   : > { %v703_v12 = vadd.f32 %v672_v11, %v514_v22  ;;  %v875_v13 = vpop.f32.mrf.mxu1 }
 0x122   : > { %v2413_v4 = vpop.f32.mrf.mxu0 }
 0x123   : > { %v906_v14 = vadd.f32 %v875_v13, %v703_v12  ;;  %v2449_v16 = vpop.f32.mrf.mxu1 }
 0x124   : > { %v677_v17 = vpop.f32.mrf.mxu0 }
 0x125   : > { %v704_v15 = vadd.f32 %v677_v17, %v519_v26  ;;  %v880_v20 = vpop.f32.mrf.mxu1 }
 0x126   : > { %v2416_v10 = vpop.f32.mrf.mxu0 }
 0x127   : > { %v907_v21 = vadd.f32 %v880_v20, %v704_v15  ;;  %v2452_v1 = vpop.f32.mrf.mxu1 }
 0x128   : > { %v680_v19 = vpop.f32.mrf.mxu0 }
 0x129   : > { %v705_v23 = vadd.f32 %v680_v19, %v522_v32  ;;  %v883_v24 = vpop.f32.mrf.mxu1 }
 0x12a   : > { %v2417_v18 = vpop.f32.mrf.mxu0 }
 0x12b   : > { %v908_v25 = vadd.f32 %v883_v24, %v705_v23  ;;  %v2453_v28 = vpop.f32.mrf.mxu1 }
 0x12c   : > { %v685_v29 = vpop.f32.mrf.mxu0 }
 0x12d   : > { %v706_v30 = vadd.f32 %v685_v29, %v527_v37  ;;  %v888_v31 = vpop.f32.mrf.mxu1 }
 0x12e   : > { %v2420_v22 = vpop.f32.mrf.mxu0 }
 0x12f   : > { %v3361_v33 = vadd.f32 %v888_v31, %v706_v30  ;;  %v2456_v34 = vpop.f32.mrf.mxu1 }
 0x130   : > { %v688_v35 = vpop.f32.mrf.mxu0 }
 0x131   : > { %v707_v27 = vadd.f32 %v688_v35, %v530_v42  ;;  %v891_v26 = vpop.f32.mrf.mxu1 }
 0x132   : > { %v2421_v38 = vpop.f32.mrf.mxu0 }
 0x133   : > { %v3363_v39 = vadd.f32 %v891_v26, %v707_v27  ;;  %v2457_v40 = vpop.f32.mrf.mxu1 }
 0x134   : > { %v693_v41 = vpop.f32.mrf.mxu0 }
 0x135   : > { %v708_v32 = vadd.f32 %v693_v41, %v535_v48  ;;  %v896_v43 = vpop.f32.mrf.mxu1 }
 0x136   : > { %v2424_v44 = vpop.f32.mrf.mxu0 }
 0x137   : > { %v3365_v46 = vadd.f32 %v896_v43, %v708_v32  ;;  %v2460_v47 = vpop.f32.mrf.mxu1 }
 0x138   : > { %v696_v37 = vpop.f32.mrf.mxu0 }
 0x139   : > { %v709_v49 = vadd.f32 %v696_v37, %v538_v53  ;;  %v899_v36 = vpop.f32.mrf.mxu1 }
 0x13a   : > { %v2425_v50 = vpop.f32.mrf.mxu0 }
 0x13b   : > { %v3367_v52 = vadd.f32 %v899_v36, %v709_v49  ;;  %v2461_v54 = vpop.f32.mrf.mxu1 }
 0x13c   : > { %v1075_v42 = vpop.f32.mrf.mxu0 }
 0x13d   : > { %v1114_v55 = vadd.f32 %v1075_v42, %v903_v60  ;;  %v1244_v56 = vpop.f32.mrf.mxu1 }
 0x13e   : > { %v2480_v57 = vpop.f32.mrf.mxu0 }
 0x13f   : > { %v3369_v58 = vadd.f32 %v1244_v56, %v1114_v55  ;;  %v2516_v59 = vpop.f32.mrf.mxu1 }
 0x140   : > { %v1078_v48 = vpop.f32.mrf.mxu0 }
 0x141   : > { %v1115_v61 = vadd.f32 %v1078_v48, %v904_v51  ;;  %v1247_v45 = vpop.f32.mrf.mxu1 }
 0x142   : > { %v2481_v62 = vpop.f32.mrf.mxu0 }
 0x143   : > { %v3371_v63 = vadd.f32 %v1247_v45, %v1115_v61  ;;  %v2517_v0 = vpop.f32.mrf.mxu1 }
 0x144   : > { %v1083_v53 = vpop.f32.mrf.mxu0 }
 0x145   : > { %v1116_v2 = vadd.f32 %v1083_v53, %v905_v8  ;;  %v1252_v3 = vpop.f32.mrf.mxu1 }
 0x146   : > { %v2484_v5 = vpop.f32.mrf.mxu0 }
 0x147   : > { %v3373_v6 = vadd.f32 %v1252_v3, %v1116_v2  ;;  %v2520_v7 = vpop.f32.mrf.mxu1 }
 0x148   : > { %v1086_v60 = vpop.f32.mrf.mxu0 }
 0x149   : > { %v1117_v9 = vadd.f32 %v1086_v60, %v906_v14  ;;  %v1255_v11 = vpop.f32.mrf.mxu1 }
 0x14a   : > { %v2485_v12 = vpop.f32.mrf.mxu0 }
 0x14b   : > { %v3375_v13 = vadd.f32 %v1255_v11, %v1117_v9  ;;  %v2521_v4 = vpop.f32.mrf.mxu1 }
 0x14c   : > { %v1091_v51 = vpop.f32.mrf.mxu0 }
 0x14d   : > { %v1118_v16 = vadd.f32 %v1091_v51, %v907_v21  ;;  %v1260_v17 = vpop.f32.mrf.mxu1 }
 0x14e   : > { %v2488_v15 = vpop.f32.mrf.mxu0 }
 0x14f   : > { %v3377_v20 = vadd.f32 %v1260_v17, %v1118_v16  ;;  %v2524_v10 = vpop.f32.mrf.mxu1 }
 0x150   : > { %v1094_v8 = vpop.f32.mrf.mxu0 }
 0x151   : > { %v1119_v1 = vadd.f32 %v1094_v8, %v908_v25  ;;  %v1263_v19 = vpop.f32.mrf.mxu1 }
 0x152   : > { %v2489_v23 = vpop.f32.mrf.mxu0 }
 0x153   : > { %v3379_v24 = vadd.f32 %v1263_v19, %v1119_v1  ;;  %v2525_v18 = vpop.f32.mrf.mxu1 }
 0x154   : > { %v1099_v14 = vpop.f32.mrf.mxu0 }
 0x155   : > { %v1268_v28 = vpop.f32.mrf.mxu1  ;;  %v1120_v17 = vadd.f32 %v1099_v14, %v3361_v33 }
 0x156   : > { %v2492_v29 = vpop.f32.mrf.mxu0 }
 0x157   : > { %v2528_v30 = vpop.f32.mrf.mxu1  ;;  %v1289_v19 = vadd.f32 %v1268_v28, %v1120_v17 }
 0x158   : > { %v1102_v31 = vpop.f32.mrf.mxu0 }
 0x159   : > { %v1271_v22 = vpop.f32.mrf.mxu1  ;;  %v1121_v23 = vadd.f32 %v1102_v31, %v3363_v39  ;;  %v3408_v39 = vld [vmem:[%s3454_s2] ss:$0 sm:$0xff] }
 0x15a   : > { %v2493_v34 = vpop.f32.mrf.mxu0 }
 0x15b   : > { %v2529_v21 = vpop.f32.mrf.mxu1 }
 0x15c   : > { %v1107_v35 = vpop.f32.mrf.mxu0 }
 0x15d   : > { %v3381_v27 = vpop.f32.mrf.mxu1 }
 0x15e   : > { %v2496_v26 = vpop.f32.mrf.mxu0 }
 0x15f   : > { %v2532_v38 = vpop.f32.mrf.mxu1 }
 0x160   : > { %v1110_v40 = vpop.f32.mrf.mxu0  ;;  %v1290_v38 = vadd.f32 %v1271_v22, %v1121_v23 }
 0x161   : > { %v3383_v25 = vpop.f32.mrf.mxu1 }
 0x162   : > { %v2497_v41 = vpop.f32.mrf.mxu0 }
 0x163   : > { %v2533_v32 = vpop.f32.mrf.mxu1  ;;  %v1122_v41 = vadd.f32 %v1107_v35, %v3365_v46  ;;  %v1123_v46 = vadd.f32 %v1110_v40, %v3367_v52 }
 0x164   : > { %v1447_v43 = vpop.f32.mrf.mxu0 }
 0x165   : > { %v1658_v44 = vpop.f32.mrf.mxu1  ;;  %v1486_v29 = vadd.f32 %v1447_v43, %v3369_v58  ;;  %v1291_v22 = vadd.f32 %v3381_v27, %v1122_v41 }
 0x166   : > { %v2552_v47 = vpop.f32.mrf.mxu0 }
 0x167   : > { %v2588_v37 = vpop.f32.mrf.mxu1  ;;  %v1697_v33 = vadd.f32 %v1658_v44, %v1486_v29 }
 0x168   : > { %v1450_v49 = vpop.f32.mrf.mxu0 }
 0x169   : > { %v1661_v36 = vpop.f32.mrf.mxu1  ;;  %v1487_v14 = vadd.f32 %v1450_v49, %v3371_v63 }
 0x16a   : > { %v2553_v50 = vpop.f32.mrf.mxu0 }
 0x16b   : > { %v2589_v54 = vpop.f32.mrf.mxu1  ;;  %v1698_v44 = vadd.f32 %v1661_v36, %v1487_v14 }
 0x16c   : > { %v1455_v42 = vpop.f32.mrf.mxu0 }
 0x16d   : > { %v3385_v55 = vpop.f32.mrf.mxu1  ;;  %v1488_v63 = vadd.f32 %v1455_v42, %v3373_v6  ;;  %v1292_v6 = vadd.f32 %v3383_v25, %v1123_v46 }
 0x16e   : > { %v2556_v56 = vpop.f32.mrf.mxu0 }
 0x16f   : > { %v2592_v57 = vpop.f32.mrf.mxu1 }
 0x170   : > { %v3387_v59 = vpop.f32.mrf.mxu0 }
 0x171   : > { %v3389_v48 = vpop.f32.mrf.mxu1 }
 0x172   : > { %v2557_v61 = vpop.f32.mrf.mxu0 }
 0x173   : > { %v2593_v45 = vpop.f32.mrf.mxu1 }
 0x174   : > { %v3391_v62 = vpop.f32.mrf.mxu0 }
 0x175   : > { %v3393_v0 = vpop.f32.mrf.mxu1 }
 0x176   : > { %v2560_v53 = vpop.f32.mrf.mxu0 }
 0x177   : > { %v2596_v2 = vpop.f32.mrf.mxu1 }
 0x178   : > { %v3395_v3 = vpop.f32.mrf.mxu0  ;;  %v1699_v2 = vadd.f32 %v3385_v55, %v1488_v63 }
 0x179   : > { %v3397_v5 = vpop.f32.mrf.mxu1 }
 0x17a   : > { %v2561_v7 = vpop.f32.mrf.mxu0 }
 0x17b   : > { %v2597_v60 = vpop.f32.mrf.mxu1  ;;  %v1489_v7 = vadd.f32 %v3387_v59, %v3375_v13  ;;  %v1490_v59 = vadd.f32 %v3391_v62, %v3377_v20  ;;  %v1491_v62 = vadd.f32 %v3395_v3, %v3379_v24 }
 0x17c   : > { %v1471_v9 = vpop.f32.mrf.mxu0 }
 0x17d   : > { %v1682_v11 = vpop.f32.mrf.mxu1  ;;  %v1492_v34 = vadd.f32 %v1471_v9, %v1289_v19  ;;  %v1700_v13 = vadd.f32 %v3389_v48, %v1489_v7  ;;  %v1701_v20 = vadd.f32 %v3393_v0, %v1490_v59 }
 0x17e   : > { %v2564_v12 = vpop.f32.mrf.mxu0 }
 0x17f   : > { %v2600_v4 = vpop.f32.mrf.mxu1  ;;  %v1703_v37 = vadd.f32 %v1682_v11, %v1492_v34 }
 0x180   : > { %v1474_v51 = vpop.f32.mrf.mxu0 }
 0x181   : > { %v1685_v16 = vpop.f32.mrf.mxu1  ;;  %v1493_v28 = vadd.f32 %v1474_v51, %v1290_v38 }
 0x182   : > { %v2565_v15 = vpop.f32.mrf.mxu0 }
 0x183   : > { %v2601_v10 = vpop.f32.mrf.mxu1  ;;  %v1704_v56 = vadd.f32 %v1685_v16, %v1493_v28 }
 0x184   : > { %v1479_v8 = vpop.f32.mrf.mxu0 }
 0x185   : > { %v1690_v1 = vpop.f32.mrf.mxu1  ;;  %v1494_v57 = vadd.f32 %v1479_v8, %v1291_v22 }
 0x186   : > { %v2568_v18 = vpop.f32.mrf.mxu0 }
 0x187   : > { %v2604_v30 = vpop.f32.mrf.mxu1  ;;  %v1705_v11 = vadd.f32 %v1690_v1, %v1494_v57 }
 0x188   : > { %v1482_v21 = vpop.f32.mrf.mxu0 }
 0x189   : > { %v1693_v26 = vpop.f32.mrf.mxu1  ;;  %v1495_v12 = vadd.f32 %v1482_v21, %v1292_v6 }
 0x18a   : > { %v2569_v32 = vpop.f32.mrf.mxu0 }
 0x18b   : > { %v2605_v47 = vpop.f32.mrf.mxu1  ;;  %v1706_v19 = vadd.f32 %v1693_v26, %v1495_v12 }
 0x18c   : > { %v1827_v50 = vpop.f32.mrf.mxu0 }
 0x18d   : > { %v1866_v58 = vadd.f32 %v1827_v50, %v1697_v33  ;;  %v1851_v31 = vpop.f32.mrf.mxu1  ;;  %v1702_v50 = vadd.f32 %v3397_v5, %v1491_v62 }
 0x18e   : > { %v1872_v35 = vadd.f32 %v1851_v31, %v1703_v37  ;;  %v2624_v43 = vpop.f32.mrf.mxu0 }
 0x18f   : > { %v1883_v49 = vadd.f32 %v3408_v39, %v1866_v58  ;;  %v2636_v54 = vpop.f32.mrf.mxu1 }
 0x190   : > { %v1889_v27 = vadd.f32 %v3408_v39, %v1872_v35  ;;  %v1830_v52 = vpop.f32.mrf.mxu0 }
 0x191   : > { %v1893_v40 = vmax.f32 %v1883_v49, 0.0  ;;  %v1867_v61 = vadd.f32 %v1830_v52, %v1698_v44  ;;  %v1854_v36 = vpop.f32.mrf.mxu1 }
 0x192   : > { %v1899_v42 = vmax.f32 %v1889_v27, 0.0  ;;  %v1873_v45 = vadd.f32 %v1854_v36, %v1704_v56  ;;  %v2625_v53 = vpop.f32.mrf.mxu0 }
 0x193   : > { %1903 = vst [vmem:[%s3417_s20] sm:$0xff] %v1893_v40  ;;  %v1884_v60 = vadd.f32 %v3408_v39, %v1867_v61  ;;  %v2637_v9 = vpop.f32.mrf.mxu1 }
 0x194   : > { %1909 = vst [vmem:[%s3417_s20 + $0x30] sm:$0xff] %v1899_v42  ;;  %v1890_v4 = vadd.f32 %v3408_v39, %v1873_v45  ;;  %v1835_v25 = vpop.f32.mrf.mxu0 }
 0x195   : > { %v1894_v51 = vmax.f32 %v1884_v60, 0.0  ;;  %v1868_v16 = vadd.f32 %v1835_v25, %v1699_v2  ;;  %v1859_v17 = vpop.f32.mrf.mxu1 }
 0x196   : > { %v1900_v15 = vmax.f32 %v1890_v4, 0.0  ;;  %v1874_v55 = vadd.f32 %v1859_v17, %v1705_v11  ;;  %v2628_v10 = vpop.f32.mrf.mxu0 }
 0x197   : > { %1904 = vst [vmem:[%s3417_s20 + $0x8] sm:$0xff] %v1894_v51  ;;  %v1885_v8 = vadd.f32 %v3408_v39, %v1868_v16  ;;  %v2640_v1 = vpop.f32.mrf.mxu1 }
 0x198   : > { %1910 = vst [vmem:[%s3417_s20 + $0x38] sm:$0xff] %v1900_v15  ;;  %v1891_v23 = vadd.f32 %v3408_v39, %v1874_v55  ;;  %v1838_v18 = vpop.f32.mrf.mxu0 }
 0x199   : > { %v1895_v29 = vmax.f32 %v1885_v8, 0.0  ;;  %v1869_v30 = vadd.f32 %v1838_v18, %v1700_v13  ;;  %v1862_v34 = vpop.f32.mrf.mxu1 }
 0x19a   : > { %v1901_v21 = vmax.f32 %v1891_v23, 0.0  ;;  %v1875_v48 = vadd.f32 %v1862_v34, %v1706_v19  ;;  %v2629_v38 = vpop.f32.mrf.mxu0 }
 0x19b   : > { %1905 = vst [vmem:[%s3417_s20 + $0x10] sm:$0xff] %v1895_v29  ;;  %v1886_v26 = vadd.f32 %v3408_v39, %v1869_v30  ;;  %v2641_v41 = vpop.f32.mrf.mxu1 }
 0x19c   : > { %1911 = vst [vmem:[%s3417_s20 + $0x40] sm:$0xff] %v1901_v21  ;;  %v1892_v32 = vadd.f32 %v3408_v39, %v1875_v48  ;;  %v1843_v33 = vpop.f32.mrf.mxu0 }
 0x19d   : > { %v1896_v14 = vmax.f32 %v1886_v26, 0.0  ;;  %v1870_v47 = vadd.f32 %v1843_v33, %v1701_v20 }
 0x19e   : > { %v1902_v37 = vmax.f32 %v1892_v32, 0.0  ;;  %v2632_v28 = vpop.f32.mrf.mxu0 }
 0x19f   : > { %1906 = vst [vmem:[%s3417_s20 + $0x18] sm:$0xff] %v1896_v14  ;;  %v1887_v0 = vadd.f32 %v3408_v39, %v1870_v47 }
 0x1a0   : > { %1912 = vst [vmem:[%s3417_s20 + $0x48] sm:$0xff] %v1902_v37  ;;  %v1846_v24 = vpop.f32.mrf.mxu0 }
 0x1a1   : > { %v1897_v3 = vmax.f32 %v1887_v0, 0.0  ;;  %v1871_v58 = vadd.f32 %v1846_v24, %v1702_v50 }
 0x1a2   : > { %v2633_v31 = vpop.f32.mrf.mxu0 }
 0x1a3   : > { %1907 = vst [vmem:[%s3417_s20 + $0x20] sm:$0xff] %v1897_v3  ;;  %v1888_v22 = vadd.f32 %v3408_v39, %v1871_v58 }
 0x1a5   : > { %v1898_v46 = vmax.f32 %v1888_v22, 0.0 }
 0x1a7   : > { %1908 = vst [vmem:[%s3417_s20 + $0x28] sm:$0xff] %v1898_v46 }
 0x1a8 PF: > { %s13_s12 = sadd.s32 1, %s2771_s12  }
 0x1a9   : > { %p10_p4 = scmp.ge.s32.totalorder %s13_s12, 4  }
 0x1ab   :  { %12 = sbr.rel (!%p10_p4) target bundleno = 1 (0x1), region = 70 }

</bundles_post_ra>
